<compile_context>
chip_gen: v6e
topology: v6e:2x2x1
jax: 0.10.0
libtpu: 0.0.40
codegen_flags: <defaults>
</compile_context>

<pallas_src>
import functools

import jax
import jax.numpy as jnp
from jax.experimental import pallas as pl
from jax.experimental.pallas import tpu as pltpu


def _round_up(x, m):
    return (x + m - 1) // m * m


# ----------------------------------------------------------------------------
# Pallas kernel: fused matmul + bias + optional ReLU (M-tiled grid)
# ----------------------------------------------------------------------------
def _matmul_bias_act_kernel(a_ref, w_ref, b_ref, o_ref, *, relu):
    acc = jnp.dot(a_ref[...], w_ref[...], preferred_element_type=jnp.float32)
    acc = acc + b_ref[...]                      # (1, Np) broadcasts over rows
    if relu:
        acc = jnp.maximum(acc, 0.0)
    o_ref[...] = acc.astype(o_ref.dtype)


def matmul_bias_act(a, w_p, b_p, *, n_out, relu, out_dtype):
    """a: (M, K); w_p: (Kp, Np) bf16 pre-padded; b_p: (1, Np) f32 pre-padded."""
    M, K = a.shape
    Kp, Np = w_p.shape
    assert K <= Kp
    tm = min(256, _round_up(M, 16))             # 16: bf16 sublane packing
    Mp = _round_up(M, tm)
    a_p = jnp.pad(a.astype(jnp.bfloat16), ((0, Mp - M), (0, Kp - K)))

    out = pl.pallas_call(
        functools.partial(_matmul_bias_act_kernel, relu=relu),
        out_shape=jax.ShapeDtypeStruct((Mp, Np), out_dtype),
        grid=(Mp // tm,),
        in_specs=[
            pl.BlockSpec((tm, Kp), lambda i: (i, 0)),   # A: streamed M tiles
            pl.BlockSpec((Kp, Np), lambda i: (0, 0)),   # W: resident
            pl.BlockSpec((1, Np), lambda i: (0, 0)),    # bias: resident
        ],
        out_specs=pl.BlockSpec((tm, Np), lambda i: (i, 0)),
        compiler_params=pltpu.CompilerParams(
            dimension_semantics=("parallel",)),
    )(a_p, w_p, b_p)
    return out[:M, :n_out]


# ----------------------------------------------------------------------------
# Pallas kernel: fc (bias + ReLU) fused with the critic head
# ----------------------------------------------------------------------------
def _fc_critic_kernel(a_ref, wf_ref, bf_ref, wc_ref, bc_ref, feat_ref, val_ref):
    h = jnp.dot(a_ref[...], wf_ref[...], preferred_element_type=jnp.float32)
    h = jnp.maximum(h + bf_ref[...], 0.0)
    feat_ref[...] = h.astype(feat_ref.dtype)
    v = jnp.dot(h.astype(jnp.bfloat16), wc_ref[...],
                preferred_element_type=jnp.float32)
    val_ref[...] = (v + bc_ref[...]).astype(val_ref.dtype)


def fc_critic(a, wf_p, bf_p, wc_p, bc_p, *, hidden):
    M, K = a.shape
    Kp, Nf = wf_p.shape
    Kc, Nc = wc_p.shape
    assert Kc == Nf
    tm = min(256, _round_up(M, 16))
    Mp = _round_up(M, tm)
    a_p = jnp.pad(a.astype(jnp.bfloat16), ((0, Mp - M), (0, Kp - K)))

    feat, val = pl.pallas_call(
        _fc_critic_kernel,
        out_shape=(jax.ShapeDtypeStruct((Mp, Nf), jnp.float32),
                   jax.ShapeDtypeStruct((Mp, Nc), jnp.float32)),
        grid=(Mp // tm,),
        in_specs=[
            pl.BlockSpec((tm, Kp), lambda i: (i, 0)),
            pl.BlockSpec((Kp, Nf), lambda i: (0, 0)),
            pl.BlockSpec((1, Nf), lambda i: (0, 0)),
            pl.BlockSpec((Kc, Nc), lambda i: (0, 0)),
            pl.BlockSpec((1, Nc), lambda i: (0, 0)),
        ],
        out_specs=(pl.BlockSpec((tm, Nf), lambda i: (i, 0)),
                   pl.BlockSpec((tm, Nc), lambda i: (i, 0))),
        compiler_params=pltpu.CompilerParams(
            dimension_semantics=("parallel",)),
    )(a_p, wf_p, bf_p, wc_p, bc_p)
    return feat[:M, :hidden], val[:M, :1]


# ----------------------------------------------------------------------------
# Conv2d (NHWC, VALID padding) as im2col + Pallas matmul
# ----------------------------------------------------------------------------
def _im2col_nhwc(x, k, stride):
    """x: (N, H, W, C) -> patches (N*Ho*Wo, k*k*C) ordered (kh, kw, c)."""
    N, H, W, C = x.shape
    Ho = (H - k) // stride + 1
    Wo = (W - k) // stride + 1
    cols = []
    for i in range(k):
        for j in range(k):
            cols.append(x[:, i:i + stride * Ho:stride,
                          j:j + stride * Wo:stride, :])     # (N, Ho, Wo, C)
    patches = jnp.concatenate(cols, axis=-1)                 # (N, Ho, Wo, k*k*C)
    return patches.reshape(N * Ho * Wo, k * k * C), Ho, Wo


def conv2d_relu(x, w_p, b_p, *, k, stride, cout):
    """x: (N, H, W, Cin) bf16 -> (N, Ho, Wo, Cout) bf16 (fused bias+ReLU)."""
    N = x.shape[0]
    patches, Ho, Wo = _im2col_nhwc(x, k, stride)
    out = matmul_bias_act(patches, w_p, b_p, n_out=cout, relu=True,
                          out_dtype=jnp.bfloat16)
    return out.reshape(N, Ho, Wo, cout)


# ----------------------------------------------------------------------------
# Parameter construction (deterministic orthogonal init, zero bias).
# All per-call prep (transpose to (K, N) im2col/NHWC order, padding to
# 128-multiples, bf16 cast, /255 folding) is done here, once.
# ----------------------------------------------------------------------------
def _pad_weight(w_mat):
    K, N = w_mat.shape
    Kp, Np = _round_up(K, 128), _round_up(N, 128)
    return jnp.pad(w_mat, ((0, Kp - K), (0, Np - N))).astype(jnp.bfloat16)


def _pad_bias(b):
    N = b.shape[0]
    Np = _round_up(N, 128)
    return jnp.pad(b.reshape(1, N), ((0, 0), (0, Np - N))).astype(jnp.float32)


def make_params(key, num_inputs, hidden_size=512):
    relu_gain = float(jnp.sqrt(2.0))          # nn.init.calculate_gain('relu')
    ks = jax.random.split(key, 5)
    ortho = jax.nn.initializers.orthogonal

    def conv_wb(k, cout, cin, ksz, gain, scale=1.0):
        # PyTorch layout: (cout, cin, kh, kw); orthogonal over (cout, cin*k*k)
        w = ortho(gain)(k, (cout, cin * ksz * ksz), jnp.float32)
        w = w.reshape(cout, cin, ksz, ksz) * scale
        # im2col (kh, kw, cin) order x cout
        w_mat = w.transpose(2, 3, 1, 0).reshape(ksz * ksz * cin, cout)
        return _pad_weight(w_mat), _pad_bias(jnp.zeros((cout,), jnp.float32))

    # /255.0 input scale folded into conv1 weights (exact for linear conv).
    c1w, c1b = conv_wb(ks[0], 32, num_inputs, 8, relu_gain, scale=1.0 / 255.0)
    c2w, c2b = conv_wb(ks[1], 64, 32, 4, relu_gain)
    c3w, c3b = conv_wb(ks[2], 32, 64, 3, relu_gain)

    # fc: PyTorch flatten order is (c, h, w); permute columns to NHWC (h, w, c).
    fc_pt = ortho(relu_gain)(ks[3], (hidden_size, 32 * 7 * 7), jnp.float32)
    fc_hwc = (fc_pt.reshape(hidden_size, 32, 7, 7)
              .transpose(0, 2, 3, 1).reshape(hidden_size, 7 * 7 * 32))
    fc_w = _pad_weight(fc_hwc.T)                      # (1568p, 512)
    fc_b = _pad_bias(jnp.zeros((hidden_size,), jnp.float32))

    critic_pt = ortho(1.0)(ks[4], (1, hidden_size), jnp.float32)
    critic_w = _pad_weight(critic_pt.T)               # (512, 128)
    critic_b = _pad_bias(jnp.zeros((1,), jnp.float32))

    return {
        "conv1_w": c1w, "conv1_b": c1b,
        "conv2_w": c2w, "conv2_b": c2b,
        "conv3_w": c3w, "conv3_b": c3b,
        "fc_w": fc_w, "fc_b": fc_b,
        "critic_w": critic_w, "critic_b": critic_b,
    }


# ----------------------------------------------------------------------------
# CNNBase forward (recurrent=False)
# ----------------------------------------------------------------------------
def cnn_base_forward(params, inputs, rnn_hxs, masks, *, hidden_size=512):
    # inputs: (N, num_inputs, 84, 84) NCHW, as in PyTorch.  Single layout
    # transpose to NHWC; /255 is folded into conv1 weights.
    x = jnp.transpose(inputs, (0, 2, 3, 1)).astype(jnp.bfloat16)
    x = conv2d_relu(x, params["conv1_w"], params["conv1_b"],
                    k=8, stride=4, cout=32)            # (N, 20, 20, 32)
    x = conv2d_relu(x, params["conv2_w"], params["conv2_b"],
                    k=4, stride=2, cout=64)            # (N, 9, 9, 64)
    x = conv2d_relu(x, params["conv3_w"], params["conv3_b"],
                    k=3, stride=1, cout=32)            # (N, 7, 7, 32)
    N = x.shape[0]
    x_flat = x.reshape(N, -1)                          # (N, 7*7*32) hwc order
    features, value = fc_critic(x_flat, params["fc_w"], params["fc_b"],
                                params["critic_w"], params["critic_b"],
                                hidden=hidden_size)
    return value, features, rnn_hxs


if __name__ == "__main__":
    batch = 2
    num_inputs = 4          # stacked frames
    hidden_size = 512
    H = W = 84              # required by Linear(32*7*7, hidden_size)

    key = jax.random.PRNGKey(0)
    k_params, k_x = jax.random.split(key)
    params = make_params(k_params, num_inputs, hidden_size)

    inputs = jax.random.uniform(k_x, (batch, num_inputs, H, W),
                                dtype=jnp.float32, minval=0.0, maxval=255.0)
    rnn_hxs = jnp.zeros((batch, 1), jnp.float32)   # recurrent_hidden_state_size == 1
    masks = jnp.ones((batch, 1), jnp.float32)

    fwd = jax.jit(functools.partial(cnn_base_forward, hidden_size=hidden_size))
    value, features, rnn_hxs_out = fwd(params, inputs, rnn_hxs, masks)
    jax.block_until_ready((value, features, rnn_hxs_out))

    assert value.shape == (batch, 1)
    assert features.shape == (batch, hidden_size)
    assert rnn_hxs_out.shape == (batch, 1)
    print("KERNEL_OK")
</pallas_src>

<mosaic_0001>
module attributes {stable_mosaic.version = 11 : i64} {
  func.func @_matmul_bias_act_kernel(%arg0: i32, %arg1: memref<256x256xbf16, #tpu.memory_space<vmem>>, %arg2: memref<256x128xbf16, #tpu.memory_space<vmem>>, %arg3: memref<1x128xf32, #tpu.memory_space<vmem>>, %arg4: memref<256x128xbf16, #tpu.memory_space<vmem>>) attributes {dimension_semantics = [#tpu.dimension_semantics<parallel>], iteration_bounds = array<i64: 4>, scalar_prefetch = 0 : i64, scratch_operands = 0 : i64, tpu.core_type = #tpu.core_type<tc>, window_params = [{transform_indices = @transform_0, window_bounds = array<i64: 256, 256>}, {pipeline_mode = #tpu.pipeline_mode<synchronous>, transform_indices = @transform_1, window_bounds = array<i64: 256, 128>}, {pipeline_mode = #tpu.pipeline_mode<synchronous>, transform_indices = @transform_2, window_bounds = array<i64: 1, 128>}, {transform_indices = @transform_3, window_bounds = array<i64: 256, 128>}]} {
    %c0 = arith.constant 0 : index
    %c0_0 = arith.constant 0 : index
    %0 = vector.load %arg1[%c0, %c0_0] : memref<256x256xbf16, #tpu.memory_space<vmem>>, vector<256x256xbf16>
    %c0_1 = arith.constant 0 : index
    %c0_2 = arith.constant 0 : index
    %1 = vector.load %arg2[%c0_1, %c0_2] : memref<256x128xbf16, #tpu.memory_space<vmem>>, vector<256x128xbf16>
    %cst = arith.constant dense<0.000000e+00> : vector<256x128xf32>
    %2 = tpu.matmul %0, %1, %cst {dimension_numbers = #tpu.dot_dimension_numbers<[1], [0], [0], [1], [0, 0, 1, 1], [], []>} : vector<256x256xbf16>, vector<256x128xbf16>, vector<256x128xf32> -> vector<256x128xf32>
    %c0_3 = arith.constant 0 : index
    %c0_4 = arith.constant 0 : index
    %3 = vector.load %arg3[%c0_3, %c0_4] : memref<1x128xf32, #tpu.memory_space<vmem>>, vector<1x128xf32>
    %4 = vector.broadcast %3 : vector<1x128xf32> to vector<256x128xf32>
    %5 = arith.addf %2, %4 : vector<256x128xf32>
    %cst_5 = arith.constant 0.000000e+00 : f32
    %6 = vector.broadcast %cst_5 : f32 to vector<256x128xf32>
    %7 = arith.maximumf %5, %6 : vector<256x128xf32>
    %8 = arith.truncf %7 : vector<256x128xf32> to vector<256x128xbf16>
    %c0_6 = arith.constant 0 : index
    %c0_7 = arith.constant 0 : index
    %9 = vector.load %arg4[%c0_6, %c0_7] : memref<256x128xbf16, #tpu.memory_space<vmem>>, vector<256x128xbf16>
    tpu.vector_store %arg4[%c0_6, %c0_7], %8 {strides = array<i32>} : memref<256x128xbf16, #tpu.memory_space<vmem>>, vector<256x128xbf16>,
    return
  }
  func.func @transform_0(%arg0: i32) -> (i32, i32) {
    %c0_i32 = arith.constant 0 : i32
    %c0_i32_0 = arith.constant 0 : i32
    return %arg0, %c0_i32 : i32, i32
  }
  func.func @transform_1(%arg0: i32) -> (i32, i32) {
    %c0_i32 = arith.constant 0 : i32
    %c0_i32_0 = arith.constant 0 : i32
    %c0_i32_1 = arith.constant 0 : i32
    return %c0_i32, %c0_i32_0 : i32, i32
  }
  func.func @transform_2(%arg0: i32) -> (i32, i32) {
    %c0_i32 = arith.constant 0 : i32
    %c0_i32_0 = arith.constant 0 : i32
    %c0_i32_1 = arith.constant 0 : i32
    return %c0_i32, %c0_i32_0 : i32, i32
  }
  func.func @transform_3(%arg0: i32) -> (i32, i32) {
    %c0_i32 = arith.constant 0 : i32
    %c0_i32_0 = arith.constant 0 : i32
    return %arg0, %c0_i32 : i32, i32
  }
}

module attributes {stable_mosaic.version = 11 : i64} {
  func.func @_matmul_bias_act_kernel(%arg0: i32, %arg1: memref<176x512xbf16, #tpu.memory_space<vmem>>, %arg2: memref<512x128xbf16, #tpu.memory_space<vmem>>, %arg3: memref<1x128xf32, #tpu.memory_space<vmem>>, %arg4: memref<176x128xbf16, #tpu.memory_space<vmem>>) attributes {dimension_semantics = [#tpu.dimension_semantics<parallel>], iteration_bounds = array<i64: 1>, scalar_prefetch = 0 : i64, scratch_operands = 0 : i64, tpu.core_type = #tpu.core_type<tc>, window_params = [{transform_indices = @transform_0, window_bounds = array<i64: 176, 512>}, {pipeline_mode = #tpu.pipeline_mode<synchronous>, transform_indices = @transform_1, window_bounds = array<i64: 512, 128>}, {pipeline_mode = #tpu.pipeline_mode<synchronous>, transform_indices = @transform_2, window_bounds = array<i64: 1, 128>}, {transform_indices = @transform_3, window_bounds = array<i64: 176, 128>}]} {
    %c0 = arith.constant 0 : index
    %c0_0 = arith.constant 0 : index
    %0 = vector.load %arg1[%c0, %c0_0] : memref<176x512xbf16, #tpu.memory_space<vmem>>, vector<176x512xbf16>
    %c0_1 = arith.constant 0 : index
    %c0_2 = arith.constant 0 : index
    %1 = vector.load %arg2[%c0_1, %c0_2] : memref<512x128xbf16, #tpu.memory_space<vmem>>, vector<512x128xbf16>
    %cst = arith.constant dense<0.000000e+00> : vector<176x128xf32>
    %2 = tpu.matmul %0, %1, %cst {dimension_numbers = #tpu.dot_dimension_numbers<[1], [0], [0], [1], [0, 0, 1, 1], [], []>} : vector<176x512xbf16>, vector<512x128xbf16>, vector<176x128xf32> -> vector<176x128xf32>
    %c0_3 = arith.constant 0 : index
    %c0_4 = arith.constant 0 : index
    %3 = vector.load %arg3[%c0_3, %c0_4] : memref<1x128xf32, #tpu.memory_space<vmem>>, vector<1x128xf32>
    %4 = vector.broadcast %3 : vector<1x128xf32> to vector<176x128xf32>
    %5 = arith.addf %2, %4 : vector<176x128xf32>
    %cst_5 = arith.constant 0.000000e+00 : f32
    %6 = vector.broadcast %cst_5 : f32 to vector<176x128xf32>
    %7 = arith.maximumf %5, %6 : vector<176x128xf32>
    %8 = arith.truncf %7 : vector<176x128xf32> to vector<176x128xbf16>
    %c0_6 = arith.constant 0 : index
    %c0_7 = arith.constant 0 : index
    %9 = vector.load %arg4[%c0_6, %c0_7] : memref<176x128xbf16, #tpu.memory_space<vmem>>, vector<176x128xbf16>
    tpu.vector_store %arg4[%c0_6, %c0_7], %8 {strides = array<i32>} : memref<176x128xbf16, #tpu.memory_space<vmem>>, vector<176x128xbf16>,
    return
  }
  func.func @transform_0(%arg0: i32) -> (i32, i32) {
    %c0_i32 = arith.constant 0 : i32
    %c0_i32_0 = arith.constant 0 : i32
    return %arg0, %c0_i32 : i32, i32
  }
  func.func @transform_1(%arg0: i32) -> (i32, i32) {
    %c0_i32 = arith.constant 0 : i32
    %c0_i32_0 = arith.constant 0 : i32
    %c0_i32_1 = arith.constant 0 : i32
    return %c0_i32, %c0_i32_0 : i32, i32
  }
  func.func @transform_2(%arg0: i32) -> (i32, i32) {
    %c0_i32 = arith.constant 0 : i32
    %c0_i32_0 = arith.constant 0 : i32
    %c0_i32_1 = arith.constant 0 : i32
    return %c0_i32, %c0_i32_0 : i32, i32
  }
  func.func @transform_3(%arg0: i32) -> (i32, i32) {
    %c0_i32 = arith.constant 0 : i32
    %c0_i32_0 = arith.constant 0 : i32
    return %arg0, %c0_i32 : i32, i32
  }
}

module attributes {stable_mosaic.version = 11 : i64} {
  func.func @_matmul_bias_act_kernel(%arg0: i32, %arg1: memref<112x640xbf16, #tpu.memory_space<vmem>>, %arg2: memref<640x128xbf16, #tpu.memory_space<vmem>>, %arg3: memref<1x128xf32, #tpu.memory_space<vmem>>, %arg4: memref<112x128xbf16, #tpu.memory_space<vmem>>) attributes {dimension_semantics = [#tpu.dimension_semantics<parallel>], iteration_bounds = array<i64: 1>, scalar_prefetch = 0 : i64, scratch_operands = 0 : i64, tpu.core_type = #tpu.core_type<tc>, window_params = [{transform_indices = @transform_0, window_bounds = array<i64: 112, 640>}, {pipeline_mode = #tpu.pipeline_mode<synchronous>, transform_indices = @transform_1, window_bounds = array<i64: 640, 128>}, {pipeline_mode = #tpu.pipeline_mode<synchronous>, transform_indices = @transform_2, window_bounds = array<i64: 1, 128>}, {transform_indices = @transform_3, window_bounds = array<i64: 112, 128>}]} {
    %c0 = arith.constant 0 : index
    %c0_0 = arith.constant 0 : index
    %0 = vector.load %arg1[%c0, %c0_0] : memref<112x640xbf16, #tpu.memory_space<vmem>>, vector<112x640xbf16>
    %c0_1 = arith.constant 0 : index
    %c0_2 = arith.constant 0 : index
    %1 = vector.load %arg2[%c0_1, %c0_2] : memref<640x128xbf16, #tpu.memory_space<vmem>>, vector<640x128xbf16>
    %cst = arith.constant dense<0.000000e+00> : vector<112x128xf32>
    %2 = tpu.matmul %0, %1, %cst {dimension_numbers = #tpu.dot_dimension_numbers<[1], [0], [0], [1], [0, 0, 1, 1], [], []>} : vector<112x640xbf16>, vector<640x128xbf16>, vector<112x128xf32> -> vector<112x128xf32>
    %c0_3 = arith.constant 0 : index
    %c0_4 = arith.constant 0 : index
    %3 = vector.load %arg3[%c0_3, %c0_4] : memref<1x128xf32, #tpu.memory_space<vmem>>, vector<1x128xf32>
    %4 = vector.broadcast %3 : vector<1x128xf32> to vector<112x128xf32>
    %5 = arith.addf %2, %4 : vector<112x128xf32>
    %cst_5 = arith.constant 0.000000e+00 : f32
    %6 = vector.broadcast %cst_5 : f32 to vector<112x128xf32>
    %7 = arith.maximumf %5, %6 : vector<112x128xf32>
    %8 = arith.truncf %7 : vector<112x128xf32> to vector<112x128xbf16>
    %c0_6 = arith.constant 0 : index
    %c0_7 = arith.constant 0 : index
    %9 = vector.load %arg4[%c0_6, %c0_7] : memref<112x128xbf16, #tpu.memory_space<vmem>>, vector<112x128xbf16>
    tpu.vector_store %arg4[%c0_6, %c0_7], %8 {strides = array<i32>} : memref<112x128xbf16, #tpu.memory_space<vmem>>, vector<112x128xbf16>,
    return
  }
  func.func @transform_0(%arg0: i32) -> (i32, i32) {
    %c0_i32 = arith.constant 0 : i32
    %c0_i32_0 = arith.constant 0 : i32
    return %arg0, %c0_i32 : i32, i32
  }
  func.func @transform_1(%arg0: i32) -> (i32, i32) {
    %c0_i32 = arith.constant 0 : i32
    %c0_i32_0 = arith.constant 0 : i32
    %c0_i32_1 = arith.constant 0 : i32
    return %c0_i32, %c0_i32_0 : i32, i32
  }
  func.func @transform_2(%arg0: i32) -> (i32, i32) {
    %c0_i32 = arith.constant 0 : i32
    %c0_i32_0 = arith.constant 0 : i32
    %c0_i32_1 = arith.constant 0 : i32
    return %c0_i32, %c0_i32_0 : i32, i32
  }
  func.func @transform_3(%arg0: i32) -> (i32, i32) {
    %c0_i32 = arith.constant 0 : i32
    %c0_i32_0 = arith.constant 0 : i32
    return %arg0, %c0_i32 : i32, i32
  }
}

module attributes {stable_mosaic.version = 11 : i64} {
  func.func @_fc_critic_kernel(%arg0: i32, %arg1: memref<16x1664xbf16, #tpu.memory_space<vmem>>, %arg2: memref<1664x512xbf16, #tpu.memory_space<vmem>>, %arg3: memref<1x512xf32, #tpu.memory_space<vmem>>, %arg4: memref<512x128xbf16, #tpu.memory_space<vmem>>, %arg5: memref<1x128xf32, #tpu.memory_space<vmem>>, %arg6: memref<16x512xf32, #tpu.memory_space<vmem>>, %arg7: memref<16x128xf32, #tpu.memory_space<vmem>>) attributes {dimension_semantics = [#tpu.dimension_semantics<parallel>], iteration_bounds = array<i64: 1>, scalar_prefetch = 0 : i64, scratch_operands = 0 : i64, tpu.core_type = #tpu.core_type<tc>, window_params = [{transform_indices = @transform_0, window_bounds = array<i64: 16, 1664>}, {pipeline_mode = #tpu.pipeline_mode<synchronous>, transform_indices = @transform_1, window_bounds = array<i64: 1664, 512>}, {pipeline_mode = #tpu.pipeline_mode<synchronous>, transform_indices = @transform_2, window_bounds = array<i64: 1, 512>}, {pipeline_mode = #tpu.pipeline_mode<synchronous>, transform_indices = @transform_3, window_bounds = array<i64: 512, 128>}, {pipeline_mode = #tpu.pipeline_mode<synchronous>, transform_indices = @transform_4, window_bounds = array<i64: 1, 128>}, {transform_indices = @transform_5, window_bounds = array<i64: 16, 512>}, {transform_indices = @transform_6, window_bounds = array<i64: 16, 128>}]} {
    %c0 = arith.constant 0 : index
    %c0_0 = arith.constant 0 : index
    %0 = vector.load %arg1[%c0, %c0_0] : memref<16x1664xbf16, #tpu.memory_space<vmem>>, vector<16x1664xbf16>
    %c0_1 = arith.constant 0 : index
    %c0_2 = arith.constant 0 : index
    %1 = vector.load %arg2[%c0_1, %c0_2] : memref<1664x512xbf16, #tpu.memory_space<vmem>>, vector<1664x512xbf16>
    %cst = arith.constant dense<0.000000e+00> : vector<16x512xf32>
    %2 = tpu.matmul %0, %1, %cst {dimension_numbers = #tpu.dot_dimension_numbers<[1], [0], [0], [1], [0, 0, 1, 1], [], []>} : vector<16x1664xbf16>, vector<1664x512xbf16>, vector<16x512xf32> -> vector<16x512xf32>
    %c0_3 = arith.constant 0 : index
    %c0_4 = arith.constant 0 : index
    %3 = vector.load %arg3[%c0_3, %c0_4] : memref<1x512xf32, #tpu.memory_space<vmem>>, vector<1x512xf32>
    %4 = vector.broadcast %3 : vector<1x512xf32> to vector<16x512xf32>
    %5 = arith.addf %2, %4 : vector<16x512xf32>
    %cst_5 = arith.constant 0.000000e+00 : f32
    %6 = vector.broadcast %cst_5 : f32 to vector<16x512xf32>
    %7 = arith.maximumf %5, %6 : vector<16x512xf32>
    %c0_6 = arith.constant 0 : index
    %c0_7 = arith.constant 0 : index
    %8 = vector.load %arg6[%c0_6, %c0_7] : memref<16x512xf32, #tpu.memory_space<vmem>>, vector<16x512xf32>
    tpu.vector_store %arg6[%c0_6, %c0_7], %7 {strides = array<i32>} : memref<16x512xf32, #tpu.memory_space<vmem>>, vector<16x512xf32>,
    %9 = arith.truncf %7 : vector<16x512xf32> to vector<16x512xbf16>
    %c0_8 = arith.constant 0 : index
    %c0_9 = arith.constant 0 : index
    %10 = vector.load %arg4[%c0_8, %c0_9] : memref<512x128xbf16, #tpu.memory_space<vmem>>, vector<512x128xbf16>
    %cst_10 = arith.constant dense<0.000000e+00> : vector<16x128xf32>
    %11 = tpu.matmul %9, %10, %cst_10 {dimension_numbers = #tpu.dot_dimension_numbers<[1], [0], [0], [1], [0, 0, 1, 1], [], []>} : vector<16x512xbf16>, vector<512x128xbf16>, vector<16x128xf32> -> vector<16x128xf32>
    %c0_11 = arith.constant 0 : index
    %c0_12 = arith.constant 0 : index
    %12 = vector.load %arg5[%c0_11, %c0_12] : memref<1x128xf32, #tpu.memory_space<vmem>>, vector<1x128xf32>
    %13 = vector.broadcast %12 : vector<1x128xf32> to vector<16x128xf32>
    %14 = arith.addf %11, %13 : vector<16x128xf32>
    %c0_13 = arith.constant 0 : index
    %c0_14 = arith.constant 0 : index
    %15 = vector.load %arg7[%c0_13, %c0_14] : memref<16x128xf32, #tpu.memory_space<vmem>>, vector<16x128xf32>
    tpu.vector_store %arg7[%c0_13, %c0_14], %14 {strides = array<i32>} : memref<16x128xf32, #tpu.memory_space<vmem>>, vector<16x128xf32>,
    return
  }
  func.func @transform_0(%arg0: i32) -> (i32, i32) {
    %c0_i32 = arith.constant 0 : i32
    %c0_i32_0 = arith.constant 0 : i32
    return %arg0, %c0_i32 : i32, i32
  }
  func.func @transform_1(%arg0: i32) -> (i32, i32) {
    %c0_i32 = arith.constant 0 : i32
    %c0_i32_0 = arith.constant 0 : i32
    %c0_i32_1 = arith.constant 0 : i32
    return %c0_i32, %c0_i32_0 : i32, i32
  }
  func.func @transform_2(%arg0: i32) -> (i32, i32) {
    %c0_i32 = arith.constant 0 : i32
    %c0_i32_0 = arith.constant 0 : i32
    %c0_i32_1 = arith.constant 0 : i32
    return %c0_i32, %c0_i32_0 : i32, i32
  }
  func.func @transform_3(%arg0: i32) -> (i32, i32) {
    %c0_i32 = arith.constant 0 : i32
    %c0_i32_0 = arith.constant 0 : i32
    %c0_i32_1 = arith.constant 0 : i32
    return %c0_i32, %c0_i32_0 : i32, i32
  }
  func.func @transform_4(%arg0: i32) -> (i32, i32) {
    %c0_i32 = arith.constant 0 : i32
    %c0_i32_0 = arith.constant 0 : i32
    %c0_i32_1 = arith.constant 0 : i32
    return %c0_i32, %c0_i32_0 : i32, i32
  }
  func.func @transform_5(%arg0: i32) -> (i32, i32) {
    %c0_i32 = arith.constant 0 : i32
    %c0_i32_0 = arith.constant 0 : i32
    return %arg0, %c0_i32 : i32, i32
  }
  func.func @transform_6(%arg0: i32) -> (i32, i32) {
    %c0_i32 = arith.constant 0 : i32
    %c0_i32_0 = arith.constant 0 : i32
    return %arg0, %c0_i32 : i32, i32
  }
}

</mosaic_0001>

<bundles_post_ra>
// kernel: cnn_base_forward.4
= control target key start
LH: loop header
LB: loop body
LE: loop exit
PB: predicated region body
PF: predicated region fallthrough
CT: control target
= control target key end

     0   :  { %s1363_s12 = smov 0   ;;  %s1521_s0 = inlined_call_operand.vmem [shape: bf16[1024,256], index: 0, kind: input, shape index: {}]   ;;  %s1522_s1 = inlined_call_operand.vmem [shape: bf16[256,128], index: 1, kind: input, shape index: {}]   ;;  %s1523_s2 = inlined_call_operand.vmem [shape: f32[1,128], index: 2, kind: input, shape index: {}]   ;;  %s1524_s3 = inlined_call_operand.vmem [shape: bf16[1024,128], index: 3, kind: output, shape index: {}]  }
   0x1 LB: > { %s914_s13 = sadd.s32 4294967295, %s1341_s12   ;;  %p918_p0 = scmp.ge.s32.totalorder %s1341_s12, 1  ;;  %s1341_s12 = sphi %s1363_s12, %s13_s12  }
   0x2   : > { %p139_p1 = scmp.lt.s32.totalorder %s1341_s12, 5 }
   0x4   : > { %p140_p2 = pnand %p918_p0, %p139_p1 }
   0x5   : > { %s919_s16 = sshll.u32 (!%p140_p2), %s914_s13, 5 }
   0x6   : > { %143 = sbr.rel (%p140_p2) target bundleno = 308 (0x134), region = 32  ;;  %p165_p3 = scmp.lt.s32.totalorder (!%p140_p2), %s919_s16, 127 }
   0xb   : > { %v1271_v0 = vld [vmem:[%s1522_s1 + $0x78] sm:$0xff]   ;;  %v1273_v2 = vld [vmem:[%s1522_s1 + $0x70] sm:$0xff]   ;;  %v1275_v4 = vld [vmem:[%s1522_s1 + $0x68] sm:$0xff]   ;;  %s1526_s16 = smov (!%p165_p3, %s919_s16), 127 }
   0xc   : > { %v1272_v1 = vld [vmem:[%s1522_s1 + $0x38] sm:$0xff]   ;;  %1135 = vmatprep.subr.bf16.mxu0 %v1271_v0  ;;  %1247 = vmatprep.subr.bf16.mxu1 %v1271_v0  ;;  %v1274_v3 = vld [vmem:[%s1522_s1 + $0x30] sm:$0xff]   ;;  %v1276_v5 = vld [vmem:[%s1522_s1 + $0x28] sm:$0xff]   ;;  %s1007_s4 = sshll.u32 %s1526_s16, 3  ;;  %s923_s28 = sshll.u32 %s1526_s16, 2 }
   0xd   : > { %1136 = vmatpush3.bf16.msra.mxu0 %v1272_v1  ;;  %1255 = vmatpush3.bf16.msra.mxu1 %v1272_v1  ;;  %v1277_v6 = vld [vmem:[%s1522_s1 + $0x60] sm:$0xff]   ;;  %v1279_v8 = vld [vmem:[%s1522_s1 + $0x58] sm:$0xff]   ;;  %s1404_s9 = scalar_lea.vmem %s1521_s0, %s1007_s4  ;;  %v1281_v10 = vld [vmem:[%s1522_s1 + $0x50] sm:$0xff]   ;;  %s1472_s4 = scalar_lea.vmem %s1524_s3, %s923_s28 }
   0xe   : > { %1137 = vmatprep.subr.bf16.mxu0 %v1273_v2  ;;  %1248 = vmatprep.subr.bf16.mxu1 %v1273_v2  ;;  %v1278_v7 = vld [vmem:[%s1522_s1 + $0x20] sm:$0xff]   ;;  %v1280_v9 = vld [vmem:[%s1522_s1 + $0x18] sm:$0xff]   ;;  %v1282_v13 = vld [vmem:[%s1522_s1 + $0x10] sm:$0xff]  }
   0xf   : > { %v1289_v11 = vld [vmem:[%s1404_s9 + $0x4] ss:$8 sps:$4 sm:$0xff]   ;;  %v1287_v18 = vld [vmem:[%s1404_s9] ss:$8 sps:$4 sm:$0xff]   ;;  %v1293_v20 = vld [vmem:[%s1404_s9 + $0x14] ss:$8 sps:$4 sm:$0xff]  }
  0x10   : > { %v1292_v12 = vld [vmem:[%s1404_s9 + $0x84] ss:$8 sps:$4 sm:$0xff]   ;;  %537 = vmatprep.mubr.bf16.mxu0 %v1289_v11  ;;  %v1290_v19 = vld [vmem:[%s1404_s9 + $0x80] ss:$8 sps:$4 sm:$0xff]   ;;  %v1295_v21 = vld [vmem:[%s1404_s9 + $0x94] ss:$8 sps:$4 sm:$0xff]  }
  0x11   : > { %1138 = vmatpush3.bf16.msra.mxu0 %v1274_v3  ;;  %1256 = vmatpush3.bf16.msra.mxu1 %v1274_v3  ;;  %v1283_v14 = vld [vmem:[%s1522_s1 + $0x48] sm:$0xff]   ;;  %v1285_v16 = vld [vmem:[%s1522_s1 + $0x40] sm:$0xff]   ;;  %v1297_v22 = vld [vmem:[%s1404_s9 + $0x10] ss:$8 sps:$4 sm:$0xff]  }
  0x12   : > { %1139 = vmatprep.subr.bf16.mxu0 %v1275_v4  ;;  %1249 = vmatprep.subr.bf16.mxu1 %v1275_v4  ;;  %v1284_v15 = vld [vmem:[%s1522_s1 + $0x8] sm:$0xff]   ;;  %v1286_v17 = vld [vmem:[%s1522_s1] sm:$0xff]   ;;  %v1298_v23 = vld [vmem:[%s1404_s9 + $0x90] ss:$8 sps:$4 sm:$0xff]  }
  0x13   : > { %601 = vmatprep.mubr.bf16.mxu1 %v1292_v12  ;;  %v1299_v24 = vld [vmem:[%s1404_s9 + $0x24] ss:$8 sps:$4 sm:$0xff]   ;;  %v1303_v26 = vld [vmem:[%s1404_s9 + $0x20] ss:$8 sps:$4 sm:$0xff]   ;;  %v1305_v28 = vld [vmem:[%s1404_s9 + $0x34] ss:$8 sps:$4 sm:$0xff]  }
  0x14   : > { %v1301_v25 = vld [vmem:[%s1404_s9 + $0xa4] ss:$8 sps:$4 sm:$0xff]   ;;  %v1304_v27 = vld [vmem:[%s1404_s9 + $0xa0] ss:$8 sps:$4 sm:$0xff]   ;;  %v1307_v29 = vld [vmem:[%s1404_s9 + $0xb4] ss:$8 sps:$4 sm:$0xff]  }
  0x15   : > { %1140 = vmatpush3.bf16.msra.mxu0 %v1276_v5  ;;  %1257 = vmatpush3.bf16.msra.mxu1 %v1276_v5  ;;  %v1309_v30 = vld [vmem:[%s1404_s9 + $0x30] ss:$8 sps:$4 sm:$0xff]   ;;  %v1311_v32 = vld [vmem:[%s1404_s9 + $0x44] ss:$8 sps:$4 sm:$0xff]   ;;  %v1315_v34 = vld [vmem:[%s1404_s9 + $0x40] ss:$8 sps:$4 sm:$0xff]  }
  0x16   : > { %1141 = vmatprep.subr.bf16.mxu0 %v1277_v6  ;;  %1250 = vmatprep.subr.bf16.mxu1 %v1277_v6  ;;  %v1310_v31 = vld [vmem:[%s1404_s9 + $0xb0] ss:$8 sps:$4 sm:$0xff]   ;;  %v1313_v33 = vld [vmem:[%s1404_s9 + $0xc4] ss:$8 sps:$4 sm:$0xff]   ;;  %v1316_v35 = vld [vmem:[%s1404_s9 + $0xc0] ss:$8 sps:$4 sm:$0xff]  }
  0x17   : > { %v1317_v36 = vld [vmem:[%s1404_s9 + $0x54] ss:$8 sps:$4 sm:$0xff]   ;;  %v1321_v38 = vld [vmem:[%s1404_s9 + $0x50] ss:$8 sps:$4 sm:$0xff]   ;;  %v1323_v40 = vld [vmem:[%s1404_s9 + $0x64] ss:$8 sps:$4 sm:$0xff]  }
  0x18   : > { %v1319_v37 = vld [vmem:[%s1404_s9 + $0xd4] ss:$8 sps:$4 sm:$0xff]   ;;  %v1322_v39 = vld [vmem:[%s1404_s9 + $0xd0] ss:$8 sps:$4 sm:$0xff]   ;;  %v1325_v41 = vld [vmem:[%s1404_s9 + $0xe4] ss:$8 sps:$4 sm:$0xff]  }
  0x19   : > { %1142 = vmatpush3.bf16.msra.mxu0 %v1278_v7  ;;  %1258 = vmatpush3.bf16.msra.mxu1 %v1278_v7  ;;  %v1327_v42 = vld [vmem:[%s1404_s9 + $0x60] ss:$8 sps:$4 sm:$0xff]   ;;  %v1329_v44 = vld [vmem:[%s1404_s9 + $0x74] ss:$8 sps:$4 sm:$0xff]   ;;  %v1333_v46 = vld [vmem:[%s1404_s9 + $0x70] ss:$8 sps:$4 sm:$0xff]  }
  0x1a   : > { %1143 = vmatprep.subr.bf16.mxu0 %v1279_v8  ;;  %1251 = vmatprep.subr.bf16.mxu1 %v1279_v8  ;;  %v1328_v43 = vld [vmem:[%s1404_s9 + $0xe0] ss:$8 sps:$4 sm:$0xff]   ;;  %v1331_v45 = vld [vmem:[%s1404_s9 + $0xf4] ss:$8 sps:$4 sm:$0xff]   ;;  %v1334_v47 = vld [vmem:[%s1404_s9 + $0xf0] ss:$8 sps:$4 sm:$0xff]  }
  0x1b   : > { %v1462_v52 = vld [vmem:[%s1523_s2] ss:$0 sm:$0xff] }
  0x1d   : > { %1144 = vmatpush3.bf16.msra.mxu0 %v1280_v9  ;;  %1259 = vmatpush3.bf16.msra.mxu1 %v1280_v9 }
  0x1e   : > { %1145 = vmatprep.subr.bf16.mxu0 %v1281_v10  ;;  %1252 = vmatprep.subr.bf16.mxu1 %v1281_v10 }
  0x21   : > { %1146 = vmatpush3.bf16.msra.mxu0 %v1282_v13  ;;  %1260 = vmatpush3.bf16.msra.mxu1 %v1282_v13 }
  0x22   : > { %1147 = vmatprep.subr.bf16.mxu0 %v1283_v14  ;;  %1253 = vmatprep.subr.bf16.mxu1 %v1283_v14 }
  0x25   : > { %1148 = vmatpush3.bf16.msra.mxu0 %v1284_v15  ;;  %1261 = vmatpush3.bf16.msra.mxu1 %v1284_v15 }
  0x26   : > { %1149 = vmatprep.subr.bf16.mxu0 %v1285_v16  ;;  %1254 = vmatprep.subr.bf16.mxu1 %v1285_v16 }
  0x29   : > { %1150 = vmatpush3.bf16.msra.mxu0 %v1286_v17  ;;  %1262 = vmatpush3.bf16.msra.mxu1 %v1286_v17 }
  0x2c   : > { %538 = vmatmul.mubr.bf16.vlgmr.msra.gmra.mxu0 %v1287_v18  ;;  %602 = vmatmul.mubr.bf16.vlgmr.msra.gmra.mxu1 %v1290_v19 }
  0x2d   : > { %545 = vmatprep.mubr.bf16.mxu0 %v1293_v20  ;;  %609 = vmatprep.mubr.bf16.mxu1 %v1295_v21 }
  0x34   : > { %546 = vmatmul.mubr.bf16.gmra.mxu0 %v1297_v22  ;;  %610 = vmatmul.mubr.bf16.gmra.mxu1 %v1298_v23 }
  0x35   : > { %553 = vmatprep.mubr.bf16.mxu0 %v1299_v24  ;;  %617 = vmatprep.mubr.bf16.mxu1 %v1301_v25 }
  0x3c   : > { %554 = vmatmul.mubr.bf16.gmra.mxu0 %v1303_v26  ;;  %618 = vmatmul.mubr.bf16.gmra.mxu1 %v1304_v27 }
  0x3d   : > { %561 = vmatprep.mubr.bf16.mxu0 %v1305_v28  ;;  %625 = vmatprep.mubr.bf16.mxu1 %v1307_v29 }
  0x44   : > { %562 = vmatmul.mubr.bf16.gmra.mxu0 %v1309_v30  ;;  %626 = vmatmul.mubr.bf16.gmra.mxu1 %v1310_v31 }
  0x45   : > { %569 = vmatprep.mubr.bf16.mxu0 %v1311_v32  ;;  %633 = vmatprep.mubr.bf16.mxu1 %v1313_v33 }
  0x4c   : > { %570 = vmatmul.mubr.bf16.gmra.mxu0 %v1315_v34  ;;  %634 = vmatmul.mubr.bf16.gmra.mxu1 %v1316_v35 }
  0x4d   : > { %577 = vmatprep.mubr.bf16.mxu0 %v1317_v36  ;;  %641 = vmatprep.mubr.bf16.mxu1 %v1319_v37 }
  0x54   : > { %578 = vmatmul.mubr.bf16.gmra.mxu0 %v1321_v38  ;;  %642 = vmatmul.mubr.bf16.gmra.mxu1 %v1322_v39 }
  0x55   : > { %585 = vmatprep.mubr.bf16.mxu0 %v1323_v40  ;;  %649 = vmatprep.mubr.bf16.mxu1 %v1325_v41 }
  0x5c   : > { %586 = vmatmul.mubr.bf16.gmra.mxu0 %v1327_v42  ;;  %650 = vmatmul.mubr.bf16.gmra.mxu1 %v1328_v43 }
  0x5d   : > { %593 = vmatprep.mubr.bf16.mxu0 %v1329_v44  ;;  %657 = vmatprep.mubr.bf16.mxu1 %v1331_v45 }
  0x64   : > { %594 = vmatmul.mubr.bf16.gmra.mxu0 %v1333_v46  ;;  %658 = vmatmul.mubr.bf16.gmra.mxu1 %v1334_v47 }
  0xec   : > { %v1151_v48 = vpop.f32.mrf.mxu0  ;;  %v1199_v49 = vpop.f32.mrf.mxu1 }
  0xee   : > { %v1152_v50 = vpop.f32.mrf.mxu0  ;;  %v1200_v51 = vpop.f32.mrf.mxu1 }
  0xef   : > { %v1153_v53 = vadd.f32 %v1152_v50, %v1151_v48  ;;  %v1201_v54 = vadd.f32 %v1200_v51, %v1199_v49 }
  0xf0   : > { %v1154_v55 = vpop.f32.mrf.mxu0  ;;  %v1202_v56 = vpop.f32.mrf.mxu1 }
  0xf1   : > { %v540_v57 = vadd.f32 %v1153_v53, %v1462_v52  ;;  %v604_v58 = vadd.f32 %v1201_v54, %v1462_v52 }
  0xf2   : > { %v1155_v59 = vpop.f32.mrf.mxu0  ;;  %v1203_v60 = vpop.f32.mrf.mxu1 }
  0xf3   : > { %v1156_v61 = vadd.f32 %v1155_v59, %v1154_v55  ;;  %v1204_v62 = vadd.f32 %v1203_v60, %v1202_v56  ;;  %v666_v3 = vmax.f32 %v540_v57, 0.0  ;;  %v682_v4 = vmax.f32 %v604_v58, 0.0 }
  0xf4   : > { %v1157_v63 = vpop.f32.mrf.mxu0  ;;  %v1205_v0 = vpop.f32.mrf.mxu1 }
  0xf5   : > { %v543_v1 = vadd.f32 %v1156_v61, %v1462_v52  ;;  %v607_v2 = vadd.f32 %v1204_v62, %v1462_v52 }
  0xf6   : > { %v1158_v5 = vpop.f32.mrf.mxu0  ;;  %v1206_v6 = vpop.f32.mrf.mxu1 }
  0xf7   : > { %v667_v7 = vmax.f32 %v543_v1, 0.0  ;;  %v683_v8 = vmax.f32 %v607_v2, 0.0  ;;  %v1159_v9 = vadd.f32 %v1158_v5, %v1157_v63  ;;  %v1207_v10 = vadd.f32 %v1206_v6, %v1205_v0 }
  0xf8   : > { %v1160_v11 = vpop.f32.mrf.mxu0  ;;  %v1208_v12 = vpop.f32.mrf.mxu1 }
  0xf9   : > { %v1043_v13 = vpack.c.bf16 %v667_v7, %v666_v3  ;;  %v1083_v14 = vpack.c.bf16 %v683_v8, %v682_v4  ;;  %v548_v15 = vadd.f32 %v1159_v9, %v1462_v52  ;;  %v612_v16 = vadd.f32 %v1207_v10, %v1462_v52 }
  0xfa   : > { %v1161_v17 = vpop.f32.mrf.mxu0  ;;  %v1209_v18 = vpop.f32.mrf.mxu1 }
  0xfb   : > { %1044 = vst [vmem:[%s1472_s4] sm:$0xff] %v1043_v13   ;;  %1127 = vst [vmem:[%s1472_s4 + $0x40] sm:$0xff] %v1083_v14   ;;  %v1162_v19 = vadd.f32 %v1161_v17, %v1160_v11  ;;  %v1210_v20 = vadd.f32 %v1209_v18, %v1208_v12  ;;  %v668_v25 = vmax.f32 %v548_v15, 0.0  ;;  %v684_v26 = vmax.f32 %v612_v16, 0.0 }
  0xfc   : > { %v1163_v21 = vpop.f32.mrf.mxu0  ;;  %v1211_v22 = vpop.f32.mrf.mxu1 }
  0xfd   : > { %v551_v23 = vadd.f32 %v1162_v19, %v1462_v52  ;;  %v615_v24 = vadd.f32 %v1210_v20, %v1462_v52 }
  0xfe   : > { %v1164_v27 = vpop.f32.mrf.mxu0  ;;  %v1212_v28 = vpop.f32.mrf.mxu1 }
  0xff   : > { %v669_v29 = vmax.f32 %v551_v23, 0.0  ;;  %v685_v30 = vmax.f32 %v615_v24, 0.0  ;;  %v1165_v31 = vadd.f32 %v1164_v27, %v1163_v21  ;;  %v1213_v32 = vadd.f32 %v1212_v28, %v1211_v22 }
 0x100   : > { %v1166_v33 = vpop.f32.mrf.mxu0  ;;  %v1214_v34 = vpop.f32.mrf.mxu1 }
 0x101   : > { %v1048_v35 = vpack.c.bf16 %v669_v29, %v668_v25  ;;  %v1088_v36 = vpack.c.bf16 %v685_v30, %v684_v26  ;;  %v556_v37 = vadd.f32 %v1165_v31, %v1462_v52  ;;  %v620_v38 = vadd.f32 %v1213_v32, %v1462_v52 }
 0x102   : > { %v1167_v39 = vpop.f32.mrf.mxu0  ;;  %v1215_v40 = vpop.f32.mrf.mxu1 }
 0x103   : > { %1120 = vst [vmem:[%s1472_s4 + $0x8] sm:$0xff] %v1048_v35   ;;  %1128 = vst [vmem:[%s1472_s4 + $0x48] sm:$0xff] %v1088_v36   ;;  %v1168_v41 = vadd.f32 %v1167_v39, %v1166_v33  ;;  %v1216_v42 = vadd.f32 %v1215_v40, %v1214_v34  ;;  %v670_v47 = vmax.f32 %v556_v37, 0.0  ;;  %v686_v48 = vmax.f32 %v620_v38, 0.0 }
 0x104   : > { %v1169_v43 = vpop.f32.mrf.mxu0  ;;  %v1217_v44 = vpop.f32.mrf.mxu1 }
 0x105   : > { %v559_v45 = vadd.f32 %v1168_v41, %v1462_v52  ;;  %v623_v46 = vadd.f32 %v1216_v42, %v1462_v52 }
 0x106   : > { %v1170_v49 = vpop.f32.mrf.mxu0  ;;  %v1218_v50 = vpop.f32.mrf.mxu1 }
 0x107   : > { %v671_v51 = vmax.f32 %v559_v45, 0.0  ;;  %v687_v53 = vmax.f32 %v623_v46, 0.0  ;;  %v1171_v54 = vadd.f32 %v1170_v49, %v1169_v43  ;;  %v1219_v55 = vadd.f32 %v1218_v50, %v1217_v44 }
 0x108   : > { %v1172_v56 = vpop.f32.mrf.mxu0  ;;  %v1220_v57 = vpop.f32.mrf.mxu1 }
 0x109   : > { %v1053_v58 = vpack.c.bf16 %v671_v51, %v670_v47  ;;  %v1093_v59 = vpack.c.bf16 %v687_v53, %v686_v48  ;;  %v564_v60 = vadd.f32 %v1171_v54, %v1462_v52  ;;  %v628_v61 = vadd.f32 %v1219_v55, %v1462_v52 }
 0x10a   : > { %v1173_v62 = vpop.f32.mrf.mxu0  ;;  %v1221_v63 = vpop.f32.mrf.mxu1 }
 0x10b   : > { %1121 = vst [vmem:[%s1472_s4 + $0x10] sm:$0xff] %v1053_v58   ;;  %1129 = vst [vmem:[%s1472_s4 + $0x50] sm:$0xff] %v1093_v59   ;;  %v1174_v0 = vadd.f32 %v1173_v62, %v1172_v56  ;;  %v1222_v1 = vadd.f32 %v1221_v63, %v1220_v57  ;;  %v672_v6 = vmax.f32 %v564_v60, 0.0  ;;  %v688_v7 = vmax.f32 %v628_v61, 0.0 }
 0x10c   : > { %v1175_v2 = vpop.f32.mrf.mxu0  ;;  %v1223_v3 = vpop.f32.mrf.mxu1 }
 0x10d   : > { %v567_v4 = vadd.f32 %v1174_v0, %v1462_v52  ;;  %v631_v5 = vadd.f32 %v1222_v1, %v1462_v52 }
 0x10e   : > { %v1176_v8 = vpop.f32.mrf.mxu0  ;;  %v1224_v9 = vpop.f32.mrf.mxu1 }
 0x10f   : > { %v673_v10 = vmax.f32 %v567_v4, 0.0  ;;  %v689_v11 = vmax.f32 %v631_v5, 0.0  ;;  %v1177_v12 = vadd.f32 %v1176_v8, %v1175_v2  ;;  %v1225_v13 = vadd.f32 %v1224_v9, %v1223_v3 }
 0x110   : > { %v1178_v14 = vpop.f32.mrf.mxu0  ;;  %v1226_v15 = vpop.f32.mrf.mxu1 }
 0x111   : > { %v1058_v16 = vpack.c.bf16 %v673_v10, %v672_v6  ;;  %v1098_v17 = vpack.c.bf16 %v689_v11, %v688_v7  ;;  %v572_v18 = vadd.f32 %v1177_v12, %v1462_v52  ;;  %v636_v19 = vadd.f32 %v1225_v13, %v1462_v52 }
 0x112   : > { %v1179_v20 = vpop.f32.mrf.mxu0  ;;  %v1227_v21 = vpop.f32.mrf.mxu1 }
 0x113   : > { %1122 = vst [vmem:[%s1472_s4 + $0x18] sm:$0xff] %v1058_v16   ;;  %1130 = vst [vmem:[%s1472_s4 + $0x58] sm:$0xff] %v1098_v17   ;;  %v1180_v22 = vadd.f32 %v1179_v20, %v1178_v14  ;;  %v1228_v23 = vadd.f32 %v1227_v21, %v1226_v15  ;;  %v674_v28 = vmax.f32 %v572_v18, 0.0  ;;  %v690_v29 = vmax.f32 %v636_v19, 0.0 }
 0x114   : > { %v1181_v24 = vpop.f32.mrf.mxu0  ;;  %v1229_v25 = vpop.f32.mrf.mxu1 }
 0x115   : > { %v575_v26 = vadd.f32 %v1180_v22, %v1462_v52  ;;  %v639_v27 = vadd.f32 %v1228_v23, %v1462_v52 }
 0x116   : > { %v1182_v30 = vpop.f32.mrf.mxu0  ;;  %v1230_v31 = vpop.f32.mrf.mxu1 }
 0x117   : > { %v675_v32 = vmax.f32 %v575_v26, 0.0  ;;  %v691_v33 = vmax.f32 %v639_v27, 0.0  ;;  %v1183_v34 = vadd.f32 %v1182_v30, %v1181_v24  ;;  %v1231_v35 = vadd.f32 %v1230_v31, %v1229_v25 }
 0x118   : > { %v1184_v36 = vpop.f32.mrf.mxu0  ;;  %v1232_v37 = vpop.f32.mrf.mxu1 }
 0x119   : > { %v1063_v38 = vpack.c.bf16 %v675_v32, %v674_v28  ;;  %v1103_v39 = vpack.c.bf16 %v691_v33, %v690_v29  ;;  %v580_v40 = vadd.f32 %v1183_v34, %v1462_v52  ;;  %v644_v41 = vadd.f32 %v1231_v35, %v1462_v52 }
 0x11a   : > { %v1185_v42 = vpop.f32.mrf.mxu0  ;;  %v1233_v43 = vpop.f32.mrf.mxu1 }
 0x11b   : > { %1123 = vst [vmem:[%s1472_s4 + $0x20] sm:$0xff] %v1063_v38   ;;  %1131 = vst [vmem:[%s1472_s4 + $0x60] sm:$0xff] %v1103_v39   ;;  %v1186_v44 = vadd.f32 %v1185_v42, %v1184_v36  ;;  %v1234_v45 = vadd.f32 %v1233_v43, %v1232_v37  ;;  %v676_v50 = vmax.f32 %v580_v40, 0.0  ;;  %v692_v51 = vmax.f32 %v644_v41, 0.0 }
 0x11c   : > { %v1187_v46 = vpop.f32.mrf.mxu0  ;;  %v1235_v47 = vpop.f32.mrf.mxu1 }
 0x11d   : > { %v583_v48 = vadd.f32 %v1186_v44, %v1462_v52  ;;  %v647_v49 = vadd.f32 %v1234_v45, %v1462_v52 }
 0x11e   : > { %v1188_v53 = vpop.f32.mrf.mxu0  ;;  %v1236_v54 = vpop.f32.mrf.mxu1 }
 0x11f   : > { %v677_v55 = vmax.f32 %v583_v48, 0.0  ;;  %v693_v56 = vmax.f32 %v647_v49, 0.0  ;;  %v1189_v57 = vadd.f32 %v1188_v53, %v1187_v46  ;;  %v1237_v58 = vadd.f32 %v1236_v54, %v1235_v47 }
 0x120   : > { %v1190_v59 = vpop.f32.mrf.mxu0  ;;  %v1238_v60 = vpop.f32.mrf.mxu1 }
 0x121   : > { %v1068_v61 = vpack.c.bf16 %v677_v55, %v676_v50  ;;  %v1108_v62 = vpack.c.bf16 %v693_v56, %v692_v51  ;;  %v588_v63 = vadd.f32 %v1189_v57, %v1462_v52  ;;  %v652_v0 = vadd.f32 %v1237_v58, %v1462_v52 }
 0x122   : > { %v1191_v1 = vpop.f32.mrf.mxu0  ;;  %v1239_v2 = vpop.f32.mrf.mxu1 }
 0x123   : > { %1124 = vst [vmem:[%s1472_s4 + $0x28] sm:$0xff] %v1068_v61   ;;  %1132 = vst [vmem:[%s1472_s4 + $0x68] sm:$0xff] %v1108_v62   ;;  %v1192_v3 = vadd.f32 %v1191_v1, %v1190_v59  ;;  %v1240_v4 = vadd.f32 %v1239_v2, %v1238_v60  ;;  %v678_v9 = vmax.f32 %v588_v63, 0.0  ;;  %v694_v10 = vmax.f32 %v652_v0, 0.0 }
 0x124   : > { %v1193_v5 = vpop.f32.mrf.mxu0  ;;  %v1241_v6 = vpop.f32.mrf.mxu1 }
 0x125   : > { %v591_v7 = vadd.f32 %v1192_v3, %v1462_v52  ;;  %v655_v8 = vadd.f32 %v1240_v4, %v1462_v52 }
 0x126   : > { %v1194_v11 = vpop.f32.mrf.mxu0  ;;  %v1242_v12 = vpop.f32.mrf.mxu1 }
 0x127   : > { %v679_v13 = vmax.f32 %v591_v7, 0.0  ;;  %v695_v14 = vmax.f32 %v655_v8, 0.0  ;;  %v1195_v15 = vadd.f32 %v1194_v11, %v1193_v5  ;;  %v1243_v16 = vadd.f32 %v1242_v12, %v1241_v6 }
 0x128   : > { %v1196_v17 = vpop.f32.mrf.mxu0  ;;  %v1244_v18 = vpop.f32.mrf.mxu1 }
 0x129   : > { %v1073_v19 = vpack.c.bf16 %v679_v13, %v678_v9  ;;  %v1113_v20 = vpack.c.bf16 %v695_v14, %v694_v10  ;;  %v596_v23 = vadd.f32 %v1195_v15, %v1462_v52  ;;  %v660_v24 = vadd.f32 %v1243_v16, %v1462_v52 }
 0x12a   : > { %v1197_v21 = vpop.f32.mrf.mxu0  ;;  %v1245_v22 = vpop.f32.mrf.mxu1 }
 0x12b   : > { %1125 = vst [vmem:[%s1472_s4 + $0x30] sm:$0xff] %v1073_v19   ;;  %1133 = vst [vmem:[%s1472_s4 + $0x70] sm:$0xff] %v1113_v20   ;;  %v1198_v25 = vadd.f32 %v1197_v21, %v1196_v17  ;;  %v1246_v26 = vadd.f32 %v1245_v22, %v1244_v18  ;;  %v680_v29 = vmax.f32 %v596_v23, 0.0  ;;  %v696_v30 = vmax.f32 %v660_v24, 0.0 }
 0x12d   : > { %v599_v27 = vadd.f32 %v1198_v25, %v1462_v52  ;;  %v663_v28 = vadd.f32 %v1246_v26, %v1462_v52 }
 0x12f   : > { %v681_v31 = vmax.f32 %v599_v27, 0.0  ;;  %v697_v32 = vmax.f32 %v663_v28, 0.0 }
 0x131   : > { %v1078_v33 = vpack.c.bf16 %v681_v31, %v680_v29  ;;  %v1118_v34 = vpack.c.bf16 %v697_v32, %v696_v30 }
 0x133   : > { %1126 = vst [vmem:[%s1472_s4 + $0x38] sm:$0xff] %v1078_v33   ;;  %1134 = vst [vmem:[%s1472_s4 + $0x78] sm:$0xff] %v1118_v34  }
 0x134 PF: > { %s13_s12 = sadd.s32 1, %s1341_s12  }
 0x135   : > { %p10_p4 = scmp.ge.s32.totalorder %s13_s12, 6  }
 0x137   :  { %12 = sbr.rel (!%p10_p4) target bundleno = 1 (0x1), region = 62 }

// kernel: cnn_base_forward.5
= control target key start
LH: loop header
LB: loop body
LE: loop exit
PB: predicated region body
PF: predicated region fallthrough
CT: control target
= control target key end

     0   :  { %s1676_s1 = inlined_call_operand.vmem [shape: bf16[512,128], index: 1, kind: input, shape index: {}]   ;;  %s1677_s0 = inlined_call_operand.vmem [shape: bf16[176,512], index: 0, kind: input, shape index: {}]   ;;  %s1678_s2 = inlined_call_operand.vmem [shape: f32[1,128], index: 2, kind: input, shape index: {}]   ;;  %s1679_s3 = inlined_call_operand.vmem [shape: bf16[176,128], index: 3, kind: output, shape index: {}]  }
   0x1   :  { %v1270_v0 = vld [vmem:[%s1676_s1 + $0x78] sm:$0xff]   ;;  %v1274_v4 = vld [vmem:[%s1676_s1 + $0x70] sm:$0xff]   ;;  %v1278_v8 = vld [vmem:[%s1676_s1 + $0x68] sm:$0xff]  }
   0x2   :  { %v1271_v1 = vld [vmem:[%s1676_s1 + $0xf8] sm:$0xff]   ;;  %1106 = vmatprep.subr.bf16.mxu0 %v1270_v0  ;;  %v1275_v5 = vld [vmem:[%s1676_s1 + $0xf0] sm:$0xff]   ;;  %v1279_v9 = vld [vmem:[%s1676_s1 + $0xe8] sm:$0xff]  }
   0x3   :  { %v1272_v2 = vld [vmem:[%s1676_s1 + $0x38] sm:$0xff]   ;;  %1188 = vmatprep.subr.bf16.mxu1 %v1271_v1  ;;  %v1276_v6 = vld [vmem:[%s1676_s1 + $0x30] sm:$0xff]   ;;  %v1280_v10 = vld [vmem:[%s1676_s1 + $0x28] sm:$0xff]  }
   0x4   :  { %v1273_v3 = vld [vmem:[%s1676_s1 + $0xb8] sm:$0xff]   ;;  %1107 = vmatpush3.bf16.msra.mxu0 %v1272_v2  ;;  %v1277_v7 = vld [vmem:[%s1676_s1 + $0xb0] sm:$0xff]   ;;  %v1281_v11 = vld [vmem:[%s1676_s1 + $0xa8] sm:$0xff]  }
   0x5   :  { %1189 = vmatpush3.bf16.msra.mxu1 %v1273_v3  ;;  %1108 = vmatprep.subr.bf16.mxu0 %v1274_v4  ;;  %v1282_v12 = vld [vmem:[%s1676_s1 + $0x60] sm:$0xff]   ;;  %v1286_v16 = vld [vmem:[%s1676_s1 + $0x58] sm:$0xff]   ;;  %v1290_v20 = vld [vmem:[%s1676_s1 + $0x50] sm:$0xff]  }
   0x6   :  { %1190 = vmatprep.subr.bf16.mxu1 %v1275_v5  ;;  %v1283_v13 = vld [vmem:[%s1676_s1 + $0xe0] sm:$0xff]   ;;  %v1287_v17 = vld [vmem:[%s1676_s1 + $0xd8] sm:$0xff]   ;;  %v1291_v21 = vld [vmem:[%s1676_s1 + $0xd0] sm:$0xff]  }
   0x7   :  { %v1284_v14 = vld [vmem:[%s1676_s1 + $0x20] sm:$0xff]   ;;  %v1288_v18 = vld [vmem:[%s1676_s1 + $0x18] sm:$0xff]   ;;  %v1292_v22 = vld [vmem:[%s1676_s1 + $0x10] sm:$0xff]  }
   0x8   :  { %1109 = vmatpush3.bf16.msra.mxu0 %v1276_v6  ;;  %v1285_v15 = vld [vmem:[%s1676_s1 + $0xa0] sm:$0xff]   ;;  %v1289_v19 = vld [vmem:[%s1676_s1 + $0x98] sm:$0xff]   ;;  %v1293_v23 = vld [vmem:[%s1676_s1 + $0x90] sm:$0xff]  }
   0x9   :  { %1191 = vmatpush3.bf16.msra.mxu1 %v1277_v7  ;;  %1110 = vmatprep.subr.bf16.mxu0 %v1278_v8  ;;  %v1294_v24 = vld [vmem:[%s1676_s1 + $0x48] sm:$0xff]   ;;  %v1298_v28 = vld [vmem:[%s1676_s1 + $0x40] sm:$0xff]  }
   0xa   :  { %1192 = vmatprep.subr.bf16.mxu1 %v1279_v9  ;;  %v1295_v25 = vld [vmem:[%s1676_s1 + $0xc8] sm:$0xff]   ;;  %v1299_v29 = vld [vmem:[%s1676_s1 + $0xc0] sm:$0xff]  }
   0xb   :  { %v1296_v26 = vld [vmem:[%s1676_s1 + $0x8] sm:$0xff]   ;;  %v1300_v30 = vld [vmem:[%s1676_s1] sm:$0xff]  }
   0xc   :  { %1111 = vmatpush3.bf16.msra.mxu0 %v1280_v10  ;;  %v1297_v27 = vld [vmem:[%s1676_s1 + $0x88] sm:$0xff]   ;;  %v1301_v31 = vld [vmem:[%s1676_s1 + $0x80] sm:$0xff]  }
   0xd   :  { %1193 = vmatpush3.bf16.msra.mxu1 %v1281_v11  ;;  %1112 = vmatprep.subr.bf16.mxu0 %v1282_v12  ;;  %v1302_v32 = vld [vmem:[%s1677_s0] ss:$16 sps:$4 sm:$0xff]   ;;  %v1304_v33 = vld [vmem:[%s1677_s0 + $0x4] ss:$16 sps:$4 sm:$0xff]   ;;  %v1305_v34 = vld [vmem:[%s1677_s0 + $0x8] ss:$16 sps:$4 sm:$0xff]  }
   0xe   :  { %1194 = vmatprep.subr.bf16.mxu1 %v1283_v13  ;;  %v1307_v35 = vld [vmem:[%s1677_s0 + $0xc] ss:$16 sps:$4 sm:$0xff]   ;;  %574 = vmatprep.mubr.bf16.mxu0 %v1304_v33  ;;  %v1308_v36 = vld [vmem:[%s1677_s0 + $0x24] ss:$16 sps:$4 sm:$0xff]   ;;  %v1312_v38 = vld [vmem:[%s1677_s0 + $0x20] ss:$16 sps:$4 sm:$0xff]  }
   0xf   :  { %695 = vmatprep.mubr.bf16.mxu1 %v1307_v35  ;;  %v1310_v37 = vld [vmem:[%s1677_s0 + $0x2c] ss:$16 sps:$4 sm:$0xff]   ;;  %v1313_v39 = vld [vmem:[%s1677_s0 + $0x28] ss:$16 sps:$4 sm:$0xff]   ;;  %v1314_v40 = vld [vmem:[%s1677_s0 + $0x44] ss:$16 sps:$4 sm:$0xff]  }
  0x10   :  { %1113 = vmatpush3.bf16.msra.mxu0 %v1284_v14  ;;  %v1316_v41 = vld [vmem:[%s1677_s0 + $0x4c] ss:$16 sps:$4 sm:$0xff]   ;;  %v1318_v42 = vld [vmem:[%s1677_s0 + $0x40] ss:$16 sps:$4 sm:$0xff]   ;;  %v1319_v43 = vld [vmem:[%s1677_s0 + $0x48] ss:$16 sps:$4 sm:$0xff]  }
  0x11   :  { %1195 = vmatpush3.bf16.msra.mxu1 %v1285_v15  ;;  %1114 = vmatprep.subr.bf16.mxu0 %v1286_v16  ;;  %v1320_v44 = vld [vmem:[%s1677_s0 + $0x64] ss:$16 sps:$4 sm:$0xff]   ;;  %v1322_v45 = vld [vmem:[%s1677_s0 + $0x6c] ss:$16 sps:$4 sm:$0xff]   ;;  %v1324_v46 = vld [vmem:[%s1677_s0 + $0x60] ss:$16 sps:$4 sm:$0xff]  }
  0x12   :  { %1196 = vmatprep.subr.bf16.mxu1 %v1287_v17  ;;  %v1325_v47 = vld [vmem:[%s1677_s0 + $0x68] ss:$16 sps:$4 sm:$0xff]   ;;  %v1326_v48 = vld [vmem:[%s1677_s0 + $0x84] ss:$16 sps:$4 sm:$0xff]   ;;  %v1328_v49 = vld [vmem:[%s1677_s0 + $0x8c] ss:$16 sps:$4 sm:$0xff]  }
  0x13   :  { %v1330_v50 = vld [vmem:[%s1677_s0 + $0x80] ss:$16 sps:$4 sm:$0xff]   ;;  %v1331_v51 = vld [vmem:[%s1677_s0 + $0x88] ss:$16 sps:$4 sm:$0xff]   ;;  %v1332_v52 = vld [vmem:[%s1677_s0 + $0xa4] ss:$16 sps:$4 sm:$0xff]  }
  0x14   :  { %1115 = vmatpush3.bf16.msra.mxu0 %v1288_v18  ;;  %v1334_v53 = vld [vmem:[%s1677_s0 + $0xac] ss:$16 sps:$4 sm:$0xff]   ;;  %v1336_v54 = vld [vmem:[%s1677_s0 + $0xa0] ss:$16 sps:$4 sm:$0xff]   ;;  %v1337_v55 = vld [vmem:[%s1677_s0 + $0xa8] ss:$16 sps:$4 sm:$0xff]  }
  0x15   :  { %1197 = vmatpush3.bf16.msra.mxu1 %v1289_v19  ;;  %1116 = vmatprep.subr.bf16.mxu0 %v1290_v20  ;;  %v1338_v56 = vld [vmem:[%s1677_s0 + $0xc4] ss:$16 sps:$4 sm:$0xff]   ;;  %v1340_v57 = vld [vmem:[%s1677_s0 + $0xcc] ss:$16 sps:$4 sm:$0xff]   ;;  %v1342_v58 = vld [vmem:[%s1677_s0 + $0xc0] ss:$16 sps:$4 sm:$0xff]  }
  0x16   :  { %1198 = vmatprep.subr.bf16.mxu1 %v1291_v21  ;;  %v1343_v59 = vld [vmem:[%s1677_s0 + $0xc8] ss:$16 sps:$4 sm:$0xff]   ;;  %v1344_v60 = vld [vmem:[%s1677_s0 + $0xe4] ss:$16 sps:$4 sm:$0xff]   ;;  %v1346_v61 = vld [vmem:[%s1677_s0 + $0xec] ss:$16 sps:$4 sm:$0xff]  }
  0x17   :  { %v1348_v62 = vld [vmem:[%s1677_s0 + $0xe0] ss:$16 sps:$4 sm:$0xff]   ;;  %v1349_v63 = vld [vmem:[%s1677_s0 + $0xe8] ss:$16 sps:$4 sm:$0xff]   ;;  %v1350_v0 = vld [vmem:[%s1677_s0 + $0x104] ss:$16 sps:$4 sm:$0xff]  }
  0x18   :  { %1117 = vmatpush3.bf16.msra.mxu0 %v1292_v22  ;;  %v1352_v1 = vld [vmem:[%s1677_s0 + $0x10c] ss:$16 sps:$4 sm:$0xff]   ;;  %v1354_v2 = vld [vmem:[%s1677_s0 + $0x100] ss:$16 sps:$4 sm:$0xff]   ;;  %v1355_v3 = vld [vmem:[%s1677_s0 + $0x108] ss:$16 sps:$4 sm:$0xff]  }
  0x19   :  { %1199 = vmatpush3.bf16.msra.mxu1 %v1293_v23  ;;  %1118 = vmatprep.subr.bf16.mxu0 %v1294_v24  ;;  %v1356_v4 = vld [vmem:[%s1677_s0 + $0x124] ss:$16 sps:$4 sm:$0xff]   ;;  %v1358_v5 = vld [vmem:[%s1677_s0 + $0x12c] ss:$16 sps:$4 sm:$0xff]   ;;  %v1360_v6 = vld [vmem:[%s1677_s0 + $0x120] ss:$16 sps:$4 sm:$0xff]  }
  0x1a   :  { %1200 = vmatprep.subr.bf16.mxu1 %v1295_v25  ;;  %v1361_v7 = vld [vmem:[%s1677_s0 + $0x128] ss:$16 sps:$4 sm:$0xff]   ;;  %v1362_v8 = vld [vmem:[%s1677_s0 + $0x144] ss:$16 sps:$4 sm:$0xff]   ;;  %v1364_v9 = vld [vmem:[%s1677_s0 + $0x14c] ss:$16 sps:$4 sm:$0xff]  }
  0x1b   :  { %v1366_v10 = vld [vmem:[%s1677_s0 + $0x140] ss:$16 sps:$4 sm:$0xff]   ;;  %v1367_v11 = vld [vmem:[%s1677_s0 + $0x148] ss:$16 sps:$4 sm:$0xff]  }
  0x1c   :  { %1119 = vmatpush3.bf16.msra.mxu0 %v1296_v26  ;;  %v1619_v14 = vld [vmem:[%s1678_s2] ss:$0 sm:$0xff] }
  0x1d   :  { %1201 = vmatpush3.bf16.msra.mxu1 %v1297_v27  ;;  %1120 = vmatprep.subr.bf16.mxu0 %v1298_v28 }
  0x1e   :  { %1202 = vmatprep.subr.bf16.mxu1 %v1299_v29 }
  0x20   :  { %1121 = vmatpush3.bf16.msra.mxu0 %v1300_v30 }
  0x21   :  { %1203 = vmatpush3.bf16.msra.mxu1 %v1301_v31 }
  0x23   :  { %575 = vmatmul.mubr.bf16.vlgmr.msra.gmra.mxu0 %v1302_v32 }
  0x24   :  { %696 = vmatmul.mubr.bf16.vlgmr.msra.gmra.mxu1 %v1305_v34  ;;  %582 = vmatprep.mubr.bf16.mxu0 %v1308_v36 }
  0x25   :  { %703 = vmatprep.mubr.bf16.mxu1 %v1310_v37 }
  0x2b   :  { %583 = vmatmul.mubr.bf16.gmra.mxu0 %v1312_v38 }
  0x2c   :  { %704 = vmatmul.mubr.bf16.gmra.mxu1 %v1313_v39  ;;  %590 = vmatprep.mubr.bf16.mxu0 %v1314_v40 }
  0x2d   :  { %711 = vmatprep.mubr.bf16.mxu1 %v1316_v41 }
  0x33   :  { %591 = vmatmul.mubr.bf16.gmra.mxu0 %v1318_v42 }
  0x34   :  { %712 = vmatmul.mubr.bf16.gmra.mxu1 %v1319_v43  ;;  %598 = vmatprep.mubr.bf16.mxu0 %v1320_v44 }
  0x35   :  { %719 = vmatprep.mubr.bf16.mxu1 %v1322_v45 }
  0x3b   :  { %599 = vmatmul.mubr.bf16.gmra.mxu0 %v1324_v46 }
  0x3c   :  { %720 = vmatmul.mubr.bf16.gmra.mxu1 %v1325_v47  ;;  %606 = vmatprep.mubr.bf16.mxu0 %v1326_v48 }
  0x3d   :  { %727 = vmatprep.mubr.bf16.mxu1 %v1328_v49 }
  0x43   :  { %607 = vmatmul.mubr.bf16.gmra.mxu0 %v1330_v50 }
  0x44   :  { %728 = vmatmul.mubr.bf16.gmra.mxu1 %v1331_v51  ;;  %614 = vmatprep.mubr.bf16.mxu0 %v1332_v52 }
  0x45   :  { %735 = vmatprep.mubr.bf16.mxu1 %v1334_v53 }
  0x4b   :  { %615 = vmatmul.mubr.bf16.gmra.mxu0 %v1336_v54 }
  0x4c   :  { %736 = vmatmul.mubr.bf16.gmra.mxu1 %v1337_v55  ;;  %622 = vmatprep.mubr.bf16.mxu0 %v1338_v56 }
  0x4d   :  { %743 = vmatprep.mubr.bf16.mxu1 %v1340_v57 }
  0x53   :  { %623 = vmatmul.mubr.bf16.gmra.mxu0 %v1342_v58 }
  0x54   :  { %744 = vmatmul.mubr.bf16.gmra.mxu1 %v1343_v59  ;;  %630 = vmatprep.mubr.bf16.mxu0 %v1344_v60 }
  0x55   :  { %751 = vmatprep.mubr.bf16.mxu1 %v1346_v61 }
  0x5b   :  { %631 = vmatmul.mubr.bf16.gmra.mxu0 %v1348_v62 }
  0x5c   :  { %752 = vmatmul.mubr.bf16.gmra.mxu1 %v1349_v63  ;;  %638 = vmatprep.mubr.bf16.mxu0 %v1350_v0 }
  0x5d   :  { %759 = vmatprep.mubr.bf16.mxu1 %v1352_v1 }
  0x63   :  { %639 = vmatmul.mubr.bf16.gmra.mxu0 %v1354_v2 }
  0x64   :  { %760 = vmatmul.mubr.bf16.gmra.mxu1 %v1355_v3  ;;  %646 = vmatprep.mubr.bf16.mxu0 %v1356_v4 }
  0x65   :  { %767 = vmatprep.mubr.bf16.mxu1 %v1358_v5 }
  0x6b   :  { %647 = vmatmul.mubr.bf16.gmra.mxu0 %v1360_v6 }
  0x6c   :  { %768 = vmatmul.mubr.bf16.gmra.mxu1 %v1361_v7  ;;  %654 = vmatprep.mubr.bf16.mxu0 %v1362_v8 }
  0x6d   :  { %775 = vmatprep.mubr.bf16.mxu1 %v1364_v9 }
  0x73   :  { %655 = vmatmul.mubr.bf16.gmra.mxu0 %v1366_v10 }
  0x74   :  { %776 = vmatmul.mubr.bf16.gmra.mxu1 %v1367_v11 }
  0xe3   :  { %v1122_v12 = vpop.f32.mrf.mxu0 }
  0xe4   :  { %v1204_v13 = vpop.f32.mrf.mxu1 }
  0xe5   :  { %v1123_v15 = vpop.f32.mrf.mxu0 }
  0xe6   :  { %v1124_v16 = vadd.f32 %v1123_v15, %v1122_v12  ;;  %v1205_v17 = vpop.f32.mrf.mxu1 }
  0xe7   :  { %v1125_v18 = vpop.f32.mrf.mxu0  ;;  %v1206_v22 = vadd.f32 %v1205_v17, %v1204_v13 }
  0xe8   :  { %v577_v19 = vadd.f32 %v1124_v16, %v1619_v14  ;;  %v1207_v20 = vpop.f32.mrf.mxu1 }
  0xe9   :  { %v1126_v21 = vpop.f32.mrf.mxu0 }
  0xea   :  { %v1127_v23 = vadd.f32 %v1126_v21, %v1125_v18  ;;  %v1208_v24 = vpop.f32.mrf.mxu1  ;;  %v698_v26 = vadd.f32 %v1206_v22, %v577_v19 }
  0xeb   :  { %v1128_v25 = vpop.f32.mrf.mxu0  ;;  %v1209_v28 = vadd.f32 %v1208_v24, %v1207_v20 }
  0xec   :  { %v580_v27 = vadd.f32 %v1127_v23, %v1619_v14  ;;  %v1210_v29 = vpop.f32.mrf.mxu1  ;;  %v784_v35 = vmax.f32 %v698_v26, 0.0 }
  0xed   :  { %v1129_v30 = vpop.f32.mrf.mxu0 }
  0xee   :  { %v701_v31 = vadd.f32 %v1209_v28, %v580_v27  ;;  %v1130_v32 = vadd.f32 %v1129_v30, %v1128_v25  ;;  %v1211_v33 = vpop.f32.mrf.mxu1 }
  0xef   :  { %v1131_v34 = vpop.f32.mrf.mxu0  ;;  %v1212_v41 = vadd.f32 %v1211_v33, %v1210_v29 }
  0xf0   :  { %v785_v36 = vmax.f32 %v701_v31, 0.0  ;;  %v585_v37 = vadd.f32 %v1130_v32, %v1619_v14  ;;  %v1213_v38 = vpop.f32.mrf.mxu1 }
  0xf1   :  { %v1132_v39 = vpop.f32.mrf.mxu0 }
  0xf2   :  { %v1044_v40 = vpack.c.bf16 %v785_v36, %v784_v35  ;;  %v1133_v42 = vadd.f32 %v1132_v39, %v1131_v34  ;;  %v1214_v43 = vpop.f32.mrf.mxu1  ;;  %v706_v45 = vadd.f32 %v1212_v41, %v585_v37 }
  0xf3   :  { %v1134_v44 = vpop.f32.mrf.mxu0  ;;  %v1215_v47 = vadd.f32 %v1214_v43, %v1213_v38 }
  0xf4   :  { %1045 = vst [vmem:[%s1679_s3] sm:$0xff] %v1044_v40   ;;  %v588_v46 = vadd.f32 %v1133_v42, %v1619_v14  ;;  %v1216_v48 = vpop.f32.mrf.mxu1  ;;  %v786_v54 = vmax.f32 %v706_v45, 0.0 }
  0xf5   :  { %v1135_v49 = vpop.f32.mrf.mxu0 }
  0xf6   :  { %v709_v50 = vadd.f32 %v1215_v47, %v588_v46  ;;  %v1136_v51 = vadd.f32 %v1135_v49, %v1134_v44  ;;  %v1217_v52 = vpop.f32.mrf.mxu1 }
  0xf7   :  { %v1137_v53 = vpop.f32.mrf.mxu0  ;;  %v1218_v60 = vadd.f32 %v1217_v52, %v1216_v48 }
  0xf8   :  { %v787_v55 = vmax.f32 %v709_v50, 0.0  ;;  %v593_v56 = vadd.f32 %v1136_v51, %v1619_v14  ;;  %v1219_v57 = vpop.f32.mrf.mxu1 }
  0xf9   :  { %v1138_v58 = vpop.f32.mrf.mxu0 }
  0xfa   :  { %v1049_v59 = vpack.c.bf16 %v787_v55, %v786_v54  ;;  %v1139_v61 = vadd.f32 %v1138_v58, %v1137_v53  ;;  %v1220_v62 = vpop.f32.mrf.mxu1  ;;  %v714_v0 = vadd.f32 %v1218_v60, %v593_v56 }
  0xfb   :  { %v1140_v63 = vpop.f32.mrf.mxu0  ;;  %v1221_v2 = vadd.f32 %v1220_v62, %v1219_v57 }
  0xfc   :  { %1096 = vst [vmem:[%s1679_s3 + $0x8] sm:$0xff] %v1049_v59   ;;  %v596_v1 = vadd.f32 %v1139_v61, %v1619_v14  ;;  %v1222_v3 = vpop.f32.mrf.mxu1  ;;  %v788_v9 = vmax.f32 %v714_v0, 0.0 }
  0xfd   :  { %v1141_v4 = vpop.f32.mrf.mxu0 }
  0xfe   :  { %v717_v5 = vadd.f32 %v1221_v2, %v596_v1  ;;  %v1142_v6 = vadd.f32 %v1141_v4, %v1140_v63  ;;  %v1223_v7 = vpop.f32.mrf.mxu1 }
  0xff   :  { %v1143_v8 = vpop.f32.mrf.mxu0  ;;  %v1224_v16 = vadd.f32 %v1223_v7, %v1222_v3 }
 0x100   :  { %v789_v10 = vmax.f32 %v717_v5, 0.0  ;;  %v601_v11 = vadd.f32 %v1142_v6, %v1619_v14  ;;  %v1225_v12 = vpop.f32.mrf.mxu1 }
 0x101   :  { %v1144_v13 = vpop.f32.mrf.mxu0 }
 0x102   :  { %v1054_v15 = vpack.c.bf16 %v789_v10, %v788_v9  ;;  %v1145_v17 = vadd.f32 %v1144_v13, %v1143_v8  ;;  %v1226_v18 = vpop.f32.mrf.mxu1  ;;  %v722_v20 = vadd.f32 %v1224_v16, %v601_v11 }
 0x103   :  { %v1146_v19 = vpop.f32.mrf.mxu0  ;;  %v1227_v22 = vadd.f32 %v1226_v18, %v1225_v12 }
 0x104   :  { %1097 = vst [vmem:[%s1679_s3 + $0x10] sm:$0xff] %v1054_v15   ;;  %v604_v21 = vadd.f32 %v1145_v17, %v1619_v14  ;;  %v1228_v23 = vpop.f32.mrf.mxu1  ;;  %v790_v29 = vmax.f32 %v722_v20, 0.0 }
 0x105   :  { %v1147_v24 = vpop.f32.mrf.mxu0 }
 0x106   :  { %v725_v25 = vadd.f32 %v1227_v22, %v604_v21  ;;  %v1148_v26 = vadd.f32 %v1147_v24, %v1146_v19  ;;  %v1229_v27 = vpop.f32.mrf.mxu1 }
 0x107   :  { %v1149_v28 = vpop.f32.mrf.mxu0  ;;  %v1230_v35 = vadd.f32 %v1229_v27, %v1228_v23 }
 0x108   :  { %v791_v30 = vmax.f32 %v725_v25, 0.0  ;;  %v609_v31 = vadd.f32 %v1148_v26, %v1619_v14  ;;  %v1231_v32 = vpop.f32.mrf.mxu1 }
 0x109   :  { %v1150_v33 = vpop.f32.mrf.mxu0 }
 0x10a   :  { %v1059_v34 = vpack.c.bf16 %v791_v30, %v790_v29  ;;  %v1151_v36 = vadd.f32 %v1150_v33, %v1149_v28  ;;  %v1232_v37 = vpop.f32.mrf.mxu1  ;;  %v730_v39 = vadd.f32 %v1230_v35, %v609_v31 }
 0x10b   :  { %v1152_v38 = vpop.f32.mrf.mxu0  ;;  %v1233_v41 = vadd.f32 %v1232_v37, %v1231_v32 }
 0x10c   :  { %1098 = vst [vmem:[%s1679_s3 + $0x18] sm:$0xff] %v1059_v34   ;;  %v612_v40 = vadd.f32 %v1151_v36, %v1619_v14  ;;  %v1234_v42 = vpop.f32.mrf.mxu1  ;;  %v792_v48 = vmax.f32 %v730_v39, 0.0 }
 0x10d   :  { %v1153_v43 = vpop.f32.mrf.mxu0 }
 0x10e   :  { %v733_v44 = vadd.f32 %v1233_v41, %v612_v40  ;;  %v1154_v45 = vadd.f32 %v1153_v43, %v1152_v38  ;;  %v1235_v46 = vpop.f32.mrf.mxu1 }
 0x10f   :  { %v1155_v47 = vpop.f32.mrf.mxu0  ;;  %v1236_v54 = vadd.f32 %v1235_v46, %v1234_v42 }
 0x110   :  { %v793_v49 = vmax.f32 %v733_v44, 0.0  ;;  %v617_v50 = vadd.f32 %v1154_v45, %v1619_v14  ;;  %v1237_v51 = vpop.f32.mrf.mxu1 }
 0x111   :  { %v1156_v52 = vpop.f32.mrf.mxu0 }
 0x112   :  { %v1064_v53 = vpack.c.bf16 %v793_v49, %v792_v48  ;;  %v1157_v55 = vadd.f32 %v1156_v52, %v1155_v47  ;;  %v1238_v56 = vpop.f32.mrf.mxu1  ;;  %v738_v58 = vadd.f32 %v1236_v54, %v617_v50 }
 0x113   :  { %v1158_v57 = vpop.f32.mrf.mxu0  ;;  %v1239_v60 = vadd.f32 %v1238_v56, %v1237_v51 }
 0x114   :  { %1099 = vst [vmem:[%s1679_s3 + $0x20] sm:$0xff] %v1064_v53   ;;  %v620_v59 = vadd.f32 %v1157_v55, %v1619_v14  ;;  %v1240_v61 = vpop.f32.mrf.mxu1  ;;  %v794_v3 = vmax.f32 %v738_v58, 0.0 }
 0x115   :  { %v1159_v62 = vpop.f32.mrf.mxu0 }
 0x116   :  { %v741_v63 = vadd.f32 %v1239_v60, %v620_v59  ;;  %v1160_v0 = vadd.f32 %v1159_v62, %v1158_v57  ;;  %v1241_v1 = vpop.f32.mrf.mxu1 }
 0x117   :  { %v1161_v2 = vpop.f32.mrf.mxu0  ;;  %v1242_v9 = vadd.f32 %v1241_v1, %v1240_v61 }
 0x118   :  { %v795_v4 = vmax.f32 %v741_v63, 0.0  ;;  %v625_v5 = vadd.f32 %v1160_v0, %v1619_v14  ;;  %v1243_v6 = vpop.f32.mrf.mxu1 }
 0x119   :  { %v1162_v7 = vpop.f32.mrf.mxu0 }
 0x11a   :  { %v1069_v8 = vpack.c.bf16 %v795_v4, %v794_v3  ;;  %v1163_v10 = vadd.f32 %v1162_v7, %v1161_v2  ;;  %v1244_v11 = vpop.f32.mrf.mxu1  ;;  %v746_v13 = vadd.f32 %v1242_v9, %v625_v5 }
 0x11b   :  { %v1164_v12 = vpop.f32.mrf.mxu0  ;;  %v1245_v16 = vadd.f32 %v1244_v11, %v1243_v6 }
 0x11c   :  { %1100 = vst [vmem:[%s1679_s3 + $0x28] sm:$0xff] %v1069_v8   ;;  %v628_v15 = vadd.f32 %v1163_v10, %v1619_v14  ;;  %v1246_v17 = vpop.f32.mrf.mxu1  ;;  %v796_v23 = vmax.f32 %v746_v13, 0.0 }
 0x11d   :  { %v1165_v18 = vpop.f32.mrf.mxu0 }
 0x11e   :  { %v749_v19 = vadd.f32 %v1245_v16, %v628_v15  ;;  %v1166_v20 = vadd.f32 %v1165_v18, %v1164_v12  ;;  %v1247_v21 = vpop.f32.mrf.mxu1 }
 0x11f   :  { %v1167_v22 = vpop.f32.mrf.mxu0  ;;  %v1248_v29 = vadd.f32 %v1247_v21, %v1246_v17 }
 0x120   :  { %v797_v24 = vmax.f32 %v749_v19, 0.0  ;;  %v633_v25 = vadd.f32 %v1166_v20, %v1619_v14  ;;  %v1249_v26 = vpop.f32.mrf.mxu1 }
 0x121   :  { %v1168_v27 = vpop.f32.mrf.mxu0 }
 0x122   :  { %v1074_v28 = vpack.c.bf16 %v797_v24, %v796_v23  ;;  %v1169_v30 = vadd.f32 %v1168_v27, %v1167_v22  ;;  %v1250_v31 = vpop.f32.mrf.mxu1  ;;  %v754_v33 = vadd.f32 %v1248_v29, %v633_v25 }
 0x123   :  { %v1170_v32 = vpop.f32.mrf.mxu0  ;;  %v1251_v35 = vadd.f32 %v1250_v31, %v1249_v26 }
 0x124   :  { %1101 = vst [vmem:[%s1679_s3 + $0x30] sm:$0xff] %v1074_v28   ;;  %v636_v34 = vadd.f32 %v1169_v30, %v1619_v14  ;;  %v1252_v36 = vpop.f32.mrf.mxu1  ;;  %v798_v42 = vmax.f32 %v754_v33, 0.0 }
 0x125   :  { %v1171_v37 = vpop.f32.mrf.mxu0 }
 0x126   :  { %v757_v38 = vadd.f32 %v1251_v35, %v636_v34  ;;  %v1172_v39 = vadd.f32 %v1171_v37, %v1170_v32  ;;  %v1253_v40 = vpop.f32.mrf.mxu1 }
 0x127   :  { %v1173_v41 = vpop.f32.mrf.mxu0  ;;  %v1254_v48 = vadd.f32 %v1253_v40, %v1252_v36 }
 0x128   :  { %v799_v43 = vmax.f32 %v757_v38, 0.0  ;;  %v641_v44 = vadd.f32 %v1172_v39, %v1619_v14  ;;  %v1255_v45 = vpop.f32.mrf.mxu1 }
 0x129   :  { %v1174_v46 = vpop.f32.mrf.mxu0 }
 0x12a   :  { %v1079_v47 = vpack.c.bf16 %v799_v43, %v798_v42  ;;  %v1175_v49 = vadd.f32 %v1174_v46, %v1173_v41  ;;  %v1256_v50 = vpop.f32.mrf.mxu1  ;;  %v762_v52 = vadd.f32 %v1254_v48, %v641_v44 }
 0x12b   :  { %v1176_v51 = vpop.f32.mrf.mxu0  ;;  %v1257_v54 = vadd.f32 %v1256_v50, %v1255_v45 }
 0x12c   :  { %1102 = vst [vmem:[%s1679_s3 + $0x38] sm:$0xff] %v1079_v47   ;;  %v644_v53 = vadd.f32 %v1175_v49, %v1619_v14  ;;  %v1258_v55 = vpop.f32.mrf.mxu1  ;;  %v800_v61 = vmax.f32 %v762_v52, 0.0 }
 0x12d   :  { %v1177_v56 = vpop.f32.mrf.mxu0 }
 0x12e   :  { %v765_v57 = vadd.f32 %v1257_v54, %v644_v53  ;;  %v1178_v58 = vadd.f32 %v1177_v56, %v1176_v51  ;;  %v1259_v59 = vpop.f32.mrf.mxu1 }
 0x12f   :  { %v1179_v60 = vpop.f32.mrf.mxu0  ;;  %v1260_v3 = vadd.f32 %v1259_v59, %v1258_v55 }
 0x130   :  { %v801_v62 = vmax.f32 %v765_v57, 0.0  ;;  %v649_v63 = vadd.f32 %v1178_v58, %v1619_v14  ;;  %v1261_v0 = vpop.f32.mrf.mxu1 }
 0x131   :  { %v1180_v1 = vpop.f32.mrf.mxu0 }
 0x132   :  { %v1084_v2 = vpack.c.bf16 %v801_v62, %v800_v61  ;;  %v1181_v4 = vadd.f32 %v1180_v1, %v1179_v60  ;;  %v1262_v5 = vpop.f32.mrf.mxu1  ;;  %v770_v7 = vadd.f32 %v1260_v3, %v649_v63 }
 0x133   :  { %v1182_v6 = vpop.f32.mrf.mxu0  ;;  %v1263_v9 = vadd.f32 %v1262_v5, %v1261_v0 }
 0x134   :  { %1103 = vst [vmem:[%s1679_s3 + $0x40] sm:$0xff] %v1084_v2   ;;  %v652_v8 = vadd.f32 %v1181_v4, %v1619_v14  ;;  %v1264_v10 = vpop.f32.mrf.mxu1  ;;  %v802_v17 = vmax.f32 %v770_v7, 0.0 }
 0x135   :  { %v1183_v11 = vpop.f32.mrf.mxu0 }
 0x136   :  { %v773_v12 = vadd.f32 %v1263_v9, %v652_v8  ;;  %v1184_v13 = vadd.f32 %v1183_v11, %v1182_v6  ;;  %v1265_v15 = vpop.f32.mrf.mxu1 }
 0x137   :  { %v1185_v16 = vpop.f32.mrf.mxu0  ;;  %v1266_v23 = vadd.f32 %v1265_v15, %v1264_v10 }
 0x138   :  { %v803_v18 = vmax.f32 %v773_v12, 0.0  ;;  %v657_v19 = vadd.f32 %v1184_v13, %v1619_v14  ;;  %v1267_v20 = vpop.f32.mrf.mxu1 }
 0x139   :  { %v1186_v21 = vpop.f32.mrf.mxu0 }
 0x13a   :  { %v1089_v22 = vpack.c.bf16 %v803_v18, %v802_v17  ;;  %v1187_v24 = vadd.f32 %v1186_v21, %v1185_v16  ;;  %v1268_v25 = vpop.f32.mrf.mxu1  ;;  %v778_v26 = vadd.f32 %v1266_v23, %v657_v19 }
 0x13b   :  { %v1269_v28 = vadd.f32 %v1268_v25, %v1267_v20 }
 0x13c   :  { %1104 = vst [vmem:[%s1679_s3 + $0x48] sm:$0xff] %v1089_v22   ;;  %v660_v27 = vadd.f32 %v1187_v24, %v1619_v14  ;;  %v804_v30 = vmax.f32 %v778_v26, 0.0 }
 0x13e   :  { %v781_v29 = vadd.f32 %v1269_v28, %v660_v27 }
 0x140   :  { %v805_v31 = vmax.f32 %v781_v29, 0.0 }
 0x142   :  { %v1094_v32 = vpack.c.bf16 %v805_v31, %v804_v30 }
 0x144   :  { %1105 = vst [vmem:[%s1679_s3 + $0x50] sm:$0xff] %v1094_v32  }

// kernel: cnn_base_forward.6
= control target key start
LH: loop header
LB: loop body
LE: loop exit
PB: predicated region body
PF: predicated region fallthrough
CT: control target
= control target key end

     0   :  { %v1348_v24 = vmov 0.0   ;;  %vm1349_vm0 = vmmov 0   ;;  %s1705_s1 = inlined_call_operand.vmem [shape: bf16[640,128], index: 1, kind: input, shape index: {}]   ;;  %s1706_s0 = inlined_call_operand.vmem [shape: bf16[112,640], index: 0, kind: input, shape index: {}]   ;;  %s1707_s2 = inlined_call_operand.vmem [shape: f32[1,128], index: 2, kind: input, shape index: {}]   ;;  %s1708_s3 = inlined_call_operand.vmem [shape: bf16[112,128], index: 3, kind: output, shape index: {}]  }
   0x1   :  { %v1259_v0 = vld [vmem:[%s1705_s1 + $0x78] sm:$0xff]   ;;  %v1261_v2 = vld [vmem:[%s1705_s1 + $0x70] sm:$0xff]   ;;  %v1263_v4 = vld [vmem:[%s1705_s1 + $0x68] sm:$0xff]  }
   0x2   :  { %v1260_v1 = vld [vmem:[%s1705_s1 + $0x38] sm:$0xff]   ;;  %1066 = vmatprep.subr.bf16.mxu0 %v1259_v0  ;;  %1241 = vmatprep.subr.bf16.mxu1 %v1259_v0  ;;  %v1262_v3 = vld [vmem:[%s1705_s1 + $0x30] sm:$0xff]   ;;  %v1264_v5 = vld [vmem:[%s1705_s1 + $0x28] sm:$0xff]  }
   0x3   :  { %1067 = vmatpush3.bf16.msra.mxu0 %v1260_v1  ;;  %1249 = vmatpush3.bf16.msra.mxu1 %v1260_v1  ;;  %v1265_v6 = vld [vmem:[%s1705_s1 + $0x60] sm:$0xff]   ;;  %v1267_v8 = vld [vmem:[%s1705_s1 + $0x58] sm:$0xff]   ;;  %v1269_v10 = vld [vmem:[%s1705_s1 + $0x50] sm:$0xff]  }
   0x4   :  { %1068 = vmatprep.subr.bf16.mxu0 %v1261_v2  ;;  %1242 = vmatprep.subr.bf16.mxu1 %v1261_v2  ;;  %v1266_v7 = vld [vmem:[%s1705_s1 + $0x20] sm:$0xff]   ;;  %v1268_v9 = vld [vmem:[%s1705_s1 + $0x18] sm:$0xff]   ;;  %v1270_v13 = vld [vmem:[%s1705_s1 + $0x10] sm:$0xff]  }
   0x5   :  { %v1277_v11 = vld [vmem:[%s1706_s0 + $0x4] ss:$20 sps:$4 sm:$0xff]   ;;  %v1271_v14 = vld [vmem:[%s1705_s1 + $0x48] sm:$0xff]   ;;  %v1275_v18 = vld [vmem:[%s1706_s0] ss:$20 sps:$4 sm:$0xff]  }
   0x6   :  { %v1280_v12 = vld [vmem:[%s1706_s0 + $0xa4] ss:$20 sps:$4 sm:$0xff]   ;;  %598 = vmatprep.mubr.bf16.mxu0 %v1277_v11  ;;  %v1272_v15 = vld [vmem:[%s1705_s1 + $0x8] sm:$0xff]   ;;  %v1278_v19 = vld [vmem:[%s1706_s0 + $0xa0] ss:$20 sps:$4 sm:$0xff]  }
   0x7   :  { %1069 = vmatpush3.bf16.msra.mxu0 %v1262_v3  ;;  %1250 = vmatpush3.bf16.msra.mxu1 %v1262_v3  ;;  %v1273_v16 = vld [vmem:[%s1705_s1 + $0x40] sm:$0xff]   ;;  %v1281_v20 = vld [vmem:[%s1705_s1 + $0xf8] sm:$0xff]   ;;  %v1284_v23 = vld [vmem:[%s1705_s1 + $0xf0] sm:$0xff]  }
   0x8   :  { %1070 = vmatprep.subr.bf16.mxu0 %v1263_v4  ;;  %1243 = vmatprep.subr.bf16.mxu1 %v1263_v4  ;;  %v1274_v17 = vld [vmem:[%s1705_s1] sm:$0xff]   ;;  %v1282_v21 = vld [vmem:[%s1705_s1 + $0xb8] sm:$0xff]   ;;  %v1285_v27 = vld [vmem:[%s1705_s1 + $0xb0] sm:$0xff]  }
   0x9   :  { %630 = vmatprep.mubr.bf16.mxu1 %v1280_v12  ;;  %v1283_v22 = vld [vmem:[%s1705_s1 + $0x138] sm:$0xff]   ;;  %v1287_v25 = vld [vmem:[%s1706_s0 + $0x2c] ss:$20 sps:$4 sm:$0xff]   ;;  %v1286_v28 = vld [vmem:[%s1705_s1 + $0x130] sm:$0xff]  }
   0xa   :  { %v1291_v26 = vld [vmem:[%s1706_s0 + $0xcc] ss:$20 sps:$4 sm:$0xff]   ;;  %v1289_v29 = vld [vmem:[%s1706_s0 + $0x28] ss:$20 sps:$4 sm:$0xff]   ;;  %v1301_v39 = vld [vmem:[%s1706_s0 + $0x50] ss:$20 sps:$4 sm:$0xff]  }
   0xb   :  { %1071 = vmatpush3.bf16.msra.mxu0 %v1264_v5  ;;  %1251 = vmatpush3.bf16.msra.mxu1 %v1264_v5  ;;  %v1290_v30 = vld [vmem:[%s1705_s1 + $0xe8] sm:$0xff]   ;;  %v1296_v34 = vld [vmem:[%s1705_s1 + $0xe0] sm:$0xff]   ;;  %v1302_v40 = vld [vmem:[%s1705_s1 + $0xd8] sm:$0xff]  }
   0xc   :  { %1072 = vmatprep.subr.bf16.mxu0 %v1265_v6  ;;  %1244 = vmatprep.subr.bf16.mxu1 %v1265_v6  ;;  %v1293_v31 = vld [vmem:[%s1705_s1 + $0xa8] sm:$0xff]   ;;  %v1297_v37 = vld [vmem:[%s1705_s1 + $0xa0] sm:$0xff]   ;;  %v1305_v41 = vld [vmem:[%s1705_s1 + $0x98] sm:$0xff]  }
   0xd   :  { %v1294_v32 = vld [vmem:[%s1705_s1 + $0x128] sm:$0xff]   ;;  %v1298_v38 = vld [vmem:[%s1705_s1 + $0x120] sm:$0xff]   ;;  %v1306_v43 = vld [vmem:[%s1705_s1 + $0x118] sm:$0xff]  }
   0xe   :  { %v1295_v33 = vld [vmem:[%s1706_s0 + $0xc8] ss:$20 sps:$4 sm:$0xff]   ;;  %v1307_v42 = vld [vmem:[%s1706_s0 + $0xf0] ss:$20 sps:$4 sm:$0xff]   ;;  %v1322_v47 = vld [vmem:[%s1706_s0 + $0xc] ss:$20 sps:$4 sm:$0xff]  }
   0xf   :  { %1073 = vmatpush3.bf16.msra.mxu0 %v1266_v7  ;;  %1252 = vmatpush3.bf16.msra.mxu1 %v1266_v7  ;;  %v1299_v35 = vld [vmem:[%s1706_s0 + $0x54] ss:$20 sps:$4 sm:$0xff]   ;;  %v1311_v45 = vld [vmem:[%s1706_s0 + $0x7c] ss:$20 sps:$4 sm:$0xff]   ;;  %v1313_v50 = vld [vmem:[%s1706_s0 + $0x78] ss:$20 sps:$4 sm:$0xff]  }
  0x10   :  { %1074 = vmatprep.subr.bf16.mxu0 %v1267_v8  ;;  %1245 = vmatprep.subr.bf16.mxu1 %v1267_v8  ;;  %v1303_v36 = vld [vmem:[%s1706_s0 + $0xf4] ss:$20 sps:$4 sm:$0xff]   ;;  %v1317_v53 = vld [vmem:[%s1705_s1 + $0xc0] sm:$0xff]   ;;  %v1327_v60 = vld [vmem:[%s1706_s0 + $0x38] ss:$20 sps:$4 sm:$0xff]  }
  0x11   :  { %v1308_v44 = vld [vmem:[%s1705_s1 + $0xd0] sm:$0xff]   ;;  %v1314_v49 = vld [vmem:[%s1705_s1 + $0xc8] sm:$0xff]   ;;  %v1318_v54 = vld [vmem:[%s1705_s1 + $0x80] sm:$0xff]  }
  0x12   :  { %v1309_v46 = vld [vmem:[%s1705_s1 + $0x90] sm:$0xff]   ;;  %v1315_v51 = vld [vmem:[%s1705_s1 + $0x88] sm:$0xff]   ;;  %v1319_v55 = vld [vmem:[%s1705_s1 + $0x100] sm:$0xff]  }
  0x13   :  { %1075 = vmatpush3.bf16.msra.mxu0 %v1268_v9  ;;  %1253 = vmatpush3.bf16.msra.mxu1 %v1268_v9  ;;  %v1310_v48 = vld [vmem:[%s1705_s1 + $0x110] sm:$0xff]   ;;  %v1316_v52 = vld [vmem:[%s1705_s1 + $0x108] sm:$0xff]   ;;  %v1332_v0 = vld [vmem:[%s1706_s0 + $0x84] ss:$20 sps:$4 sm:$0xff]  }
  0x14   :  { %1076 = vmatprep.subr.bf16.mxu0 %v1269_v10  ;;  %1246 = vmatprep.subr.bf16.mxu1 %v1269_v10  ;;  %v1320_v56 = vld [vmem:[%s1706_s0 + $0x8] ss:$20 sps:$4 sm:$0xff]   ;;  %v1323_v57 = vld [vmem:[%s1706_s0 + $0x10] ss:$20 sps:$4 sm:$0xff]   ;;  %v1330_v62 = vld [vmem:[%s1706_s0 + $0x58] ss:$20 sps:$4 sm:$0xff]  }
  0x15   :  { %v1324_v58 = vld [vmem:[%s1706_s0 + $0x34] ss:$20 sps:$4 sm:$0xff]   ;;  %v1326_v59 = vld [vmem:[%s1706_s0 + $0x30] ss:$20 sps:$4 sm:$0xff]   ;;  %v1336_v3 = vld [vmem:[%s1706_s0 + $0xac] ss:$20 sps:$4 sm:$0xff]  }
  0x16   :  { %v1328_v61 = vld [vmem:[%s1706_s0 + $0x5c] ss:$20 sps:$4 sm:$0xff]   ;;  %v1331_v63 = vld [vmem:[%s1706_s0 + $0x60] ss:$20 sps:$4 sm:$0xff]   ;;  %v1343_v8 = vld [vmem:[%s1706_s0 + $0xd8] ss:$20 sps:$4 sm:$0xff]  }
  0x17   :  { %1077 = vmatpush3.bf16.msra.mxu0 %v1270_v13  ;;  %1254 = vmatpush3.bf16.msra.mxu1 %v1270_v13  ;;  %v1334_v1 = vld [vmem:[%s1706_s0 + $0x80] ss:$20 sps:$4 sm:$0xff]   ;;  %v1335_v2 = vld [vmem:[%s1706_s0 + $0x88] ss:$20 sps:$4 sm:$0xff]   ;;  %v1339_v5 = vld [vmem:[%s1706_s0 + $0xb0] ss:$20 sps:$4 sm:$0xff]  }
  0x18   :  { %1078 = vmatprep.subr.bf16.mxu0 %v1271_v14  ;;  %1247 = vmatprep.subr.bf16.mxu1 %v1271_v14  ;;  %v1338_v4 = vld [vmem:[%s1706_s0 + $0xa8] ss:$20 sps:$4 sm:$0xff]   ;;  %v1342_v7 = vld [vmem:[%s1706_s0 + $0xd0] ss:$20 sps:$4 sm:$0xff]   ;;  %v1346_v10 = vld [vmem:[%s1706_s0 + $0xf8] ss:$20 sps:$4 sm:$0xff]  }
  0x19   :  { %v1340_v6 = vld [vmem:[%s1706_s0 + $0xd4] ss:$20 sps:$4 sm:$0xff]   ;;  %v1344_v9 = vld [vmem:[%s1706_s0 + $0xfc] ss:$20 sps:$4 sm:$0xff]  }
  0x1a   :  { %v1347_v11 = vld [vmem:[%s1706_s0 + $0x100] ss:$20 sps:$4 sm:$0xff]  }
  0x1b   :  { %1079 = vmatpush3.bf16.msra.mxu0 %v1272_v15  ;;  %1255 = vmatpush3.bf16.msra.mxu1 %v1272_v15 }
  0x1c   :  { %1080 = vmatprep.subr.bf16.mxu0 %v1273_v16  ;;  %1248 = vmatprep.subr.bf16.mxu1 %v1273_v16 }
  0x1f   :  { %1081 = vmatpush3.bf16.msra.mxu0 %v1274_v17  ;;  %1256 = vmatpush3.bf16.msra.mxu1 %v1274_v17 }
  0x20   :  { %1124 = vmatprep.subr.bf16.mxu1 %v1281_v20  ;;  %1197 = vmatprep.subr.bf16.mxu0 %v1348_v24 }
  0x22   :  { %599 = vmatmul.mubr.bf16.vlgmr.msra.gmra.mxu0 %v1275_v18  ;;  %631 = vmatmul.mubr.bf16.vlgmr.msra.gmra.mxu1 %v1278_v19 }
  0x23   :  { %1125 = vmatpush3.bf16.msra.mxu1 %v1282_v21  ;;  %1198 = vmatpush3.bf16.msra.mxu0 %v1283_v22 }
  0x24   :  { %1126 = vmatprep.subr.bf16.mxu1 %v1284_v23  ;;  %1199 = vmatprep.subr.bf16.mxu0 %v1348_v24 }
  0x25   :  { %606 = vmatprep.mubr.bf16.mxu0 %v1287_v25  ;;  %638 = vmatprep.mubr.bf16.mxu1 %v1291_v26 }
  0x27   :  { %1127 = vmatpush3.bf16.msra.mxu1 %v1285_v27  ;;  %1200 = vmatpush3.bf16.msra.mxu0 %v1286_v28 }
  0x28   :  { %1128 = vmatprep.subr.bf16.mxu1 %v1290_v30  ;;  %1201 = vmatprep.subr.bf16.mxu0 %v1348_v24 }
  0x2a   :  { %607 = vmatmul.mubr.bf16.gmra.mxu0 %v1289_v29  ;;  %639 = vmatmul.mubr.bf16.gmra.mxu1 %v1295_v33 }
  0x2b   :  { %1129 = vmatpush3.bf16.msra.mxu1 %v1293_v31  ;;  %1202 = vmatpush3.bf16.msra.mxu0 %v1294_v32 }
  0x2c   :  { %1130 = vmatprep.subr.bf16.mxu1 %v1296_v34  ;;  %1203 = vmatprep.subr.bf16.mxu0 %v1348_v24 }
  0x2d   :  { %614 = vmatprep.mubr.bf16.mxu0 %v1299_v35  ;;  %646 = vmatprep.mubr.bf16.mxu1 %v1303_v36 }
  0x2f   :  { %1131 = vmatpush3.bf16.msra.mxu1 %v1297_v37  ;;  %1204 = vmatpush3.bf16.msra.mxu0 %v1298_v38 }
  0x30   :  { %1132 = vmatprep.subr.bf16.mxu1 %v1302_v40  ;;  %1205 = vmatprep.subr.bf16.mxu0 %v1348_v24 }
  0x32   :  { %615 = vmatmul.mubr.bf16.gmra.mxu0 %v1301_v39  ;;  %647 = vmatmul.mubr.bf16.gmra.mxu1 %v1307_v42 }
  0x33   :  { %1133 = vmatpush3.bf16.msra.mxu1 %v1305_v41  ;;  %1206 = vmatpush3.bf16.msra.mxu0 %v1306_v43  ;;  %v1652_v43 = vld [vmem:[%s1707_s2] ss:$0 sm:$0xff] }
  0x34   :  { %1134 = vmatprep.subr.bf16.mxu1 %v1308_v44  ;;  %1207 = vmatprep.subr.bf16.mxu0 %v1348_v24 }
  0x35   :  { %622 = vmatprep.mubr.bf16.mxu0 %v1311_v45  ;;  %687 = vmatprep.mubr.bf16.mxu1 %v1322_v47 }
  0x37   :  { %1135 = vmatpush3.bf16.msra.mxu1 %v1309_v46  ;;  %1208 = vmatpush3.bf16.msra.mxu0 %v1310_v48 }
  0x38   :  { %1136 = vmatprep.subr.bf16.mxu1 %v1314_v49  ;;  %1209 = vmatprep.subr.bf16.mxu0 %v1348_v24 }
  0x3a   :  { %623 = vmatmul.mubr.bf16.gmra.mxu0 %v1313_v50 }
  0x3b   :  { %1137 = vmatpush3.bf16.msra.mxu1 %v1315_v51  ;;  %1210 = vmatpush3.bf16.msra.mxu0 %v1316_v52 }
  0x3c   :  { %1138 = vmatprep.subr.bf16.mxu1 %v1317_v53  ;;  %1211 = vmatprep.subr.bf16.mxu0 %v1348_v24 }
  0x3d   :  { %1213 = vmatprep.mubr.msk.bf16.mxu0 %vm1349_vm0, %v1348_v24 }
  0x3f   :  { %1139 = vmatpush3.bf16.msra.mxu1 %v1318_v54  ;;  %1212 = vmatpush3.bf16.msra.mxu0 %v1319_v55 }
  0x42   :  { %688 = vmatmul.mubr.bf16.vlgmr.msra.gmra.mxu1 %v1320_v56  ;;  %1214 = vmatmul.mubr.bf16.vlgmr.msra.gmra.mxu0 %v1323_v57 }
  0x43   :  { %695 = vmatprep.mubr.bf16.mxu1 %v1324_v58  ;;  %1217 = vmatprep.mubr.msk.bf16.mxu0 %vm1349_vm0, %v1348_v24 }
  0x4a   :  { %696 = vmatmul.mubr.bf16.gmra.mxu1 %v1326_v59  ;;  %1218 = vmatmul.mubr.bf16.gmra.mxu0 %v1327_v60 }
  0x4b   :  { %703 = vmatprep.mubr.bf16.mxu1 %v1328_v61  ;;  %1221 = vmatprep.mubr.msk.bf16.mxu0 %vm1349_vm0, %v1348_v24 }
  0x52   :  { %704 = vmatmul.mubr.bf16.gmra.mxu1 %v1330_v62  ;;  %1222 = vmatmul.mubr.bf16.gmra.mxu0 %v1331_v63 }
  0x53   :  { %711 = vmatprep.mubr.bf16.mxu1 %v1332_v0  ;;  %1225 = vmatprep.mubr.msk.bf16.mxu0 %vm1349_vm0, %v1348_v24 }
  0x5a   :  { %712 = vmatmul.mubr.bf16.gmra.mxu1 %v1334_v1  ;;  %1226 = vmatmul.mubr.bf16.gmra.mxu0 %v1335_v2 }
  0x5b   :  { %719 = vmatprep.mubr.bf16.mxu1 %v1336_v3  ;;  %1229 = vmatprep.mubr.msk.bf16.mxu0 %vm1349_vm0, %v1348_v24 }
  0x62   :  { %720 = vmatmul.mubr.bf16.gmra.mxu1 %v1338_v4  ;;  %1230 = vmatmul.mubr.bf16.gmra.mxu0 %v1339_v5 }
  0x63   :  { %727 = vmatprep.mubr.bf16.mxu1 %v1340_v6  ;;  %1233 = vmatprep.mubr.msk.bf16.mxu0 %vm1349_vm0, %v1348_v24 }
  0x6a   :  { %728 = vmatmul.mubr.bf16.gmra.mxu1 %v1342_v7  ;;  %1234 = vmatmul.mubr.bf16.gmra.mxu0 %v1343_v8 }
  0x6b   :  { %735 = vmatprep.mubr.bf16.mxu1 %v1344_v9  ;;  %1237 = vmatprep.mubr.msk.bf16.mxu0 %vm1349_vm0, %v1348_v24 }
  0x72   :  { %736 = vmatmul.mubr.bf16.gmra.mxu1 %v1346_v10  ;;  %1238 = vmatmul.mubr.bf16.gmra.mxu0 %v1347_v11 }
  0xe2   :  { %v1082_v12 = vpop.f32.mrf.mxu0  ;;  %v1617_v13 = vpop.f32.mrf.mxu1 }
  0xe4   :  { %v1083_v14 = vpop.f32.mrf.mxu0  ;;  %v1619_v15 = vpop.f32.mrf.mxu1 }
  0xe5   :  { %v1084_v40 = vadd.f32 %v1083_v14, %v1082_v12 }
  0xe6   :  { %v1085_v16 = vpop.f32.mrf.mxu0  ;;  %v1621_v17 = vpop.f32.mrf.mxu1 }
  0xe7   :  { %v601_v46 = vadd.f32 %v1084_v40, %v1652_v43 }
  0xe8   :  { %v1086_v18 = vpop.f32.mrf.mxu0  ;;  %v1623_v19 = vpop.f32.mrf.mxu1 }
  0xe9   :  { %v1087_v47 = vadd.f32 %v1086_v18, %v1085_v16 }
  0xea   :  { %v1088_v20 = vpop.f32.mrf.mxu0  ;;  %v1625_v21 = vpop.f32.mrf.mxu1 }
  0xeb   :  { %v604_v54 = vadd.f32 %v1087_v47, %v1652_v43 }
  0xec   :  { %v1089_v22 = vpop.f32.mrf.mxu0  ;;  %v1627_v23 = vpop.f32.mrf.mxu1 }
  0xed   :  { %v1090_v55 = vadd.f32 %v1089_v22, %v1088_v20 }
  0xee   :  { %v1091_v24 = vpop.f32.mrf.mxu0  ;;  %v1629_v25 = vpop.f32.mrf.mxu1 }
  0xef   :  { %v609_v63 = vadd.f32 %v1090_v55, %v1652_v43 }
  0xf0   :  { %v1092_v26 = vpop.f32.mrf.mxu0  ;;  %v1631_v27 = vpop.f32.mrf.mxu1 }
  0xf1   :  { %v1093_v0 = vadd.f32 %v1092_v26, %v1091_v24 }
  0xf2   :  { %v1094_v28 = vpop.f32.mrf.mxu0  ;;  %v1633_v30 = vpop.f32.mrf.mxu1 }
  0xf3   :  { %v612_v10 = vadd.f32 %v1093_v0, %v1652_v43 }
  0xf4   :  { %v1095_v29 = vpop.f32.mrf.mxu0  ;;  %v1635_v32 = vpop.f32.mrf.mxu1 }
  0xf5   :  { %v1096_v11 = vadd.f32 %v1095_v29, %v1094_v28 }
  0xf6   :  { %v1097_v31 = vpop.f32.mrf.mxu0  ;;  %v1639_v35 = vpop.f32.mrf.mxu1 }
  0xf7   :  { %v617_v40 = vadd.f32 %v1096_v11, %v1652_v43 }
  0xf8   :  { %v1098_v33 = vpop.f32.mrf.mxu0  ;;  %v1645_v38 = vpop.f32.mrf.mxu1 }
  0xfa   :  { %v1637_v34 = vpop.f32.mrf.mxu0 }
  0xfc   :  { %v1641_v36 = vpop.f32.mrf.mxu0 }
  0xfe   :  { %v1643_v37 = vpop.f32.mrf.mxu0 }
 0x100   :  { %v1647_v39 = vpop.f32.mrf.mxu0 }
 0x102   :  { %v1140_v41 = vpop.f32.mrf.mxu1  ;;  %v778_v42 = vpop.f32.mrf.mxu0 }
 0x104   :  { %v1141_v44 = vpop.f32.mrf.mxu1  ;;  %v1215_v45 = vpop.f32.mrf.mxu0 }
 0x105   :  { %v1142_v48 = vadd.f32 %v1141_v44, %v1140_v41  ;;  %v1099_v41 = vadd.f32 %v1098_v33, %v1097_v31 }
 0x106   :  { %v1143_v49 = vpop.f32.mrf.mxu1  ;;  %v781_v50 = vpop.f32.mrf.mxu0 }
 0x107   :  { %v690_v51 = vadd.f32 %v1142_v48, %v601_v46 }
 0x108   :  { %v1144_v52 = vpop.f32.mrf.mxu1  ;;  %v1216_v53 = vpop.f32.mrf.mxu0 }
 0x109   :  { %v1145_v56 = vadd.f32 %v1144_v52, %v1143_v49  ;;  %v779_v59 = vadd.f32 %v778_v42, %v690_v51  ;;  %v1102_v51 = vadd.f32 %v1641_v36, %v1637_v34 }
 0x10a   :  { %v1146_v57 = vpop.f32.mrf.mxu1  ;;  %v786_v58 = vpop.f32.mrf.mxu0 }
 0x10b   :  { %v693_v60 = vadd.f32 %v1145_v56, %v604_v54  ;;  %v833_v5 = vmax.f32 %v779_v59, 0.0  ;;  %v1105_v59 = vadd.f32 %v1647_v39, %v1643_v37 }
 0x10c   :  { %v1147_v61 = vpop.f32.mrf.mxu1  ;;  %v1219_v62 = vpop.f32.mrf.mxu0 }
 0x10d   :  { %v782_v1 = vadd.f32 %v781_v50, %v693_v60  ;;  %v1148_v2 = vadd.f32 %v1147_v61, %v1146_v57  ;;  %v620_v50 = vadd.f32 %v1099_v41, %v1652_v43  ;;  %v1114_v41 = vadd.f32 %v1627_v23, %v1625_v21 }
 0x10e   :  { %v1149_v3 = vpop.f32.mrf.mxu1  ;;  %v789_v4 = vpop.f32.mrf.mxu0 }
 0x10f   :  { %v834_v6 = vmax.f32 %v782_v1, 0.0  ;;  %v698_v7 = vadd.f32 %v1148_v2, %v609_v63 }
 0x110   :  { %v1150_v8 = vpop.f32.mrf.mxu1  ;;  %v1220_v9 = vpop.f32.mrf.mxu0 }
 0x111   :  { %v1028_v12 = vpack.c.bf16 %v834_v6, %v833_v5  ;;  %v1151_v14 = vadd.f32 %v1150_v8, %v1149_v3  ;;  %v787_v20 = vadd.f32 %v786_v58, %v698_v7  ;;  %v625_v58 = vadd.f32 %v1102_v51, %v1652_v43 }
 0x112   :  { %v1152_v16 = vpop.f32.mrf.mxu1  ;;  %v794_v18 = vpop.f32.mrf.mxu0  ;;  %v1108_v3 = vadd.f32 %v1619_v15, %v1617_v13 }
 0x113   :  { %1029 = vst [vmem:[%s1708_s3] sm:$0xff] %v1028_v12   ;;  %v701_v22 = vadd.f32 %v1151_v14, %v612_v10  ;;  %v835_v28 = vmax.f32 %v787_v20, 0.0  ;;  %v1111_v12 = vadd.f32 %v1623_v19, %v1621_v17 }
 0x114   :  { %v1153_v24 = vpop.f32.mrf.mxu1  ;;  %v1223_v26 = vpop.f32.mrf.mxu0  ;;  %v633_v11 = vadd.f32 %v1108_v3, %v1652_v43 }
 0x115   :  { %v790_v42 = vadd.f32 %v789_v4, %v701_v22  ;;  %v1154_v44 = vadd.f32 %v1153_v24, %v1152_v16  ;;  %v628_v4 = vadd.f32 %v1105_v59, %v1652_v43 }
 0x116   :  { %v1155_v45 = vpop.f32.mrf.mxu1  ;;  %v797_v46 = vpop.f32.mrf.mxu0 }
 0x117   :  { %v836_v29 = vmax.f32 %v790_v42, 0.0  ;;  %v706_v47 = vadd.f32 %v1154_v44, %v617_v40  ;;  %v636_v40 = vadd.f32 %v1111_v12, %v1652_v43 }
 0x118   :  { %v1156_v48 = vpop.f32.mrf.mxu1  ;;  %v1224_v49 = vpop.f32.mrf.mxu0 }
 0x119   :  { %v1033_v52 = vpack.c.bf16 %v836_v29, %v835_v28  ;;  %v1157_v53 = vadd.f32 %v1156_v48, %v1155_v45  ;;  %v795_v31 = vadd.f32 %v794_v18, %v706_v47  ;;  %v641_v47 = vadd.f32 %v1114_v41, %v1652_v43 }
 0x11a   :  { %v1158_v54 = vpop.f32.mrf.mxu1  ;;  %v802_v55 = vpop.f32.mrf.mxu0  ;;  %v1117_v48 = vadd.f32 %v1631_v27, %v1629_v25 }
 0x11b   :  { %1060 = vst [vmem:[%s1708_s3 + $0x8] sm:$0xff] %v1033_v52   ;;  %v709_v33 = vadd.f32 %v1157_v53, %v620_v50  ;;  %v837_v62 = vmax.f32 %v795_v31, 0.0 }
 0x11c   :  { %v1159_v56 = vpop.f32.mrf.mxu1  ;;  %v1227_v57 = vpop.f32.mrf.mxu0  ;;  %v644_v31 = vadd.f32 %v1117_v48, %v1652_v43 }
 0x11d   :  { %v798_v60 = vadd.f32 %v797_v46, %v709_v33  ;;  %v1160_v61 = vadd.f32 %v1159_v56, %v1158_v54  ;;  %v1120_v33 = vadd.f32 %v1635_v32, %v1633_v30 }
 0x11e   :  { %v1161_v34 = vpop.f32.mrf.mxu1  ;;  %v805_v36 = vpop.f32.mrf.mxu0 }
 0x11f   :  { %v838_v63 = vmax.f32 %v798_v60, 0.0  ;;  %v714_v0 = vadd.f32 %v1160_v61, %v625_v58 }
 0x120   :  { %v1162_v1 = vpop.f32.mrf.mxu1  ;;  %v1228_v2 = vpop.f32.mrf.mxu0 }
 0x121   :  { %v1038_v5 = vpack.c.bf16 %v838_v63, %v837_v62  ;;  %v1163_v6 = vadd.f32 %v1162_v1, %v1161_v34  ;;  %v803_v37 = vadd.f32 %v802_v55, %v714_v0  ;;  %v649_v34 = vadd.f32 %v1120_v33, %v1652_v43 }
 0x122   :  { %v1164_v7 = vpop.f32.mrf.mxu1  ;;  %v810_v8 = vpop.f32.mrf.mxu0 }
 0x123   :  { %1061 = vst [vmem:[%s1708_s3 + $0x10] sm:$0xff] %v1038_v5   ;;  %v717_v39 = vadd.f32 %v1163_v6, %v628_v4  ;;  %v839_v18 = vmax.f32 %v803_v37, 0.0 }
 0x124   :  { %v1165_v9 = vpop.f32.mrf.mxu1  ;;  %v1231_v10 = vpop.f32.mrf.mxu0 }
 0x125   :  { %v806_v13 = vadd.f32 %v805_v36, %v717_v39  ;;  %v1166_v15 = vadd.f32 %v1165_v9, %v1164_v7  ;;  %v1123_v36 = vadd.f32 %v1645_v38, %v1639_v35 }
 0x126   :  { %v1167_v14 = vpop.f32.mrf.mxu1  ;;  %v813_v16 = vpop.f32.mrf.mxu0 }
 0x127   :  { %v840_v20 = vmax.f32 %v806_v13, 0.0  ;;  %v722_v22 = vadd.f32 %v1166_v15, %v633_v11  ;;  %v652_v5 = vadd.f32 %v1123_v36, %v1652_v43 }
 0x128   :  { %v1168_v24 = vpop.f32.mrf.mxu1  ;;  %v1232_v26 = vpop.f32.mrf.mxu0 }
 0x129   :  { %v1043_v42 = vpack.c.bf16 %v840_v20, %v839_v18  ;;  %v1169_v44 = vadd.f32 %v1168_v24, %v1167_v14  ;;  %v811_v17 = vadd.f32 %v810_v8, %v722_v22 }
 0x12a   :  { %v1170_v45 = vpop.f32.mrf.mxu1  ;;  %v818_v46 = vpop.f32.mrf.mxu0 }
 0x12b   :  { %1062 = vst [vmem:[%s1708_s3 + $0x18] sm:$0xff] %v1043_v42   ;;  %v725_v19 = vadd.f32 %v1169_v44, %v636_v40  ;;  %v841_v51 = vmax.f32 %v811_v17, 0.0 }
 0x12c   :  { %v1171_v28 = vpop.f32.mrf.mxu1  ;;  %v1235_v29 = vpop.f32.mrf.mxu0 }
 0x12d   :  { %v814_v49 = vadd.f32 %v813_v16, %v725_v19  ;;  %v1172_v50 = vadd.f32 %v1171_v28, %v1170_v45 }
 0x12e   :  { %v1173_v21 = vpop.f32.mrf.mxu1  ;;  %v821_v23 = vpop.f32.mrf.mxu0 }
 0x12f   :  { %v842_v52 = vmax.f32 %v814_v49, 0.0  ;;  %v730_v53 = vadd.f32 %v1172_v50, %v641_v47 }
 0x130   :  { %v1174_v54 = vpop.f32.mrf.mxu1  ;;  %v1236_v55 = vpop.f32.mrf.mxu0 }
 0x131   :  { %v1048_v56 = vpack.c.bf16 %v842_v52, %v841_v51  ;;  %v1175_v57 = vadd.f32 %v1174_v54, %v1173_v21  ;;  %v819_v25 = vadd.f32 %v818_v46, %v730_v53 }
 0x132   :  { %v1176_v58 = vpop.f32.mrf.mxu1  ;;  %v826_v59 = vpop.f32.mrf.mxu0 }
 0x133   :  { %1063 = vst [vmem:[%s1708_s3 + $0x20] sm:$0xff] %v1048_v56   ;;  %v733_v27 = vadd.f32 %v1175_v57, %v644_v31  ;;  %v843_v0 = vmax.f32 %v819_v25, 0.0 }
 0x134   :  { %v1177_v60 = vpop.f32.mrf.mxu1  ;;  %v1239_v61 = vpop.f32.mrf.mxu0 }
 0x135   :  { %v822_v62 = vadd.f32 %v821_v23, %v733_v27  ;;  %v1178_v63 = vadd.f32 %v1177_v60, %v1176_v58 }
 0x136   :  { %v1179_v30 = vpop.f32.mrf.mxu1  ;;  %v829_v32 = vpop.f32.mrf.mxu0 }
 0x137   :  { %v844_v1 = vmax.f32 %v822_v62, 0.0  ;;  %v738_v2 = vadd.f32 %v1178_v63, %v649_v34 }
 0x138   :  { %v1180_v3 = vpop.f32.mrf.mxu1  ;;  %v1240_v4 = vpop.f32.mrf.mxu0 }
 0x139   :  { %v1053_v6 = vpack.c.bf16 %v844_v1, %v843_v0  ;;  %v1181_v7 = vadd.f32 %v1180_v3, %v1179_v30  ;;  %v827_v8 = vadd.f32 %v826_v59, %v738_v2 }
 0x13b   :  { %1064 = vst [vmem:[%s1708_s3 + $0x28] sm:$0xff] %v1053_v6   ;;  %v741_v37 = vadd.f32 %v1181_v7, %v652_v5  ;;  %v845_v38 = vmax.f32 %v827_v8, 0.0 }
 0x13d   :  { %v830_v35 = vadd.f32 %v829_v32, %v741_v37 }
 0x13f   :  { %v846_v39 = vmax.f32 %v830_v35, 0.0 }
 0x141   :  { %v1058_v9 = vpack.c.bf16 %v846_v39, %v845_v38 }
 0x143   :  { %1065 = vst [vmem:[%s1708_s3 + $0x30] sm:$0xff] %v1058_v9  }

// kernel: cnn_base_forward.7
= control target key start
LH: loop header
LB: loop body
LE: loop exit
PB: predicated region body
PF: predicated region fallthrough
CT: control target
= control target key end

     0   :  { %s6319_s1 = inlined_call_operand.vmem [shape: bf16[1664,512], index: 1, kind: input, shape index: {}]   ;;  %s6320_s0 = inlined_call_operand.vmem [shape: bf16[16,1664], index: 0, kind: input, shape index: {}]   ;;  %s6321_s3 = inlined_call_operand.vmem [shape: bf16[512,128], index: 3, kind: input, shape index: {}]   ;;  %s6322_s2 = inlined_call_operand.vmem [shape: f32[1,512], index: 2, kind: input, shape index: {}]   ;;  %s6323_s5 = inlined_call_operand.vmem [shape: f32[16,512], index: 5, kind: output, shape index: {0}]   ;;  %s6324_s4 = inlined_call_operand.vmem [shape: f32[1,128], index: 4, kind: input, shape index: {}]   ;;  %s6325_s6 = inlined_call_operand.vmem [shape: f32[16,128], index: 6, kind: output, shape index: {1}]  }
   0x1   :  { %v4105_v0 = vld [vmem:[%s6319_s1 + $0xe4] ss:$16 sps:$4 sm:$0xff]   ;;  %v4109_v2 = vld [vmem:[%s6319_s1 + $0xe0] ss:$16 sps:$4 sm:$0xff]  }
   0x2   :  { %v4107_v1 = vld [vmem:[%s6319_s1 + $0x2e4] ss:$16 sps:$4 sm:$0xff]   ;;  %2621 = vmatprep.subr.bf16.mxu0 %v4105_v0  ;;  %v4110_v3 = vld [vmem:[%s6319_s1 + $0x2e0] ss:$16 sps:$4 sm:$0xff]  }
   0x3   :  { %2664 = vmatprep.subr.bf16.mxu1 %v4107_v1  ;;  %v4111_v4 = vld [vmem:[%s6319_s1 + $0xc4] ss:$16 sps:$4 sm:$0xff]   ;;  %2622 = vmatpush1.bf16.msra.mxu0 %v4109_v2  ;;  %v4115_v6 = vld [vmem:[%s6319_s1 + $0xc0] ss:$16 sps:$4 sm:$0xff]  }
   0x4   :  { %2665 = vmatpush1.bf16.msra.mxu1 %v4110_v3  ;;  %v4113_v5 = vld [vmem:[%s6319_s1 + $0x2c4] ss:$16 sps:$4 sm:$0xff]   ;;  %2623 = vmatprep.subr.bf16.mxu0 %v4111_v4  ;;  %v4116_v7 = vld [vmem:[%s6319_s1 + $0x2c0] ss:$16 sps:$4 sm:$0xff]  }
   0x5   :  { %2666 = vmatprep.subr.bf16.mxu1 %v4113_v5  ;;  %v4117_v8 = vld [vmem:[%s6319_s1 + $0xa4] ss:$16 sps:$4 sm:$0xff]   ;;  %v4121_v10 = vld [vmem:[%s6319_s1 + $0xa0] ss:$16 sps:$4 sm:$0xff]   ;;  %v4204_v5 = vld [vmem:[%s6320_s0 + $0x8] ss:$52 sps:$4 sm:$0xff]  }
   0x6   :  { %v4119_v9 = vld [vmem:[%s6319_s1 + $0x2a4] ss:$16 sps:$4 sm:$0xff]   ;;  %v4122_v11 = vld [vmem:[%s6319_s1 + $0x2a0] ss:$16 sps:$4 sm:$0xff]  }
   0x7   :  { %2624 = vmatpush1.bf16.msra.mxu0 %v4115_v6  ;;  %v4123_v12 = vld [vmem:[%s6319_s1 + $0x84] ss:$16 sps:$4 sm:$0xff]   ;;  %v4127_v14 = vld [vmem:[%s6319_s1 + $0x80] ss:$16 sps:$4 sm:$0xff]  }
   0x8   :  { %2667 = vmatpush1.bf16.msra.mxu1 %v4116_v7  ;;  %2625 = vmatprep.subr.bf16.mxu0 %v4117_v8  ;;  %v4125_v13 = vld [vmem:[%s6319_s1 + $0x284] ss:$16 sps:$4 sm:$0xff]   ;;  %v4128_v15 = vld [vmem:[%s6319_s1 + $0x280] ss:$16 sps:$4 sm:$0xff]  }
   0x9   :  { %2668 = vmatprep.subr.bf16.mxu1 %v4119_v9  ;;  %v4129_v16 = vld [vmem:[%s6319_s1 + $0x64] ss:$16 sps:$4 sm:$0xff]   ;;  %v4133_v18 = vld [vmem:[%s6319_s1 + $0x60] ss:$16 sps:$4 sm:$0xff]  }
   0xa   :  { %v4131_v17 = vld [vmem:[%s6319_s1 + $0x264] ss:$16 sps:$4 sm:$0xff]   ;;  %v4134_v19 = vld [vmem:[%s6319_s1 + $0x260] ss:$16 sps:$4 sm:$0xff]  }
   0xb   :  { %2626 = vmatpush1.bf16.msra.mxu0 %v4121_v10  ;;  %v4135_v20 = vld [vmem:[%s6319_s1 + $0x44] ss:$16 sps:$4 sm:$0xff]   ;;  %v4139_v22 = vld [vmem:[%s6319_s1 + $0x40] ss:$16 sps:$4 sm:$0xff]  }
   0xc   :  { %2669 = vmatpush1.bf16.msra.mxu1 %v4122_v11  ;;  %2627 = vmatprep.subr.bf16.mxu0 %v4123_v12  ;;  %v4137_v21 = vld [vmem:[%s6319_s1 + $0x244] ss:$16 sps:$4 sm:$0xff]   ;;  %v4140_v23 = vld [vmem:[%s6319_s1 + $0x240] ss:$16 sps:$4 sm:$0xff]  }
   0xd   :  { %2670 = vmatprep.subr.bf16.mxu1 %v4125_v13  ;;  %v4141_v24 = vld [vmem:[%s6319_s1 + $0x24] ss:$16 sps:$4 sm:$0xff]   ;;  %v4145_v26 = vld [vmem:[%s6319_s1 + $0x20] ss:$16 sps:$4 sm:$0xff]  }
   0xe   :  { %v4143_v25 = vld [vmem:[%s6319_s1 + $0x224] ss:$16 sps:$4 sm:$0xff]   ;;  %v4146_v27 = vld [vmem:[%s6319_s1 + $0x220] ss:$16 sps:$4 sm:$0xff]  }
   0xf   :  { %2628 = vmatpush1.bf16.msra.mxu0 %v4127_v14  ;;  %v4147_v28 = vld [vmem:[%s6319_s1 + $0x4] ss:$16 sps:$4 sm:$0xff]   ;;  %v4151_v30 = vld [vmem:[%s6319_s1] ss:$16 sps:$4 sm:$0xff]  }
  0x10   :  { %2671 = vmatpush1.bf16.msra.mxu1 %v4128_v15  ;;  %2629 = vmatprep.subr.bf16.mxu0 %v4129_v16  ;;  %v4149_v29 = vld [vmem:[%s6319_s1 + $0x204] ss:$16 sps:$4 sm:$0xff]   ;;  %v4152_v31 = vld [vmem:[%s6319_s1 + $0x200] ss:$16 sps:$4 sm:$0xff]  }
  0x11   :  { %2672 = vmatprep.subr.bf16.mxu1 %v4131_v17  ;;  %v4153_v32 = vld [vmem:[%s6319_s1 + $0x1e4] ss:$16 sps:$4 sm:$0xff]   ;;  %v4157_v34 = vld [vmem:[%s6319_s1 + $0x1e0] ss:$16 sps:$4 sm:$0xff]  }
  0x12   :  { %v4155_v33 = vld [vmem:[%s6319_s1 + $0x3e4] ss:$16 sps:$4 sm:$0xff]   ;;  %v4158_v35 = vld [vmem:[%s6319_s1 + $0x3e0] ss:$16 sps:$4 sm:$0xff]  }
  0x13   :  { %2630 = vmatpush1.bf16.msra.mxu0 %v4133_v18  ;;  %v4159_v36 = vld [vmem:[%s6319_s1 + $0x1c4] ss:$16 sps:$4 sm:$0xff]   ;;  %v4163_v38 = vld [vmem:[%s6319_s1 + $0x1c0] ss:$16 sps:$4 sm:$0xff]  }
  0x14   :  { %2673 = vmatpush1.bf16.msra.mxu1 %v4134_v19  ;;  %2631 = vmatprep.subr.bf16.mxu0 %v4135_v20  ;;  %v4161_v37 = vld [vmem:[%s6319_s1 + $0x3c4] ss:$16 sps:$4 sm:$0xff]   ;;  %v4164_v39 = vld [vmem:[%s6319_s1 + $0x3c0] ss:$16 sps:$4 sm:$0xff]  }
  0x15   :  { %2674 = vmatprep.subr.bf16.mxu1 %v4137_v21  ;;  %v4165_v40 = vld [vmem:[%s6319_s1 + $0x1a4] ss:$16 sps:$4 sm:$0xff]   ;;  %v4169_v42 = vld [vmem:[%s6319_s1 + $0x1a0] ss:$16 sps:$4 sm:$0xff]  }
  0x16   :  { %v4167_v41 = vld [vmem:[%s6319_s1 + $0x3a4] ss:$16 sps:$4 sm:$0xff]   ;;  %v4170_v43 = vld [vmem:[%s6319_s1 + $0x3a0] ss:$16 sps:$4 sm:$0xff]  }
  0x17   :  { %2632 = vmatpush1.bf16.msra.mxu0 %v4139_v22  ;;  %v4171_v44 = vld [vmem:[%s6319_s1 + $0x184] ss:$16 sps:$4 sm:$0xff]   ;;  %v4175_v46 = vld [vmem:[%s6319_s1 + $0x180] ss:$16 sps:$4 sm:$0xff]  }
  0x18   :  { %2675 = vmatpush1.bf16.msra.mxu1 %v4140_v23  ;;  %2633 = vmatprep.subr.bf16.mxu0 %v4141_v24  ;;  %v4173_v45 = vld [vmem:[%s6319_s1 + $0x384] ss:$16 sps:$4 sm:$0xff]   ;;  %v4176_v47 = vld [vmem:[%s6319_s1 + $0x380] ss:$16 sps:$4 sm:$0xff]  }
  0x19   :  { %2676 = vmatprep.subr.bf16.mxu1 %v4143_v25  ;;  %v4177_v48 = vld [vmem:[%s6319_s1 + $0x164] ss:$16 sps:$4 sm:$0xff]   ;;  %v4206_v51 = vld [vmem:[%s6320_s0 + $0xc] ss:$52 sps:$4 sm:$0xff]  }
  0x1a   :  { %v4203_v49 = vld [vmem:[%s6320_s0 + $0x4] ss:$52 sps:$4 sm:$0xff]   ;;  %v4181_v52 = vld [vmem:[%s6319_s1 + $0x160] ss:$16 sps:$4 sm:$0xff]   ;;  %2696 = vmatprep.mubr.bf16.mxu1 %v4206_v51 }
  0x1b   :  { %2634 = vmatpush1.bf16.msra.mxu0 %v4145_v26  ;;  %v4179_v50 = vld [vmem:[%s6319_s1 + $0x364] ss:$16 sps:$4 sm:$0xff]   ;;  %2653 = vmatprep.mubr.bf16.mxu0 %v4203_v49  ;;  %v4182_v53 = vld [vmem:[%s6319_s1 + $0x360] ss:$16 sps:$4 sm:$0xff]  }
  0x1c   :  { %2677 = vmatpush1.bf16.msra.mxu1 %v4146_v27  ;;  %2635 = vmatprep.subr.bf16.mxu0 %v4147_v28  ;;  %v4183_v54 = vld [vmem:[%s6319_s1 + $0x144] ss:$16 sps:$4 sm:$0xff]   ;;  %v4187_v56 = vld [vmem:[%s6319_s1 + $0x140] ss:$16 sps:$4 sm:$0xff]  }
  0x1d   :  { %2678 = vmatprep.subr.bf16.mxu1 %v4149_v29  ;;  %v4185_v55 = vld [vmem:[%s6319_s1 + $0x344] ss:$16 sps:$4 sm:$0xff]   ;;  %v4188_v57 = vld [vmem:[%s6319_s1 + $0x340] ss:$16 sps:$4 sm:$0xff]  }
  0x1e   :  { %v4189_v58 = vld [vmem:[%s6319_s1 + $0x124] ss:$16 sps:$4 sm:$0xff]   ;;  %v4193_v60 = vld [vmem:[%s6319_s1 + $0x120] ss:$16 sps:$4 sm:$0xff]  }
  0x1f   :  { %2636 = vmatpush1.bf16.msra.mxu0 %v4151_v30  ;;  %v4191_v59 = vld [vmem:[%s6319_s1 + $0x324] ss:$16 sps:$4 sm:$0xff]   ;;  %v4194_v61 = vld [vmem:[%s6319_s1 + $0x320] ss:$16 sps:$4 sm:$0xff]  }
  0x20   :  { %2679 = vmatpush1.bf16.msra.mxu1 %v4152_v31  ;;  %2637 = vmatprep.subr.bf16.mxu0 %v4153_v32  ;;  %v4195_v62 = vld [vmem:[%s6319_s1 + $0x104] ss:$16 sps:$4 sm:$0xff]   ;;  %v4199_v0 = vld [vmem:[%s6319_s1 + $0x100] ss:$16 sps:$4 sm:$0xff]  }
  0x21   :  { %2680 = vmatprep.subr.bf16.mxu1 %v4155_v33  ;;  %v4197_v63 = vld [vmem:[%s6319_s1 + $0x304] ss:$16 sps:$4 sm:$0xff]   ;;  %v4200_v1 = vld [vmem:[%s6319_s1 + $0x300] ss:$16 sps:$4 sm:$0xff]  }
  0x22   :  { %v4209_v2 = vld [vmem:[%s6319_s1 + $0x4e4] ss:$16 sps:$4 sm:$0xff]   ;;  %v4207_v6 = vld [vmem:[%s6319_s1 + $0x4e0] ss:$16 sps:$4 sm:$0xff]  }
  0x23   :  { %2638 = vmatpush2.bf16.msra.mxu0 %v4157_v34  ;;  %v4212_v3 = vld [vmem:[%s6319_s1 + $0x6e4] ss:$16 sps:$4 sm:$0xff]   ;;  %v4210_v7 = vld [vmem:[%s6319_s1 + $0x6e0] ss:$16 sps:$4 sm:$0xff]  }
  0x24   :  { %2681 = vmatpush2.bf16.msra.mxu1 %v4158_v35  ;;  %2639 = vmatprep.subr.bf16.mxu0 %v4159_v36  ;;  %v4201_v4 = vld [vmem:[%s6320_s0] ss:$52 sps:$4 sm:$0xff]   ;;  %v4308_v35 = vld [vmem:[%s6320_s0 + $0x1c] ss:$52 sps:$4 sm:$0xff]  }
  0x25   :  { %2682 = vmatprep.subr.bf16.mxu1 %v4161_v37  ;;  %v4215_v8 = vld [vmem:[%s6319_s1 + $0x4c4] ss:$16 sps:$4 sm:$0xff]   ;;  %v4213_v10 = vld [vmem:[%s6319_s1 + $0x4c0] ss:$16 sps:$4 sm:$0xff]  }
  0x26   :  { %v4218_v9 = vld [vmem:[%s6319_s1 + $0x6c4] ss:$16 sps:$4 sm:$0xff]   ;;  %v4216_v11 = vld [vmem:[%s6319_s1 + $0x6c0] ss:$16 sps:$4 sm:$0xff]  }
  0x27   :  { %2640 = vmatpush2.bf16.msra.mxu0 %v4163_v38  ;;  %v4221_v12 = vld [vmem:[%s6319_s1 + $0x4a4] ss:$16 sps:$4 sm:$0xff]   ;;  %v4219_v14 = vld [vmem:[%s6319_s1 + $0x4a0] ss:$16 sps:$4 sm:$0xff]  }
  0x28   :  { %2683 = vmatpush2.bf16.msra.mxu1 %v4164_v39  ;;  %2641 = vmatprep.subr.bf16.mxu0 %v4165_v40  ;;  %v4224_v13 = vld [vmem:[%s6319_s1 + $0x6a4] ss:$16 sps:$4 sm:$0xff]   ;;  %v4222_v15 = vld [vmem:[%s6319_s1 + $0x6a0] ss:$16 sps:$4 sm:$0xff]  }
  0x29   :  { %2684 = vmatprep.subr.bf16.mxu1 %v4167_v41  ;;  %v4227_v16 = vld [vmem:[%s6319_s1 + $0x484] ss:$16 sps:$4 sm:$0xff]   ;;  %v4225_v18 = vld [vmem:[%s6319_s1 + $0x480] ss:$16 sps:$4 sm:$0xff]  }
  0x2a   :  { %v4230_v17 = vld [vmem:[%s6319_s1 + $0x684] ss:$16 sps:$4 sm:$0xff]   ;;  %v4228_v19 = vld [vmem:[%s6319_s1 + $0x680] ss:$16 sps:$4 sm:$0xff]  }
  0x2b   :  { %2642 = vmatpush2.bf16.msra.mxu0 %v4169_v42  ;;  %v4233_v20 = vld [vmem:[%s6319_s1 + $0x464] ss:$16 sps:$4 sm:$0xff]   ;;  %v4231_v22 = vld [vmem:[%s6319_s1 + $0x460] ss:$16 sps:$4 sm:$0xff]  }
  0x2c   :  { %2685 = vmatpush2.bf16.msra.mxu1 %v4170_v43  ;;  %2643 = vmatprep.subr.bf16.mxu0 %v4171_v44  ;;  %v4236_v21 = vld [vmem:[%s6319_s1 + $0x664] ss:$16 sps:$4 sm:$0xff]   ;;  %v4234_v23 = vld [vmem:[%s6319_s1 + $0x660] ss:$16 sps:$4 sm:$0xff]  }
  0x2d   :  { %2686 = vmatprep.subr.bf16.mxu1 %v4173_v45  ;;  %v4239_v24 = vld [vmem:[%s6319_s1 + $0x444] ss:$16 sps:$4 sm:$0xff]   ;;  %v4237_v26 = vld [vmem:[%s6319_s1 + $0x440] ss:$16 sps:$4 sm:$0xff]  }
  0x2e   :  { %v4242_v25 = vld [vmem:[%s6319_s1 + $0x644] ss:$16 sps:$4 sm:$0xff]   ;;  %v4240_v27 = vld [vmem:[%s6319_s1 + $0x640] ss:$16 sps:$4 sm:$0xff]  }
  0x2f   :  { %2644 = vmatpush2.bf16.msra.mxu0 %v4175_v46  ;;  %v4245_v28 = vld [vmem:[%s6319_s1 + $0x424] ss:$16 sps:$4 sm:$0xff]   ;;  %v4243_v30 = vld [vmem:[%s6319_s1 + $0x420] ss:$16 sps:$4 sm:$0xff]  }
  0x30   :  { %2687 = vmatpush2.bf16.msra.mxu1 %v4176_v47  ;;  %2645 = vmatprep.subr.bf16.mxu0 %v4177_v48  ;;  %v4248_v29 = vld [vmem:[%s6319_s1 + $0x624] ss:$16 sps:$4 sm:$0xff]   ;;  %v4246_v31 = vld [vmem:[%s6319_s1 + $0x620] ss:$16 sps:$4 sm:$0xff]  }
  0x31   :  { %2688 = vmatprep.subr.bf16.mxu1 %v4179_v50  ;;  %v4251_v32 = vld [vmem:[%s6319_s1 + $0x404] ss:$16 sps:$4 sm:$0xff]   ;;  %v4249_v36 = vld [vmem:[%s6319_s1 + $0x400] ss:$16 sps:$4 sm:$0xff]  }
  0x32   :  { %v4254_v33 = vld [vmem:[%s6319_s1 + $0x604] ss:$16 sps:$4 sm:$0xff]   ;;  %v4252_v37 = vld [vmem:[%s6319_s1 + $0x600] ss:$16 sps:$4 sm:$0xff]  }
  0x33   :  { %2646 = vmatpush2.bf16.msra.mxu0 %v4181_v52  ;;  %v4305_v34 = vld [vmem:[%s6320_s0 + $0x14] ss:$52 sps:$4 sm:$0xff]   ;;  %v4255_v40 = vld [vmem:[%s6319_s1 + $0x5e0] ss:$16 sps:$4 sm:$0xff]  }
  0x34   :  { %2689 = vmatpush2.bf16.msra.mxu1 %v4182_v53  ;;  %2647 = vmatprep.subr.bf16.mxu0 %v4183_v54  ;;  %v4257_v38 = vld [vmem:[%s6319_s1 + $0x5e4] ss:$16 sps:$4 sm:$0xff]   ;;  %v4258_v41 = vld [vmem:[%s6319_s1 + $0x7e0] ss:$16 sps:$4 sm:$0xff]  }
  0x35   :  { %2690 = vmatprep.subr.bf16.mxu1 %v4185_v55  ;;  %v4260_v39 = vld [vmem:[%s6319_s1 + $0x7e4] ss:$16 sps:$4 sm:$0xff]   ;;  %v4261_v44 = vld [vmem:[%s6319_s1 + $0x5c0] ss:$16 sps:$4 sm:$0xff]  }
  0x36   :  { %v4263_v42 = vld [vmem:[%s6319_s1 + $0x5c4] ss:$16 sps:$4 sm:$0xff]   ;;  %v4264_v45 = vld [vmem:[%s6319_s1 + $0x7c0] ss:$16 sps:$4 sm:$0xff]  }
  0x37   :  { %2648 = vmatpush2.bf16.msra.mxu0 %v4187_v56  ;;  %v4266_v43 = vld [vmem:[%s6319_s1 + $0x7c4] ss:$16 sps:$4 sm:$0xff]   ;;  %v4267_v48 = vld [vmem:[%s6319_s1 + $0x5a0] ss:$16 sps:$4 sm:$0xff]  }
  0x38   :  { %2691 = vmatpush2.bf16.msra.mxu1 %v4188_v57  ;;  %2649 = vmatprep.subr.bf16.mxu0 %v4189_v58  ;;  %v4269_v46 = vld [vmem:[%s6319_s1 + $0x5a4] ss:$16 sps:$4 sm:$0xff]   ;;  %v4270_v49 = vld [vmem:[%s6319_s1 + $0x7a0] ss:$16 sps:$4 sm:$0xff]  }
  0x39   :  { %2692 = vmatprep.subr.bf16.mxu1 %v4191_v59  ;;  %v4272_v47 = vld [vmem:[%s6319_s1 + $0x7a4] ss:$16 sps:$4 sm:$0xff]   ;;  %v4273_v52 = vld [vmem:[%s6319_s1 + $0x580] ss:$16 sps:$4 sm:$0xff]  }
  0x3a   :  { %v4275_v50 = vld [vmem:[%s6319_s1 + $0x584] ss:$16 sps:$4 sm:$0xff]   ;;  %v4276_v53 = vld [vmem:[%s6319_s1 + $0x780] ss:$16 sps:$4 sm:$0xff]  }
  0x3b   :  { %2650 = vmatpush2.bf16.msra.mxu0 %v4193_v60  ;;  %v4278_v51 = vld [vmem:[%s6319_s1 + $0x784] ss:$16 sps:$4 sm:$0xff]   ;;  %v4279_v56 = vld [vmem:[%s6319_s1 + $0x560] ss:$16 sps:$4 sm:$0xff]  }
  0x3c   :  { %2693 = vmatpush2.bf16.msra.mxu1 %v4194_v61  ;;  %2651 = vmatprep.subr.bf16.mxu0 %v4195_v62  ;;  %v4281_v54 = vld [vmem:[%s6319_s1 + $0x564] ss:$16 sps:$4 sm:$0xff]   ;;  %v4282_v57 = vld [vmem:[%s6319_s1 + $0x760] ss:$16 sps:$4 sm:$0xff]  }
  0x3d   :  { %2694 = vmatprep.subr.bf16.mxu1 %v4197_v63  ;;  %v4284_v55 = vld [vmem:[%s6319_s1 + $0x764] ss:$16 sps:$4 sm:$0xff]   ;;  %v4285_v60 = vld [vmem:[%s6319_s1 + $0x540] ss:$16 sps:$4 sm:$0xff]  }
  0x3e   :  { %v4287_v58 = vld [vmem:[%s6319_s1 + $0x544] ss:$16 sps:$4 sm:$0xff]   ;;  %v4288_v61 = vld [vmem:[%s6319_s1 + $0x740] ss:$16 sps:$4 sm:$0xff]  }
  0x3f   :  { %2652 = vmatpush2.bf16.msra.mxu0 %v4199_v0  ;;  %v4290_v59 = vld [vmem:[%s6319_s1 + $0x744] ss:$16 sps:$4 sm:$0xff]   ;;  %v4291_v0 = vld [vmem:[%s6319_s1 + $0x520] ss:$16 sps:$4 sm:$0xff]  }
  0x40   :  { %2695 = vmatpush2.bf16.msra.mxu1 %v4200_v1  ;;  %2707 = vmatprep.subr.bf16.mxu0 %v4209_v2  ;;  %v4293_v62 = vld [vmem:[%s6319_s1 + $0x524] ss:$16 sps:$4 sm:$0xff]   ;;  %v4294_v1 = vld [vmem:[%s6319_s1 + $0x720] ss:$16 sps:$4 sm:$0xff]  }
  0x41   :  { %2750 = vmatprep.subr.bf16.mxu1 %v4212_v3  ;;  %v4296_v63 = vld [vmem:[%s6319_s1 + $0x724] ss:$16 sps:$4 sm:$0xff]  }
  0x42   :  { %2654 = vmatmul.mubr.bf16.vlgmr.msra.gmra.mxu0 %v4201_v4  ;;  %v4299_v2 = vld [vmem:[%s6319_s1 + $0x504] ss:$16 sps:$4 sm:$0xff]   ;;  %v4297_v4 = vld [vmem:[%s6319_s1 + $0x500] ss:$16 sps:$4 sm:$0xff]  }
  0x43   :  { %2697 = vmatmul.mubr.bf16.vlgmr.msra.gmra.mxu1 %v4204_v5  ;;  %2708 = vmatpush1.bf16.msra.mxu0 %v4207_v6  ;;  %v4302_v3 = vld [vmem:[%s6319_s1 + $0x704] ss:$16 sps:$4 sm:$0xff]   ;;  %v4300_v5 = vld [vmem:[%s6319_s1 + $0x700] ss:$16 sps:$4 sm:$0xff]  }
  0x44   :  { %2751 = vmatpush1.bf16.msra.mxu1 %v4210_v7  ;;  %2709 = vmatprep.subr.bf16.mxu0 %v4215_v8  ;;  %v4311_v6 = vld [vmem:[%s6319_s1 + $0x8e4] ss:$16 sps:$4 sm:$0xff]  }
  0x45   :  { %2752 = vmatprep.subr.bf16.mxu1 %v4218_v9  ;;  %2739 = vmatprep.mubr.bf16.mxu0 %v4305_v34  ;;  %v4314_v7 = vld [vmem:[%s6319_s1 + $0xae4] ss:$16 sps:$4 sm:$0xff]   ;;  %v4306_v9 = vld [vmem:[%s6320_s0 + $0x18] ss:$52 sps:$4 sm:$0xff]  }
  0x46   :  { %2782 = vmatprep.mubr.bf16.mxu1 %v4308_v35  ;;  %v4303_v8 = vld [vmem:[%s6320_s0 + $0x10] ss:$52 sps:$4 sm:$0xff]  }
  0x47   :  { %2710 = vmatpush1.bf16.msra.mxu0 %v4213_v10  ;;  %v4309_v10 = vld [vmem:[%s6319_s1 + $0x8e0] ss:$16 sps:$4 sm:$0xff]   ;;  %v4347_v34 = vld [vmem:[%s6319_s1 + $0x824] ss:$16 sps:$4 sm:$0xff]  }
  0x48   :  { %2753 = vmatpush1.bf16.msra.mxu1 %v4216_v11  ;;  %2711 = vmatprep.subr.bf16.mxu0 %v4221_v12  ;;  %v4312_v11 = vld [vmem:[%s6319_s1 + $0xae0] ss:$16 sps:$4 sm:$0xff]   ;;  %v4317_v12 = vld [vmem:[%s6319_s1 + $0x8c4] ss:$16 sps:$4 sm:$0xff]  }
  0x49   :  { %2754 = vmatprep.subr.bf16.mxu1 %v4224_v13  ;;  %v4320_v13 = vld [vmem:[%s6319_s1 + $0xac4] ss:$16 sps:$4 sm:$0xff]  }
  0x4a   :  { %v4350_v35 = vld [vmem:[%s6319_s1 + $0xa24] ss:$16 sps:$4 sm:$0xff]  }
  0x4b   :  { %2712 = vmatpush1.bf16.msra.mxu0 %v4219_v14  ;;  %v4315_v14 = vld [vmem:[%s6319_s1 + $0x8c0] ss:$16 sps:$4 sm:$0xff]  }
  0x4c   :  { %2755 = vmatpush1.bf16.msra.mxu1 %v4222_v15  ;;  %2713 = vmatprep.subr.bf16.mxu0 %v4227_v16  ;;  %v4318_v15 = vld [vmem:[%s6319_s1 + $0xac0] ss:$16 sps:$4 sm:$0xff]   ;;  %v4323_v16 = vld [vmem:[%s6319_s1 + $0x8a4] ss:$16 sps:$4 sm:$0xff]  }
  0x4d   :  { %2756 = vmatprep.subr.bf16.mxu1 %v4230_v17  ;;  %v4326_v17 = vld [vmem:[%s6319_s1 + $0xaa4] ss:$16 sps:$4 sm:$0xff]  }
  0x4f   :  { %2714 = vmatpush1.bf16.msra.mxu0 %v4225_v18  ;;  %v4321_v18 = vld [vmem:[%s6319_s1 + $0x8a0] ss:$16 sps:$4 sm:$0xff]  }
  0x50   :  { %2757 = vmatpush1.bf16.msra.mxu1 %v4228_v19  ;;  %2715 = vmatprep.subr.bf16.mxu0 %v4233_v20  ;;  %v4407_v19 = vld [vmem:[%s6320_s0 + $0x24] ss:$52 sps:$4 sm:$0xff]   ;;  %v4324_v20 = vld [vmem:[%s6319_s1 + $0xaa0] ss:$16 sps:$4 sm:$0xff]  }
  0x51   :  { %2758 = vmatprep.subr.bf16.mxu1 %v4236_v21  ;;  %v4410_v21 = vld [vmem:[%s6320_s0 + $0x2c] ss:$52 sps:$4 sm:$0xff]  }
  0x53   :  { %2716 = vmatpush1.bf16.msra.mxu0 %v4231_v22  ;;  %v4329_v22 = vld [vmem:[%s6319_s1 + $0x884] ss:$16 sps:$4 sm:$0xff]  }
  0x54   :  { %2759 = vmatpush1.bf16.msra.mxu1 %v4234_v23  ;;  %2717 = vmatprep.subr.bf16.mxu0 %v4239_v24  ;;  %v4332_v23 = vld [vmem:[%s6319_s1 + $0xa84] ss:$16 sps:$4 sm:$0xff]   ;;  %v4327_v24 = vld [vmem:[%s6319_s1 + $0x880] ss:$16 sps:$4 sm:$0xff]  }
  0x55   :  { %2760 = vmatprep.subr.bf16.mxu1 %v4242_v25  ;;  %v4330_v25 = vld [vmem:[%s6319_s1 + $0xa80] ss:$16 sps:$4 sm:$0xff]  }
  0x57   :  { %2718 = vmatpush1.bf16.msra.mxu0 %v4237_v26  ;;  %v4335_v26 = vld [vmem:[%s6319_s1 + $0x864] ss:$16 sps:$4 sm:$0xff]  }
  0x58   :  { %2761 = vmatpush1.bf16.msra.mxu1 %v4240_v27  ;;  %2719 = vmatprep.subr.bf16.mxu0 %v4245_v28  ;;  %v4338_v27 = vld [vmem:[%s6319_s1 + $0xa64] ss:$16 sps:$4 sm:$0xff]   ;;  %v4333_v28 = vld [vmem:[%s6319_s1 + $0x860] ss:$16 sps:$4 sm:$0xff]  }
  0x59   :  { %2762 = vmatprep.subr.bf16.mxu1 %v4248_v29  ;;  %v4336_v29 = vld [vmem:[%s6319_s1 + $0xa60] ss:$16 sps:$4 sm:$0xff]  }
  0x5b   :  { %2720 = vmatpush1.bf16.msra.mxu0 %v4243_v30  ;;  %v4341_v30 = vld [vmem:[%s6319_s1 + $0x844] ss:$16 sps:$4 sm:$0xff]  }
  0x5c   :  { %2763 = vmatpush1.bf16.msra.mxu1 %v4246_v31  ;;  %2721 = vmatprep.subr.bf16.mxu0 %v4251_v32  ;;  %v4344_v31 = vld [vmem:[%s6319_s1 + $0xa44] ss:$16 sps:$4 sm:$0xff]   ;;  %v4339_v32 = vld [vmem:[%s6319_s1 + $0x840] ss:$16 sps:$4 sm:$0xff]  }
  0x5d   :  { %2764 = vmatprep.subr.bf16.mxu1 %v4254_v33  ;;  %v4342_v33 = vld [vmem:[%s6319_s1 + $0xa40] ss:$16 sps:$4 sm:$0xff]  }
  0x5f   :  { %2722 = vmatpush1.bf16.msra.mxu0 %v4249_v36  ;;  %v4345_v36 = vld [vmem:[%s6319_s1 + $0x820] ss:$16 sps:$4 sm:$0xff]  }
  0x60   :  { %2765 = vmatpush1.bf16.msra.mxu1 %v4252_v37  ;;  %2723 = vmatprep.subr.bf16.mxu0 %v4257_v38  ;;  %v4348_v37 = vld [vmem:[%s6319_s1 + $0xa20] ss:$16 sps:$4 sm:$0xff]   ;;  %v4353_v38 = vld [vmem:[%s6319_s1 + $0x804] ss:$16 sps:$4 sm:$0xff]  }
  0x61   :  { %2766 = vmatprep.subr.bf16.mxu1 %v4260_v39  ;;  %v4356_v39 = vld [vmem:[%s6319_s1 + $0xa04] ss:$16 sps:$4 sm:$0xff]  }
  0x63   :  { %2724 = vmatpush2.bf16.msra.mxu0 %v4255_v40  ;;  %v4351_v40 = vld [vmem:[%s6319_s1 + $0x800] ss:$16 sps:$4 sm:$0xff]  }
  0x64   :  { %2767 = vmatpush2.bf16.msra.mxu1 %v4258_v41  ;;  %2725 = vmatprep.subr.bf16.mxu0 %v4263_v42  ;;  %v4354_v41 = vld [vmem:[%s6319_s1 + $0xa00] ss:$16 sps:$4 sm:$0xff]   ;;  %v4359_v42 = vld [vmem:[%s6319_s1 + $0x9e4] ss:$16 sps:$4 sm:$0xff]  }
  0x65   :  { %2768 = vmatprep.subr.bf16.mxu1 %v4266_v43  ;;  %v4362_v43 = vld [vmem:[%s6319_s1 + $0xbe4] ss:$16 sps:$4 sm:$0xff]  }
  0x67   :  { %2726 = vmatpush2.bf16.msra.mxu0 %v4261_v44  ;;  %v4357_v44 = vld [vmem:[%s6319_s1 + $0x9e0] ss:$16 sps:$4 sm:$0xff]  }
  0x68   :  { %2769 = vmatpush2.bf16.msra.mxu1 %v4264_v45  ;;  %2727 = vmatprep.subr.bf16.mxu0 %v4269_v46  ;;  %v4360_v45 = vld [vmem:[%s6319_s1 + $0xbe0] ss:$16 sps:$4 sm:$0xff]   ;;  %v4365_v46 = vld [vmem:[%s6319_s1 + $0x9c4] ss:$16 sps:$4 sm:$0xff]  }
  0x69   :  { %2770 = vmatprep.subr.bf16.mxu1 %v4272_v47  ;;  %v4368_v47 = vld [vmem:[%s6319_s1 + $0xbc4] ss:$16 sps:$4 sm:$0xff]  }
  0x6b   :  { %2728 = vmatpush2.bf16.msra.mxu0 %v4267_v48  ;;  %v4363_v48 = vld [vmem:[%s6319_s1 + $0x9c0] ss:$16 sps:$4 sm:$0xff]  }
  0x6c   :  { %2771 = vmatpush2.bf16.msra.mxu1 %v4270_v49  ;;  %2729 = vmatprep.subr.bf16.mxu0 %v4275_v50  ;;  %v4366_v49 = vld [vmem:[%s6319_s1 + $0xbc0] ss:$16 sps:$4 sm:$0xff]   ;;  %v4371_v50 = vld [vmem:[%s6319_s1 + $0x9a4] ss:$16 sps:$4 sm:$0xff]  }
  0x6d   :  { %2772 = vmatprep.subr.bf16.mxu1 %v4278_v51  ;;  %v4374_v51 = vld [vmem:[%s6319_s1 + $0xba4] ss:$16 sps:$4 sm:$0xff]  }
  0x6f   :  { %2730 = vmatpush2.bf16.msra.mxu0 %v4273_v52  ;;  %v4369_v52 = vld [vmem:[%s6319_s1 + $0x9a0] ss:$16 sps:$4 sm:$0xff]  }
  0x70   :  { %2773 = vmatpush2.bf16.msra.mxu1 %v4276_v53  ;;  %2731 = vmatprep.subr.bf16.mxu0 %v4281_v54  ;;  %v4372_v53 = vld [vmem:[%s6319_s1 + $0xba0] ss:$16 sps:$4 sm:$0xff]   ;;  %v4377_v54 = vld [vmem:[%s6319_s1 + $0x984] ss:$16 sps:$4 sm:$0xff]  }
  0x71   :  { %2774 = vmatprep.subr.bf16.mxu1 %v4284_v55  ;;  %v4380_v55 = vld [vmem:[%s6319_s1 + $0xb84] ss:$16 sps:$4 sm:$0xff]  }
  0x73   :  { %2732 = vmatpush2.bf16.msra.mxu0 %v4279_v56  ;;  %v4375_v56 = vld [vmem:[%s6319_s1 + $0x980] ss:$16 sps:$4 sm:$0xff]  }
  0x74   :  { %2775 = vmatpush2.bf16.msra.mxu1 %v4282_v57  ;;  %2733 = vmatprep.subr.bf16.mxu0 %v4287_v58  ;;  %v4378_v57 = vld [vmem:[%s6319_s1 + $0xb80] ss:$16 sps:$4 sm:$0xff]   ;;  %v4383_v58 = vld [vmem:[%s6319_s1 + $0x964] ss:$16 sps:$4 sm:$0xff]  }
  0x75   :  { %2776 = vmatprep.subr.bf16.mxu1 %v4290_v59  ;;  %v4386_v59 = vld [vmem:[%s6319_s1 + $0xb64] ss:$16 sps:$4 sm:$0xff]  }
  0x77   :  { %2734 = vmatpush2.bf16.msra.mxu0 %v4285_v60  ;;  %v4381_v60 = vld [vmem:[%s6319_s1 + $0x960] ss:$16 sps:$4 sm:$0xff]  }
  0x78   :  { %2777 = vmatpush2.bf16.msra.mxu1 %v4288_v61  ;;  %2735 = vmatprep.subr.bf16.mxu0 %v4293_v62  ;;  %v4384_v61 = vld [vmem:[%s6319_s1 + $0xb60] ss:$16 sps:$4 sm:$0xff]   ;;  %v4389_v62 = vld [vmem:[%s6319_s1 + $0x944] ss:$16 sps:$4 sm:$0xff]  }
  0x79   :  { %2778 = vmatprep.subr.bf16.mxu1 %v4296_v63  ;;  %v4392_v63 = vld [vmem:[%s6319_s1 + $0xb44] ss:$16 sps:$4 sm:$0xff]  }
  0x7b   :  { %2736 = vmatpush2.bf16.msra.mxu0 %v4291_v0  ;;  %v4387_v0 = vld [vmem:[%s6319_s1 + $0x940] ss:$16 sps:$4 sm:$0xff]  }
  0x7c   :  { %2779 = vmatpush2.bf16.msra.mxu1 %v4294_v1  ;;  %2737 = vmatprep.subr.bf16.mxu0 %v4299_v2  ;;  %v4390_v1 = vld [vmem:[%s6319_s1 + $0xb40] ss:$16 sps:$4 sm:$0xff]   ;;  %v4395_v2 = vld [vmem:[%s6319_s1 + $0x924] ss:$16 sps:$4 sm:$0xff]  }
  0x7d   :  { %2780 = vmatprep.subr.bf16.mxu1 %v4302_v3  ;;  %v4398_v3 = vld [vmem:[%s6319_s1 + $0xb24] ss:$16 sps:$4 sm:$0xff]  }
  0x7f   :  { %2738 = vmatpush2.bf16.msra.mxu0 %v4297_v4  ;;  %v4393_v4 = vld [vmem:[%s6319_s1 + $0x920] ss:$16 sps:$4 sm:$0xff]  }
  0x80   :  { %2781 = vmatpush2.bf16.msra.mxu1 %v4300_v5  ;;  %2793 = vmatprep.subr.bf16.mxu0 %v4311_v6  ;;  %v4396_v5 = vld [vmem:[%s6319_s1 + $0xb20] ss:$16 sps:$4 sm:$0xff]   ;;  %v4401_v6 = vld [vmem:[%s6319_s1 + $0x904] ss:$16 sps:$4 sm:$0xff]  }
  0x81   :  { %2836 = vmatprep.subr.bf16.mxu1 %v4314_v7  ;;  %v4404_v7 = vld [vmem:[%s6319_s1 + $0xb04] ss:$16 sps:$4 sm:$0xff]  }
  0x82   :  { %2740 = vmatmul.mubr.bf16.vlgmr.msra.gmra.mxu0 %v4303_v8  ;;  %v4399_v8 = vld [vmem:[%s6319_s1 + $0x900] ss:$16 sps:$4 sm:$0xff]  }
  0x83   :  { %2783 = vmatmul.mubr.bf16.vlgmr.msra.gmra.mxu1 %v4306_v9  ;;  %2794 = vmatpush1.bf16.msra.mxu0 %v4309_v10  ;;  %v4402_v9 = vld [vmem:[%s6319_s1 + $0xb00] ss:$16 sps:$4 sm:$0xff]   ;;  %v4413_v10 = vld [vmem:[%s6319_s1 + $0xce4] ss:$16 sps:$4 sm:$0xff]  }
  0x84   :  { %2837 = vmatpush1.bf16.msra.mxu1 %v4312_v11  ;;  %2795 = vmatprep.subr.bf16.mxu0 %v4317_v12  ;;  %v4416_v11 = vld [vmem:[%s6319_s1 + $0xec] ss:$16 sps:$4 sm:$0xff]   ;;  %v4405_v12 = vld [vmem:[%s6320_s0 + $0x20] ss:$52 sps:$4 sm:$0xff]  }
  0x85   :  { %2838 = vmatprep.subr.bf16.mxu1 %v4320_v13  ;;  %2825 = vmatprep.mubr.bf16.mxu0 %v4407_v19  ;;  %v4408_v13 = vld [vmem:[%s6320_s0 + $0x28] ss:$52 sps:$4 sm:$0xff]  }
  0x86   :  { %2868 = vmatprep.mubr.bf16.mxu1 %v4410_v21  ;;  %v4420_v19 = vld [vmem:[%s6319_s1 + $0xc8] ss:$16 sps:$4 sm:$0xff]   ;;  %v4428_v21 = vld [vmem:[%s6319_s1 + $0xac] ss:$16 sps:$4 sm:$0xff]  }
  0x87   :  { %2796 = vmatpush1.bf16.msra.mxu0 %v4315_v14  ;;  %v4411_v14 = vld [vmem:[%s6319_s1 + $0xce0] ss:$16 sps:$4 sm:$0xff]  }
  0x88   :  { %2839 = vmatpush1.bf16.msra.mxu1 %v4318_v15  ;;  %2797 = vmatprep.subr.bf16.mxu0 %v4323_v16  ;;  %v4414_v15 = vld [vmem:[%s6319_s1 + $0xe8] ss:$16 sps:$4 sm:$0xff]   ;;  %v4419_v16 = vld [vmem:[%s6319_s1 + $0xcc4] ss:$16 sps:$4 sm:$0xff]  }
  0x89   :  { %2840 = vmatprep.subr.bf16.mxu1 %v4326_v17  ;;  %v4422_v17 = vld [vmem:[%s6319_s1 + $0xcc] ss:$16 sps:$4 sm:$0xff]  }
  0x8b   :  { %2798 = vmatpush1.bf16.msra.mxu0 %v4321_v18  ;;  %v4417_v18 = vld [vmem:[%s6319_s1 + $0xcc0] ss:$16 sps:$4 sm:$0xff]  }
  0x8c   :  { %2841 = vmatpush1.bf16.msra.mxu1 %v4324_v20  ;;  %2799 = vmatprep.subr.bf16.mxu0 %v4329_v22  ;;  %v4425_v20 = vld [vmem:[%s6319_s1 + $0xca4] ss:$16 sps:$4 sm:$0xff]   ;;  %v4793_v22 = vmov 0  }
  0x8d   :  { %2842 = vmatprep.subr.bf16.mxu1 %v4332_v23  ;;  %v4780_v23 = vld [vmem:[%s6320_s0 + $0x4] ss:$52 sps:$4 sm:$0xff]  }
  0x8f   :  { %2800 = vmatpush1.bf16.msra.mxu0 %v4327_v24  ;;  %v4423_v24 = vld [vmem:[%s6319_s1 + $0xca0] ss:$16 sps:$4 sm:$0xff]  }
  0x90   :  { %2843 = vmatpush1.bf16.msra.mxu1 %v4330_v25  ;;  %2801 = vmatprep.subr.bf16.mxu0 %v4335_v26  ;;  %v4426_v25 = vld [vmem:[%s6319_s1 + $0xa8] ss:$16 sps:$4 sm:$0xff]   ;;  %v4431_v26 = vld [vmem:[%s6319_s1 + $0xc84] ss:$16 sps:$4 sm:$0xff]  }
  0x91   :  { %2844 = vmatprep.subr.bf16.mxu1 %v4338_v27  ;;  %v4434_v27 = vld [vmem:[%s6319_s1 + $0x8c] ss:$16 sps:$4 sm:$0xff]  }
  0x93   :  { %2802 = vmatpush1.bf16.msra.mxu0 %v4333_v28  ;;  %v4429_v28 = vld [vmem:[%s6319_s1 + $0xc80] ss:$16 sps:$4 sm:$0xff]  }
  0x94   :  { %2845 = vmatpush1.bf16.msra.mxu1 %v4336_v29  ;;  %2803 = vmatprep.subr.bf16.mxu0 %v4341_v30  ;;  %v4432_v29 = vld [vmem:[%s6319_s1 + $0x88] ss:$16 sps:$4 sm:$0xff]   ;;  %v4437_v30 = vld [vmem:[%s6319_s1 + $0xc64] ss:$16 sps:$4 sm:$0xff]  }
  0x95   :  { %2846 = vmatprep.subr.bf16.mxu1 %v4344_v31  ;;  %v4440_v31 = vld [vmem:[%s6319_s1 + $0x6c] ss:$16 sps:$4 sm:$0xff]  }
  0x97   :  { %2804 = vmatpush1.bf16.msra.mxu0 %v4339_v32  ;;  %v4435_v32 = vld [vmem:[%s6319_s1 + $0xc60] ss:$16 sps:$4 sm:$0xff]  }
  0x98   :  { %2847 = vmatpush1.bf16.msra.mxu1 %v4342_v33  ;;  %2805 = vmatprep.subr.bf16.mxu0 %v4347_v34  ;;  %v4438_v33 = vld [vmem:[%s6319_s1 + $0x68] ss:$16 sps:$4 sm:$0xff]   ;;  %v4443_v34 = vld [vmem:[%s6319_s1 + $0xc44] ss:$16 sps:$4 sm:$0xff]  }
  0x99   :  { %2848 = vmatprep.subr.bf16.mxu1 %v4350_v35  ;;  %v4446_v35 = vld [vmem:[%s6319_s1 + $0x4c] ss:$16 sps:$4 sm:$0xff]  }
  0x9b   :  { %2806 = vmatpush1.bf16.msra.mxu0 %v4345_v36  ;;  %v4441_v36 = vld [vmem:[%s6319_s1 + $0xc40] ss:$16 sps:$4 sm:$0xff]  }
  0x9c   :  { %2849 = vmatpush1.bf16.msra.mxu1 %v4348_v37  ;;  %2807 = vmatprep.subr.bf16.mxu0 %v4353_v38  ;;  %v4444_v37 = vld [vmem:[%s6319_s1 + $0x48] ss:$16 sps:$4 sm:$0xff]   ;;  %v4449_v38 = vld [vmem:[%s6319_s1 + $0xc24] ss:$16 sps:$4 sm:$0xff]  }
  0x9d   :  { %2850 = vmatprep.subr.bf16.mxu1 %v4356_v39  ;;  %v4452_v39 = vld [vmem:[%s6319_s1 + $0x2c] ss:$16 sps:$4 sm:$0xff]  }
  0x9f   :  { %2808 = vmatpush1.bf16.msra.mxu0 %v4351_v40  ;;  %v4447_v40 = vld [vmem:[%s6319_s1 + $0xc20] ss:$16 sps:$4 sm:$0xff]  }
  0xa0   :  { %2851 = vmatpush1.bf16.msra.mxu1 %v4354_v41  ;;  %2809 = vmatprep.subr.bf16.mxu0 %v4359_v42  ;;  %v4450_v41 = vld [vmem:[%s6319_s1 + $0x28] ss:$16 sps:$4 sm:$0xff]   ;;  %v4455_v42 = vld [vmem:[%s6319_s1 + $0xc04] ss:$16 sps:$4 sm:$0xff]  }
  0xa1   :  { %2852 = vmatprep.subr.bf16.mxu1 %v4362_v43  ;;  %v4458_v43 = vld [vmem:[%s6319_s1 + $0xc] ss:$16 sps:$4 sm:$0xff]  }
  0xa3   :  { %2810 = vmatpush2.bf16.msra.mxu0 %v4357_v44  ;;  %v4453_v44 = vld [vmem:[%s6319_s1 + $0xc00] ss:$16 sps:$4 sm:$0xff]  }
  0xa4   :  { %2853 = vmatpush2.bf16.msra.mxu1 %v4360_v45  ;;  %2811 = vmatprep.subr.bf16.mxu0 %v4365_v46  ;;  %v4456_v45 = vld [vmem:[%s6319_s1 + $0x8] ss:$16 sps:$4 sm:$0xff]   ;;  %v4462_v46 = vld [vmem:[%s6319_s1 + $0x1ec] ss:$16 sps:$4 sm:$0xff]  }
  0xa5   :  { %2854 = vmatprep.subr.bf16.mxu1 %v4368_v47  ;;  %v4465_v47 = vld [vmem:[%s6319_s1 + $0x2ec] ss:$16 sps:$4 sm:$0xff]  }
  0xa7   :  { %2812 = vmatpush2.bf16.msra.mxu0 %v4363_v48  ;;  %v4459_v48 = vld [vmem:[%s6320_s0 + $0x30] ss:$52 sps:$4 sm:$0xff]  }
  0xa8   :  { %2855 = vmatpush2.bf16.msra.mxu1 %v4366_v49  ;;  %2813 = vmatprep.subr.bf16.mxu0 %v4371_v50  ;;  %v4460_v49 = vld [vmem:[%s6319_s1 + $0x1e8] ss:$16 sps:$4 sm:$0xff]  }
  0xa9   :  { %2856 = vmatprep.subr.bf16.mxu1 %v4374_v51  ;;  %v4463_v50 = vld [vmem:[%s6319_s1 + $0x2e8] ss:$16 sps:$4 sm:$0xff]   ;;  %v4468_v51 = vld [vmem:[%s6319_s1 + $0x1cc] ss:$16 sps:$4 sm:$0xff]  }
  0xab   :  { %2814 = vmatpush2.bf16.msra.mxu0 %v4369_v52  ;;  %v4471_v52 = vld [vmem:[%s6319_s1 + $0x2cc] ss:$16 sps:$4 sm:$0xff]  }
  0xac   :  { %2857 = vmatpush2.bf16.msra.mxu1 %v4372_v53  ;;  %2815 = vmatprep.subr.bf16.mxu0 %v4377_v54  ;;  %v4466_v53 = vld [vmem:[%s6319_s1 + $0x1c8] ss:$16 sps:$4 sm:$0xff]  }
  0xad   :  { %2858 = vmatprep.subr.bf16.mxu1 %v4380_v55  ;;  %v4469_v54 = vld [vmem:[%s6319_s1 + $0x2c8] ss:$16 sps:$4 sm:$0xff]   ;;  %v4474_v55 = vld [vmem:[%s6319_s1 + $0x1ac] ss:$16 sps:$4 sm:$0xff]  }
  0xaf   :  { %2816 = vmatpush2.bf16.msra.mxu0 %v4375_v56  ;;  %v4477_v56 = vld [vmem:[%s6319_s1 + $0x2ac] ss:$16 sps:$4 sm:$0xff]  }
  0xb0   :  { %2859 = vmatpush2.bf16.msra.mxu1 %v4378_v57  ;;  %2817 = vmatprep.subr.bf16.mxu0 %v4383_v58  ;;  %v4781_v57 = vld [vmem:[%s6320_s0 + $0xc] ss:$52 sps:$4 sm:$0xff]   ;;  %v4472_v58 = vld [vmem:[%s6319_s1 + $0x1a8] ss:$16 sps:$4 sm:$0xff]  }
  0xb1   :  { %2860 = vmatprep.subr.bf16.mxu1 %v4386_v59  ;;  %v4475_v59 = vld [vmem:[%s6319_s1 + $0x2a8] ss:$16 sps:$4 sm:$0xff]  }
  0xb3   :  { %2818 = vmatpush2.bf16.msra.mxu0 %v4381_v60  ;;  %v4480_v60 = vld [vmem:[%s6319_s1 + $0x18c] ss:$16 sps:$4 sm:$0xff]  }
  0xb4   :  { %2861 = vmatpush2.bf16.msra.mxu1 %v4384_v61  ;;  %2819 = vmatprep.subr.bf16.mxu0 %v4389_v62  ;;  %v4483_v61 = vld [vmem:[%s6319_s1 + $0x28c] ss:$16 sps:$4 sm:$0xff]   ;;  %v4478_v62 = vld [vmem:[%s6319_s1 + $0x188] ss:$16 sps:$4 sm:$0xff]  }
  0xb5   :  { %2862 = vmatprep.subr.bf16.mxu1 %v4392_v63  ;;  %v4481_v63 = vld [vmem:[%s6319_s1 + $0x288] ss:$16 sps:$4 sm:$0xff]  }
  0xb7   :  { %2820 = vmatpush2.bf16.msra.mxu0 %v4387_v0  ;;  %v4486_v0 = vld [vmem:[%s6319_s1 + $0x16c] ss:$16 sps:$4 sm:$0xff]  }
  0xb8   :  { %2863 = vmatpush2.bf16.msra.mxu1 %v4390_v1  ;;  %2821 = vmatprep.subr.bf16.mxu0 %v4395_v2  ;;  %v4489_v1 = vld [vmem:[%s6319_s1 + $0x26c] ss:$16 sps:$4 sm:$0xff]   ;;  %v4484_v2 = vld [vmem:[%s6319_s1 + $0x168] ss:$16 sps:$4 sm:$0xff]  }
  0xb9   :  { %2864 = vmatprep.subr.bf16.mxu1 %v4398_v3  ;;  %v4487_v3 = vld [vmem:[%s6319_s1 + $0x268] ss:$16 sps:$4 sm:$0xff]  }
  0xbb   :  { %2822 = vmatpush2.bf16.msra.mxu0 %v4393_v4  ;;  %v4492_v4 = vld [vmem:[%s6319_s1 + $0x14c] ss:$16 sps:$4 sm:$0xff]  }
  0xbc   :  { %2865 = vmatpush2.bf16.msra.mxu1 %v4396_v5  ;;  %2823 = vmatprep.subr.bf16.mxu0 %v4401_v6  ;;  %v4495_v5 = vld [vmem:[%s6319_s1 + $0x24c] ss:$16 sps:$4 sm:$0xff]   ;;  %v4490_v6 = vld [vmem:[%s6319_s1 + $0x148] ss:$16 sps:$4 sm:$0xff]  }
  0xbd   :  { %2866 = vmatprep.subr.bf16.mxu1 %v4404_v7  ;;  %v4493_v7 = vld [vmem:[%s6319_s1 + $0x248] ss:$16 sps:$4 sm:$0xff]  }
  0xbf   :  { %2824 = vmatpush2.bf16.msra.mxu0 %v4399_v8  ;;  %v4498_v8 = vld [vmem:[%s6319_s1 + $0x12c] ss:$16 sps:$4 sm:$0xff]  }
  0xc0   :  { %2867 = vmatpush2.bf16.msra.mxu1 %v4402_v9  ;;  %2879 = vmatprep.subr.bf16.mxu0 %v4413_v10  ;;  %v4501_v9 = vld [vmem:[%s6319_s1 + $0x22c] ss:$16 sps:$4 sm:$0xff]   ;;  %v4496_v10 = vld [vmem:[%s6319_s1 + $0x128] ss:$16 sps:$4 sm:$0xff]  }
  0xc1   :  { %2922 = vmatprep.subr.bf16.mxu1 %v4416_v11  ;;  %v4499_v11 = vld [vmem:[%s6319_s1 + $0x228] ss:$16 sps:$4 sm:$0xff]  }
  0xc2   :  { %2826 = vmatmul.mubr.bf16.vlgmr.msra.gmra.mxu0 %v4405_v12  ;;  %v4504_v12 = vld [vmem:[%s6319_s1 + $0x10c] ss:$16 sps:$4 sm:$0xff]  }
  0xc3   :  { %2869 = vmatmul.mubr.bf16.vlgmr.msra.gmra.mxu1 %v4408_v13  ;;  %2880 = vmatpush1.bf16.msra.mxu0 %v4411_v14  ;;  %v4507_v13 = vld [vmem:[%s6319_s1 + $0x20c] ss:$16 sps:$4 sm:$0xff]   ;;  %v4502_v14 = vld [vmem:[%s6319_s1 + $0x108] ss:$16 sps:$4 sm:$0xff]  }
  0xc4   :  { %2923 = vmatpush1.bf16.msra.mxu1 %v4414_v15  ;;  %2881 = vmatprep.subr.bf16.mxu0 %v4419_v16  ;;  %v4505_v15 = vld [vmem:[%s6319_s1 + $0x208] ss:$16 sps:$4 sm:$0xff]   ;;  %v4510_v16 = vld [vmem:[%s6319_s1 + $0x3ec] ss:$16 sps:$4 sm:$0xff]  }
  0xc5   :  { %2924 = vmatprep.subr.bf16.mxu1 %v4422_v17  ;;  %2911 = vmatprep.mubr.bf16.mxu0 %v4793_v22  ;;  %v4513_v17 = vld [vmem:[%s6319_s1 + $0x4ec] ss:$16 sps:$4 sm:$0xff]  }
  0xc6   :  { %2954 = vmatprep.mubr.bf16.mxu1 %v4780_v23  ;;  %v4782_v23 = vld [vmem:[%s6320_s0] ss:$52 sps:$4 sm:$0xff]  }
  0xc7   :  { %2882 = vmatpush1.bf16.msra.mxu0 %v4417_v18  ;;  %v4508_v18 = vld [vmem:[%s6319_s1 + $0x3e8] ss:$16 sps:$4 sm:$0xff]  }
  0xc8   :  { %2925 = vmatpush1.bf16.msra.mxu1 %v4420_v19  ;;  %2883 = vmatprep.subr.bf16.mxu0 %v4425_v20  ;;  %v4511_v19 = vld [vmem:[%s6319_s1 + $0x4e8] ss:$16 sps:$4 sm:$0xff]   ;;  %v4516_v20 = vld [vmem:[%s6319_s1 + $0x3cc] ss:$16 sps:$4 sm:$0xff]  }
  0xc9   :  { %2926 = vmatprep.subr.bf16.mxu1 %v4428_v21  ;;  %v4519_v21 = vld [vmem:[%s6319_s1 + $0x4cc] ss:$16 sps:$4 sm:$0xff]  }
  0xcb   :  { %2884 = vmatpush1.bf16.msra.mxu0 %v4423_v24  ;;  %v4514_v24 = vld [vmem:[%s6319_s1 + $0x3c8] ss:$16 sps:$4 sm:$0xff]  }
  0xcc   :  { %2927 = vmatpush1.bf16.msra.mxu1 %v4426_v25  ;;  %2885 = vmatprep.subr.bf16.mxu0 %v4431_v26  ;;  %v4517_v25 = vld [vmem:[%s6319_s1 + $0x4c8] ss:$16 sps:$4 sm:$0xff]   ;;  %v4522_v26 = vld [vmem:[%s6319_s1 + $0x3ac] ss:$16 sps:$4 sm:$0xff]  }
  0xcd   :  { %2928 = vmatprep.subr.bf16.mxu1 %v4434_v27  ;;  %v4525_v27 = vld [vmem:[%s6319_s1 + $0x4ac] ss:$16 sps:$4 sm:$0xff]  }
  0xcf   :  { %2886 = vmatpush1.bf16.msra.mxu0 %v4429_v28  ;;  %v4783_v28 = vld [vmem:[%s6320_s0 + $0x14] ss:$52 sps:$4 sm:$0xff]  }
  0xd0   :  { %2929 = vmatpush1.bf16.msra.mxu1 %v4432_v29  ;;  %2887 = vmatprep.subr.bf16.mxu0 %v4437_v30  ;;  %v4520_v29 = vld [vmem:[%s6319_s1 + $0x3a8] ss:$16 sps:$4 sm:$0xff]  }
  0xd1   :  { %2930 = vmatprep.subr.bf16.mxu1 %v4440_v31  ;;  %v4523_v30 = vld [vmem:[%s6319_s1 + $0x4a8] ss:$16 sps:$4 sm:$0xff]   ;;  %v4528_v31 = vld [vmem:[%s6319_s1 + $0x38c] ss:$16 sps:$4 sm:$0xff]  }
  0xd3   :  { %2888 = vmatpush1.bf16.msra.mxu0 %v4435_v32  ;;  %v4531_v32 = vld [vmem:[%s6319_s1 + $0x48c] ss:$16 sps:$4 sm:$0xff]  }
  0xd4   :  { %2931 = vmatpush1.bf16.msra.mxu1 %v4438_v33  ;;  %2889 = vmatprep.subr.bf16.mxu0 %v4443_v34  ;;  %v4526_v33 = vld [vmem:[%s6319_s1 + $0x388] ss:$16 sps:$4 sm:$0xff]  }
  0xd5   :  { %2932 = vmatprep.subr.bf16.mxu1 %v4446_v35  ;;  %v4529_v34 = vld [vmem:[%s6319_s1 + $0x488] ss:$16 sps:$4 sm:$0xff]   ;;  %v4534_v35 = vld [vmem:[%s6319_s1 + $0x36c] ss:$16 sps:$4 sm:$0xff]  }
  0xd7   :  { %2890 = vmatpush1.bf16.msra.mxu0 %v4441_v36  ;;  %v4537_v36 = vld [vmem:[%s6319_s1 + $0x46c] ss:$16 sps:$4 sm:$0xff]  }
  0xd8   :  { %2933 = vmatpush1.bf16.msra.mxu1 %v4444_v37  ;;  %2891 = vmatprep.subr.bf16.mxu0 %v4449_v38  ;;  %v4532_v37 = vld [vmem:[%s6319_s1 + $0x368] ss:$16 sps:$4 sm:$0xff]  }
  0xd9   :  { %2934 = vmatprep.subr.bf16.mxu1 %v4452_v39  ;;  %v4535_v38 = vld [vmem:[%s6319_s1 + $0x468] ss:$16 sps:$4 sm:$0xff]   ;;  %v4540_v39 = vld [vmem:[%s6319_s1 + $0x34c] ss:$16 sps:$4 sm:$0xff]  }
  0xdb   :  { %2892 = vmatpush1.bf16.msra.mxu0 %v4447_v40  ;;  %v4543_v40 = vld [vmem:[%s6319_s1 + $0x44c] ss:$16 sps:$4 sm:$0xff]  }
  0xdc   :  { %2935 = vmatpush1.bf16.msra.mxu1 %v4450_v41  ;;  %2893 = vmatprep.subr.bf16.mxu0 %v4455_v42  ;;  %v4538_v41 = vld [vmem:[%s6319_s1 + $0x348] ss:$16 sps:$4 sm:$0xff]  }
  0xdd   :  { %2936 = vmatprep.subr.bf16.mxu1 %v4458_v43  ;;  %v4541_v42 = vld [vmem:[%s6319_s1 + $0x448] ss:$16 sps:$4 sm:$0xff]   ;;  %v4546_v43 = vld [vmem:[%s6319_s1 + $0x32c] ss:$16 sps:$4 sm:$0xff]  }
  0xdf   :  { %2894 = vmatpush1.bf16.msra.mxu0 %v4453_v44  ;;  %v4549_v44 = vld [vmem:[%s6319_s1 + $0x42c] ss:$16 sps:$4 sm:$0xff]  }
  0xe0   :  { %2937 = vmatpush1.bf16.msra.mxu1 %v4456_v45  ;;  %2965 = vmatprep.subr.bf16.mxu0 %v4465_v47  ;;  %v4544_v45 = vld [vmem:[%s6319_s1 + $0x328] ss:$16 sps:$4 sm:$0xff]   ;;  %v4552_v47 = vld [vmem:[%s6319_s1 + $0x30c] ss:$16 sps:$4 sm:$0xff]  }
  0xe1   :  { %2938 = vmatprep.subr.bf16.mxu1 %v4462_v46  ;;  %v4547_v46 = vld [vmem:[%s6319_s1 + $0x428] ss:$16 sps:$4 sm:$0xff]  }
  0xe2   :  { %2912 = vmatmul.mubr.bf16.vlgmr.msra.gmra.mxu0 %v4459_v48  ;;  %v4555_v48 = vld [vmem:[%s6319_s1 + $0x40c] ss:$16 sps:$4 sm:$0xff]  }
  0xe3   :  { %2966 = vmatpush1.bf16.msra.mxu0 %v4463_v50  ;;  %2997 = vmatprep.mubr.bf16.mxu0 %v4781_v57  ;;  %v4553_v50 = vld [vmem:[%s6319_s1 + $0x408] ss:$16 sps:$4 sm:$0xff]  }
  0xe4   :  { %2939 = vmatpush2.bf16.msra.mxu1 %v4460_v49  ;;  %2967 = vmatprep.subr.bf16.mxu0 %v4471_v52  ;;  %v4550_v49 = vld [vmem:[%s6319_s1 + $0x308] ss:$16 sps:$4 sm:$0xff]   ;;  %v4561_v52 = vld [vmem:[%s6319_s1 + $0x6ec] ss:$16 sps:$4 sm:$0xff]  }
  0xe5   :  { %2940 = vmatprep.subr.bf16.mxu1 %v4468_v51  ;;  %v4558_v51 = vld [vmem:[%s6319_s1 + $0x5ec] ss:$16 sps:$4 sm:$0xff]   ;;  %v4562_v57 = vld [vmem:[%s6319_s1 + $0x5c8] ss:$16 sps:$4 sm:$0xff]  }
  0xe7   :  { %2968 = vmatpush1.bf16.msra.mxu0 %v4469_v54  ;;  %v4559_v54 = vld [vmem:[%s6319_s1 + $0x6e8] ss:$16 sps:$4 sm:$0xff]  }
  0xe8   :  { %2941 = vmatpush2.bf16.msra.mxu1 %v4466_v53  ;;  %2969 = vmatprep.subr.bf16.mxu0 %v4477_v56  ;;  %v4556_v53 = vld [vmem:[%s6319_s1 + $0x5e8] ss:$16 sps:$4 sm:$0xff]   ;;  %v4567_v56 = vld [vmem:[%s6319_s1 + $0x6cc] ss:$16 sps:$4 sm:$0xff]  }
  0xe9   :  { %2942 = vmatprep.subr.bf16.mxu1 %v4474_v55  ;;  %v4564_v55 = vld [vmem:[%s6319_s1 + $0x5cc] ss:$16 sps:$4 sm:$0xff]  }
  0xeb   :  { %2970 = vmatpush1.bf16.msra.mxu0 %v4475_v59  ;;  %v4784_v59 = vld [vmem:[%s6320_s0 + $0x8] ss:$52 sps:$4 sm:$0xff]  }
  0xec   :  { %2943 = vmatpush2.bf16.msra.mxu1 %v4472_v58  ;;  %2971 = vmatprep.subr.bf16.mxu0 %v4483_v61  ;;  %v4565_v58 = vld [vmem:[%s6319_s1 + $0x6c8] ss:$16 sps:$4 sm:$0xff]   ;;  %v4573_v61 = vld [vmem:[%s6319_s1 + $0x6ac] ss:$16 sps:$4 sm:$0xff]  }
  0xed   :  { %2944 = vmatprep.subr.bf16.mxu1 %v4480_v60  ;;  %v4570_v60 = vld [vmem:[%s6319_s1 + $0x5ac] ss:$16 sps:$4 sm:$0xff]  }
  0xef   :  { %2972 = vmatpush1.bf16.msra.mxu0 %v4481_v63  ;;  %v4571_v63 = vld [vmem:[%s6319_s1 + $0x6a8] ss:$16 sps:$4 sm:$0xff]  }
  0xf0   :  { %2945 = vmatpush2.bf16.msra.mxu1 %v4478_v62  ;;  %2973 = vmatprep.subr.bf16.mxu0 %v4489_v1  ;;  %v4568_v62 = vld [vmem:[%s6319_s1 + $0x5a8] ss:$16 sps:$4 sm:$0xff]   ;;  %v4576_v1 = vld [vmem:[%s6319_s1 + $0x58c] ss:$16 sps:$4 sm:$0xff]  }
  0xf1   :  { %2946 = vmatprep.subr.bf16.mxu1 %v4486_v0  ;;  %v4785_v0 = vld [vmem:[%s6320_s0 + $0x1c] ss:$52 sps:$4 sm:$0xff]  }
  0xf3   :  { %2974 = vmatpush1.bf16.msra.mxu0 %v4487_v3  ;;  %v4574_v3 = vld [vmem:[%s6319_s1 + $0x588] ss:$16 sps:$4 sm:$0xff]  }
  0xf4   :  { %2947 = vmatpush2.bf16.msra.mxu1 %v4484_v2  ;;  %2975 = vmatprep.subr.bf16.mxu0 %v4495_v5  ;;  %v4579_v2 = vld [vmem:[%s6319_s1 + $0x68c] ss:$16 sps:$4 sm:$0xff]  }
  0xf5   :  { %2948 = vmatprep.subr.bf16.mxu1 %v4492_v4  ;;  %v4577_v4 = vld [vmem:[%s6319_s1 + $0x688] ss:$16 sps:$4 sm:$0xff]   ;;  %v4582_v5 = vld [vmem:[%s6319_s1 + $0x56c] ss:$16 sps:$4 sm:$0xff]  }
  0xf7   :  { %2976 = vmatpush1.bf16.msra.mxu0 %v4493_v7  ;;  %v4580_v7 = vld [vmem:[%s6319_s1 + $0x568] ss:$16 sps:$4 sm:$0xff]  }
  0xf8   :  { %2949 = vmatpush2.bf16.msra.mxu1 %v4490_v6  ;;  %2977 = vmatprep.subr.bf16.mxu0 %v4501_v9  ;;  %v4585_v6 = vld [vmem:[%s6319_s1 + $0x66c] ss:$16 sps:$4 sm:$0xff]  }
  0xf9   :  { %2950 = vmatprep.subr.bf16.mxu1 %v4498_v8  ;;  %v4583_v8 = vld [vmem:[%s6319_s1 + $0x668] ss:$16 sps:$4 sm:$0xff]   ;;  %v4588_v9 = vld [vmem:[%s6319_s1 + $0x54c] ss:$16 sps:$4 sm:$0xff]  }
  0xfb   :  { %2978 = vmatpush1.bf16.msra.mxu0 %v4499_v11  ;;  %v4586_v11 = vld [vmem:[%s6319_s1 + $0x548] ss:$16 sps:$4 sm:$0xff]  }
  0xfc   :  { %2951 = vmatpush2.bf16.msra.mxu1 %v4496_v10  ;;  %2979 = vmatprep.subr.bf16.mxu0 %v4507_v13  ;;  %v4591_v10 = vld [vmem:[%s6319_s1 + $0x64c] ss:$16 sps:$4 sm:$0xff]  }
  0xfd   :  { %2952 = vmatprep.subr.bf16.mxu1 %v4504_v12  ;;  %v4589_v12 = vld [vmem:[%s6319_s1 + $0x648] ss:$16 sps:$4 sm:$0xff]   ;;  %v4594_v13 = vld [vmem:[%s6319_s1 + $0x52c] ss:$16 sps:$4 sm:$0xff]  }
  0xff   :  { %2980 = vmatpush1.bf16.msra.mxu0 %v4505_v15  ;;  %v4592_v15 = vld [vmem:[%s6319_s1 + $0x528] ss:$16 sps:$4 sm:$0xff]  }
 0x100   :  { %2953 = vmatpush2.bf16.msra.mxu1 %v4502_v14  ;;  %2981 = vmatprep.subr.bf16.mxu0 %v4510_v16  ;;  %v4597_v14 = vld [vmem:[%s6319_s1 + $0x62c] ss:$16 sps:$4 sm:$0xff]   ;;  %v4595_v16 = vld [vmem:[%s6319_s1 + $0x628] ss:$16 sps:$4 sm:$0xff]  }
 0x101   :  { %3008 = vmatprep.subr.bf16.mxu1 %v4513_v17  ;;  %v4600_v17 = vld [vmem:[%s6319_s1 + $0x50c] ss:$16 sps:$4 sm:$0xff]  }
 0x103   :  { %2955 = vmatmul.mubr.bf16.vlgmr.msra.gmra.mxu1 %v4782_v23  ;;  %2982 = vmatpush2.bf16.msra.mxu0 %v4508_v18  ;;  %v4603_v18 = vld [vmem:[%s6319_s1 + $0x60c] ss:$16 sps:$4 sm:$0xff]  }
 0x104   :  { %3009 = vmatpush1.bf16.msra.mxu1 %v4511_v19  ;;  %2983 = vmatprep.subr.bf16.mxu0 %v4516_v20  ;;  %v4598_v19 = vld [vmem:[%s6319_s1 + $0x508] ss:$16 sps:$4 sm:$0xff]   ;;  %v4609_v23 = vld [vmem:[%s6319_s1 + $0x8ec] ss:$16 sps:$4 sm:$0xff]  }
 0x105   :  { %3010 = vmatprep.subr.bf16.mxu1 %v4519_v21  ;;  %3040 = vmatprep.mubr.bf16.mxu1 %v4783_v28  ;;  %v4601_v20 = vld [vmem:[%s6319_s1 + $0x608] ss:$16 sps:$4 sm:$0xff]   ;;  %v4606_v21 = vld [vmem:[%s6319_s1 + $0x7ec] ss:$16 sps:$4 sm:$0xff]   ;;  %v4786_v28 = vld [vmem:[%s6320_s0 + $0x10] ss:$52 sps:$4 sm:$0xff]  }
 0x107   :  { %2984 = vmatpush2.bf16.msra.mxu0 %v4514_v24  ;;  %v4604_v24 = vld [vmem:[%s6319_s1 + $0x7e8] ss:$16 sps:$4 sm:$0xff]  }
 0x108   :  { %3011 = vmatpush1.bf16.msra.mxu1 %v4517_v25  ;;  %2985 = vmatprep.subr.bf16.mxu0 %v4522_v26  ;;  %v4607_v25 = vld [vmem:[%s6319_s1 + $0x8e8] ss:$16 sps:$4 sm:$0xff]   ;;  %v4612_v26 = vld [vmem:[%s6319_s1 + $0x7cc] ss:$16 sps:$4 sm:$0xff]  }
 0x109   :  { %3012 = vmatprep.subr.bf16.mxu1 %v4525_v27  ;;  %v4615_v27 = vld [vmem:[%s6319_s1 + $0x8cc] ss:$16 sps:$4 sm:$0xff]  }
 0x10b   :  { %2986 = vmatpush2.bf16.msra.mxu0 %v4520_v29  ;;  %v4610_v29 = vld [vmem:[%s6319_s1 + $0x7c8] ss:$16 sps:$4 sm:$0xff]  }
 0x10c   :  { %3013 = vmatpush1.bf16.msra.mxu1 %v4523_v30  ;;  %2987 = vmatprep.subr.bf16.mxu0 %v4528_v31  ;;  %v4613_v30 = vld [vmem:[%s6319_s1 + $0x8c8] ss:$16 sps:$4 sm:$0xff]   ;;  %v4618_v31 = vld [vmem:[%s6319_s1 + $0x7ac] ss:$16 sps:$4 sm:$0xff]  }
 0x10d   :  { %3014 = vmatprep.subr.bf16.mxu1 %v4531_v32  ;;  %v4621_v32 = vld [vmem:[%s6319_s1 + $0x8ac] ss:$16 sps:$4 sm:$0xff]  }
 0x10f   :  { %2988 = vmatpush2.bf16.msra.mxu0 %v4526_v33  ;;  %v4787_v33 = vld [vmem:[%s6320_s0 + $0x24] ss:$52 sps:$4 sm:$0xff]  }
 0x110   :  { %3015 = vmatpush1.bf16.msra.mxu1 %v4529_v34  ;;  %2989 = vmatprep.subr.bf16.mxu0 %v4534_v35  ;;  %v4616_v34 = vld [vmem:[%s6319_s1 + $0x7a8] ss:$16 sps:$4 sm:$0xff]  }
 0x111   :  { %3016 = vmatprep.subr.bf16.mxu1 %v4537_v36  ;;  %v4619_v35 = vld [vmem:[%s6319_s1 + $0x8a8] ss:$16 sps:$4 sm:$0xff]   ;;  %v4624_v36 = vld [vmem:[%s6319_s1 + $0x78c] ss:$16 sps:$4 sm:$0xff]  }
 0x113   :  { %2990 = vmatpush2.bf16.msra.mxu0 %v4532_v37  ;;  %v4627_v37 = vld [vmem:[%s6319_s1 + $0x88c] ss:$16 sps:$4 sm:$0xff]  }
 0x114   :  { %3017 = vmatpush1.bf16.msra.mxu1 %v4535_v38  ;;  %2991 = vmatprep.subr.bf16.mxu0 %v4540_v39  ;;  %v4622_v38 = vld [vmem:[%s6319_s1 + $0x788] ss:$16 sps:$4 sm:$0xff]  }
 0x115   :  { %3018 = vmatprep.subr.bf16.mxu1 %v4543_v40  ;;  %v4625_v39 = vld [vmem:[%s6319_s1 + $0x888] ss:$16 sps:$4 sm:$0xff]   ;;  %v4630_v40 = vld [vmem:[%s6319_s1 + $0x76c] ss:$16 sps:$4 sm:$0xff]  }
 0x117   :  { %2992 = vmatpush2.bf16.msra.mxu0 %v4538_v41  ;;  %v4633_v41 = vld [vmem:[%s6319_s1 + $0x86c] ss:$16 sps:$4 sm:$0xff]  }
 0x118   :  { %3019 = vmatpush1.bf16.msra.mxu1 %v4541_v42  ;;  %2993 = vmatprep.subr.bf16.mxu0 %v4546_v43  ;;  %v4628_v42 = vld [vmem:[%s6319_s1 + $0x768] ss:$16 sps:$4 sm:$0xff]  }
 0x119   :  { %3020 = vmatprep.subr.bf16.mxu1 %v4549_v44  ;;  %v4631_v43 = vld [vmem:[%s6319_s1 + $0x868] ss:$16 sps:$4 sm:$0xff]   ;;  %v4636_v44 = vld [vmem:[%s6319_s1 + $0x74c] ss:$16 sps:$4 sm:$0xff]  }
 0x11b   :  { %2994 = vmatpush2.bf16.msra.mxu0 %v4544_v45  ;;  %v4639_v45 = vld [vmem:[%s6319_s1 + $0x84c] ss:$16 sps:$4 sm:$0xff]  }
 0x11c   :  { %3021 = vmatpush1.bf16.msra.mxu1 %v4547_v46  ;;  %2995 = vmatprep.subr.bf16.mxu0 %v4552_v47  ;;  %v4634_v46 = vld [vmem:[%s6319_s1 + $0x748] ss:$16 sps:$4 sm:$0xff]  }
 0x11d   :  { %3022 = vmatprep.subr.bf16.mxu1 %v4555_v48  ;;  %v4637_v47 = vld [vmem:[%s6319_s1 + $0x848] ss:$16 sps:$4 sm:$0xff]   ;;  %v4642_v48 = vld [vmem:[%s6319_s1 + $0x72c] ss:$16 sps:$4 sm:$0xff]  }
 0x11f   :  { %2996 = vmatpush2.bf16.msra.mxu0 %v4550_v49  ;;  %v4645_v49 = vld [vmem:[%s6319_s1 + $0x82c] ss:$16 sps:$4 sm:$0xff]  }
 0x120   :  { %3023 = vmatpush1.bf16.msra.mxu1 %v4553_v50  ;;  %3051 = vmatprep.subr.bf16.mxu0 %v4561_v52  ;;  %v4640_v50 = vld [vmem:[%s6319_s1 + $0x728] ss:$16 sps:$4 sm:$0xff]   ;;  %v4648_v52 = vld [vmem:[%s6319_s1 + $0x70c] ss:$16 sps:$4 sm:$0xff]  }
 0x121   :  { %3024 = vmatprep.subr.bf16.mxu1 %v4558_v51  ;;  %v4643_v51 = vld [vmem:[%s6319_s1 + $0x828] ss:$16 sps:$4 sm:$0xff]  }
 0x122   :  { %2998 = vmatmul.mubr.bf16.vlgmr.msra.gmra.mxu0 %v4784_v59  ;;  %v4655_v59 = vld [vmem:[%s6319_s1 + $0xae8] ss:$16 sps:$4 sm:$0xff]  }
 0x123   :  { %3052 = vmatpush1.bf16.msra.mxu0 %v4559_v54  ;;  %3083 = vmatprep.mubr.bf16.mxu0 %v4785_v0  ;;  %v4646_v54 = vld [vmem:[%s6319_s1 + $0x708] ss:$16 sps:$4 sm:$0xff]  }
 0x124   :  { %3025 = vmatpush2.bf16.msra.mxu1 %v4556_v53  ;;  %3053 = vmatprep.subr.bf16.mxu0 %v4567_v56  ;;  %v4651_v53 = vld [vmem:[%s6319_s1 + $0x80c] ss:$16 sps:$4 sm:$0xff]   ;;  %v4661_v0 = vld [vmem:[%s6319_s1 + $0xac8] ss:$16 sps:$4 sm:$0xff]  }
 0x125   :  { %3026 = vmatprep.subr.bf16.mxu1 %v4564_v55  ;;  %v4649_v55 = vld [vmem:[%s6319_s1 + $0x808] ss:$16 sps:$4 sm:$0xff]   ;;  %v4654_v56 = vld [vmem:[%s6319_s1 + $0x9ec] ss:$16 sps:$4 sm:$0xff]  }
 0x127   :  { %3054 = vmatpush1.bf16.msra.mxu0 %v4565_v58  ;;  %v4652_v58 = vld [vmem:[%s6319_s1 + $0x9e8] ss:$16 sps:$4 sm:$0xff]  }
 0x128   :  { %3027 = vmatpush2.bf16.msra.mxu1 %v4562_v57  ;;  %3055 = vmatprep.subr.bf16.mxu0 %v4573_v61  ;;  %v4657_v57 = vld [vmem:[%s6319_s1 + $0xaec] ss:$16 sps:$4 sm:$0xff]  }
 0x129   :  { %3028 = vmatprep.subr.bf16.mxu1 %v4570_v60  ;;  %v4660_v60 = vld [vmem:[%s6319_s1 + $0x9cc] ss:$16 sps:$4 sm:$0xff]  }
 0x12a   :  { %v4663_v61 = vld [vmem:[%s6319_s1 + $0xacc] ss:$16 sps:$4 sm:$0xff]  }
 0x12b   :  { %3056 = vmatpush1.bf16.msra.mxu0 %v4571_v63  ;;  %v4658_v63 = vld [vmem:[%s6319_s1 + $0x9c8] ss:$16 sps:$4 sm:$0xff]  }
 0x12c   :  { %3029 = vmatpush2.bf16.msra.mxu1 %v4568_v62  ;;  %3057 = vmatprep.subr.bf16.mxu0 %v4579_v2  ;;  %v4788_v62 = vld [vmem:[%s6320_s0 + $0x18] ss:$52 sps:$4 sm:$0xff]  }
 0x12d   :  { %3030 = vmatprep.subr.bf16.mxu1 %v4576_v1  ;;  %v4666_v1 = vld [vmem:[%s6319_s1 + $0x9ac] ss:$16 sps:$4 sm:$0xff]  }
 0x12e   :  { %v4669_v2 = vld [vmem:[%s6319_s1 + $0xaac] ss:$16 sps:$4 sm:$0xff]  }
 0x12f   :  { %3058 = vmatpush1.bf16.msra.mxu0 %v4577_v4  ;;  %v4664_v4 = vld [vmem:[%s6319_s1 + $0x9a8] ss:$16 sps:$4 sm:$0xff]  }
 0x130   :  { %3031 = vmatpush2.bf16.msra.mxu1 %v4574_v3  ;;  %3059 = vmatprep.subr.bf16.mxu0 %v4585_v6  ;;  %v4789_v3 = vld [vmem:[%s6320_s0 + $0x2c] ss:$52 sps:$4 sm:$0xff]  }
 0x131   :  { %3032 = vmatprep.subr.bf16.mxu1 %v4582_v5  ;;  %v4667_v5 = vld [vmem:[%s6319_s1 + $0xaa8] ss:$16 sps:$4 sm:$0xff]   ;;  %v4672_v6 = vld [vmem:[%s6319_s1 + $0x98c] ss:$16 sps:$4 sm:$0xff]  }
 0x133   :  { %3060 = vmatpush1.bf16.msra.mxu0 %v4583_v8  ;;  %v4670_v8 = vld [vmem:[%s6319_s1 + $0x988] ss:$16 sps:$4 sm:$0xff]  }
 0x134   :  { %3033 = vmatpush2.bf16.msra.mxu1 %v4580_v7  ;;  %3061 = vmatprep.subr.bf16.mxu0 %v4591_v10  ;;  %v4675_v7 = vld [vmem:[%s6319_s1 + $0xa8c] ss:$16 sps:$4 sm:$0xff]  }
 0x135   :  { %3034 = vmatprep.subr.bf16.mxu1 %v4588_v9  ;;  %v4673_v9 = vld [vmem:[%s6319_s1 + $0xa88] ss:$16 sps:$4 sm:$0xff]   ;;  %v4678_v10 = vld [vmem:[%s6319_s1 + $0x96c] ss:$16 sps:$4 sm:$0xff]  }
 0x137   :  { %3062 = vmatpush1.bf16.msra.mxu0 %v4589_v12  ;;  %v4676_v12 = vld [vmem:[%s6319_s1 + $0x968] ss:$16 sps:$4 sm:$0xff]  }
 0x138   :  { %3035 = vmatpush2.bf16.msra.mxu1 %v4586_v11  ;;  %3063 = vmatprep.subr.bf16.mxu0 %v4597_v14  ;;  %v4681_v11 = vld [vmem:[%s6319_s1 + $0xa6c] ss:$16 sps:$4 sm:$0xff]  }
 0x139   :  { %3036 = vmatprep.subr.bf16.mxu1 %v4594_v13  ;;  %v4679_v13 = vld [vmem:[%s6319_s1 + $0xa68] ss:$16 sps:$4 sm:$0xff]   ;;  %v4684_v14 = vld [vmem:[%s6319_s1 + $0x94c] ss:$16 sps:$4 sm:$0xff]  }
 0x13b   :  { %3064 = vmatpush1.bf16.msra.mxu0 %v4595_v16  ;;  %v4682_v16 = vld [vmem:[%s6319_s1 + $0x948] ss:$16 sps:$4 sm:$0xff]  }
 0x13c   :  { %3037 = vmatpush2.bf16.msra.mxu1 %v4592_v15  ;;  %3065 = vmatprep.subr.bf16.mxu0 %v4603_v18  ;;  %v4687_v15 = vld [vmem:[%s6319_s1 + $0xa4c] ss:$16 sps:$4 sm:$0xff]  }
 0x13d   :  { %3038 = vmatprep.subr.bf16.mxu1 %v4600_v17  ;;  %v4685_v17 = vld [vmem:[%s6319_s1 + $0xa48] ss:$16 sps:$4 sm:$0xff]   ;;  %v4690_v18 = vld [vmem:[%s6319_s1 + $0x92c] ss:$16 sps:$4 sm:$0xff]  }
 0x13f   :  { %3066 = vmatpush1.bf16.msra.mxu0 %v4601_v20  ;;  %v4688_v20 = vld [vmem:[%s6319_s1 + $0x928] ss:$16 sps:$4 sm:$0xff]  }
 0x140   :  { %3039 = vmatpush2.bf16.msra.mxu1 %v4598_v19  ;;  %3067 = vmatprep.subr.bf16.mxu0 %v4606_v21  ;;  %v4693_v19 = vld [vmem:[%s6319_s1 + $0xa2c] ss:$16 sps:$4 sm:$0xff]   ;;  %v4691_v21 = vld [vmem:[%s6319_s1 + $0xa28] ss:$16 sps:$4 sm:$0xff]  }
 0x141   :  { %3094 = vmatprep.subr.bf16.mxu1 %v4609_v23  ;;  %v6039_v23 = vpop.f32.mrf.mxu0 }
 0x143   :  { %3041 = vmatmul.mubr.bf16.vlgmr.msra.gmra.mxu1 %v4786_v28  ;;  %3068 = vmatpush2.bf16.msra.mxu0 %v4604_v24  ;;  %v4696_v24 = vld [vmem:[%s6319_s1 + $0x90c] ss:$16 sps:$4 sm:$0xff]   ;;  %v6053_v28 = vpop.f32.mrf.mxu0 }
 0x144   :  { %3095 = vmatpush1.bf16.msra.mxu1 %v4607_v25  ;;  %3069 = vmatprep.subr.bf16.mxu0 %v4612_v26  ;;  %v4699_v25 = vld [vmem:[%s6319_s1 + $0xa0c] ss:$16 sps:$4 sm:$0xff]   ;;  %v4694_v26 = vld [vmem:[%s6319_s1 + $0x908] ss:$16 sps:$4 sm:$0xff]  }
 0x145   :  { %3096 = vmatprep.subr.bf16.mxu1 %v4615_v27  ;;  %3126 = vmatprep.mubr.bf16.mxu1 %v4787_v33  ;;  %v4697_v27 = vld [vmem:[%s6319_s1 + $0xa08] ss:$16 sps:$4 sm:$0xff]  }
 0x146   :  { %v4703_v33 = vld [vmem:[%s6319_s1 + $0xce8] ss:$16 sps:$4 sm:$0xff]  }
 0x147   :  { %3070 = vmatpush2.bf16.msra.mxu0 %v4610_v29  ;;  %v4702_v29 = vld [vmem:[%s6319_s1 + $0xbec] ss:$16 sps:$4 sm:$0xff]  }
 0x148   :  { %3097 = vmatpush1.bf16.msra.mxu1 %v4613_v30  ;;  %3071 = vmatprep.subr.bf16.mxu0 %v4618_v31  ;;  %v4705_v30 = vld [vmem:[%s6319_s1 + $0xcec] ss:$16 sps:$4 sm:$0xff]   ;;  %v6061_v31 = vpop.f32.mrf.mxu1 }
 0x149   :  { %3098 = vmatprep.subr.bf16.mxu1 %v4621_v32  ;;  %v4700_v32 = vld [vmem:[%s6319_s1 + $0xbe8] ss:$16 sps:$4 sm:$0xff]  }
 0x14b   :  { %3072 = vmatpush2.bf16.msra.mxu0 %v4616_v34  ;;  %v6069_v34 = vpop.f32.mrf.mxu0 }
 0x14c   :  { %3099 = vmatpush1.bf16.msra.mxu1 %v4619_v35  ;;  %3073 = vmatprep.subr.bf16.mxu0 %v4624_v36  ;;  %v4708_v35 = vld [vmem:[%s6319_s1 + $0xbcc] ss:$16 sps:$4 sm:$0xff]  }
 0x14d   :  { %3100 = vmatprep.subr.bf16.mxu1 %v4627_v37  ;;  %v4711_v36 = vld [vmem:[%s6319_s1 + $0xccc] ss:$16 sps:$4 sm:$0xff]   ;;  %v455_v37 = vlaneseq }
 0x14f   :  { %3074 = vmatpush2.bf16.msra.mxu0 %v4622_v38  ;;  %v6077_v38 = vpop.f32.mrf.mxu1 }
 0x150   :  { %3101 = vmatpush1.bf16.msra.mxu1 %v4625_v39  ;;  %3075 = vmatprep.subr.bf16.mxu0 %v4630_v40  ;;  %v4790_v39 = vld [vmem:[%s6320_s0 + $0x20] ss:$52 sps:$4 sm:$0xff]   ;;  %v4706_v40 = vld [vmem:[%s6319_s1 + $0xbc8] ss:$16 sps:$4 sm:$0xff]  }
 0x151   :  { %3102 = vmatprep.subr.bf16.mxu1 %v4633_v41  ;;  %v4709_v41 = vld [vmem:[%s6319_s1 + $0xcc8] ss:$16 sps:$4 sm:$0xff]  }
 0x153   :  { %3076 = vmatpush2.bf16.msra.mxu0 %v4628_v42  ;;  %v2661_v42 = vpop.f32.mrf.mxu0 }
 0x154   :  { %3103 = vmatpush1.bf16.msra.mxu1 %v4631_v43  ;;  %3077 = vmatprep.subr.bf16.mxu0 %v4636_v44  ;;  %v4714_v43 = vld [vmem:[%s6319_s1 + $0xbac] ss:$16 sps:$4 sm:$0xff]  }
 0x155   :  { %3104 = vmatprep.subr.bf16.mxu1 %v4639_v45  ;;  %v4717_v44 = vld [vmem:[%s6319_s1 + $0xcac] ss:$16 sps:$4 sm:$0xff]   ;;  %v6094_v45 = vshrl.u32 %v455_v37, 7 }
 0x157   :  { %3078 = vmatpush2.bf16.msra.mxu0 %v4634_v46  ;;  %v6097_v46 = vpop.f32.mrf.mxu1 }
 0x158   :  { %3105 = vmatpush1.bf16.msra.mxu1 %v4637_v47  ;;  %3079 = vmatprep.subr.bf16.mxu0 %v4642_v48  ;;  %v2741_v47 = vpop.f32.mrf.mxu0  ;;  %v4712_v48 = vld [vmem:[%s6319_s1 + $0xba8] ss:$16 sps:$4 sm:$0xff]  }
 0x159   :  { %3106 = vmatprep.subr.bf16.mxu1 %v4645_v49  ;;  %v4715_v49 = vld [vmem:[%s6319_s1 + $0xca8] ss:$16 sps:$4 sm:$0xff]  }
 0x15b   :  { %3080 = vmatpush2.bf16.msra.mxu0 %v4640_v50  ;;  %v4720_v50 = vld [vmem:[%s6319_s1 + $0xb8c] ss:$16 sps:$4 sm:$0xff]  }
 0x15c   :  { %3107 = vmatpush1.bf16.msra.mxu1 %v4643_v51  ;;  %3081 = vmatprep.subr.bf16.mxu0 %v4648_v52  ;;  %v457_v51 = vsub.s32 0, %v6094_v45  ;;  %v6115_v52 = vld [vmem:[%s6322_s2] sm:$0xf] }
 0x15d   :  { %3108 = vmatprep.subr.bf16.mxu1 %v4651_v53  ;;  %v2704_v53 = vpop.f32.mrf.mxu1 }
 0x15f   :  { %3082 = vmatpush2.bf16.msra.mxu0 %v4646_v54  ;;  %v2743_v54 = vpop.f32.mrf.mxu0 }
 0x160   :  { %3109 = vmatpush1.bf16.msra.mxu1 %v4649_v55  ;;  %3137 = vmatprep.subr.bf16.mxu0 %v4657_v57  ;;  %v461_v55 = vsub.s32 1, %v6094_v45  ;;  %v4721_v57 = vld [vmem:[%s6319_s1 + $0xc88] ss:$16 sps:$4 sm:$0xff]  }
 0x161   :  { %3110 = vmatprep.subr.bf16.mxu1 %v4654_v56  ;;  %v4718_v56 = vld [vmem:[%s6319_s1 + $0xb88] ss:$16 sps:$4 sm:$0xff]  }
 0x162   :  { %3084 = vmatmul.mubr.bf16.vlgmr.msra.gmra.mxu0 %v4788_v62  ;;  %v2745_v62 = vpop.f32.mrf.mxu0 }
 0x163   :  { %3138 = vmatpush1.bf16.msra.mxu0 %v4655_v59  ;;  %3169 = vmatprep.mubr.bf16.mxu0 %v4789_v3  ;;  %v4726_v59 = vld [vmem:[%s6319_s1 + $0xb6c] ss:$16 sps:$4 sm:$0xff]  }
 0x164   :  { %3111 = vmatpush2.bf16.msra.mxu1 %v4652_v58  ;;  %3139 = vmatprep.subr.bf16.mxu0 %v4663_v61  ;;  %v2784_v58 = vpop.f32.mrf.mxu1  ;;  %v458_v61 = vrot.slane %v6115_v52, %v457_v51  ;;  %v4732_v3 = vld [vmem:[%s6319_s1 + $0xb4c] ss:$16 sps:$4 sm:$0xff]   ;;  %v4792_v51 = vld [vmem:[%s6320_s0 + $0x30] ss:$52 sps:$4 sm:$0xff]  }
 0x165   :  { %3112 = vmatprep.subr.bf16.mxu1 %v4660_v60  ;;  %v4729_v60 = vld [vmem:[%s6319_s1 + $0xc6c] ss:$16 sps:$4 sm:$0xff]  }
 0x167   :  { %3140 = vmatpush1.bf16.msra.mxu0 %v4661_v0  ;;  %v4724_v0 = vld [vmem:[%s6319_s1 + $0xb68] ss:$16 sps:$4 sm:$0xff]  }
 0x168   :  { %3113 = vmatpush2.bf16.msra.mxu1 %v4658_v63  ;;  %3141 = vmatprep.subr.bf16.mxu0 %v4669_v2  ;;  %v462_v63 = vrot.slane %v6115_v52, %v461_v55  ;;  %v2786_v2 = vpop.f32.mrf.mxu1 }
 0x169   :  { %3114 = vmatprep.subr.bf16.mxu1 %v4666_v1  ;;  %v4727_v1 = vld [vmem:[%s6319_s1 + $0xc68] ss:$16 sps:$4 sm:$0xff]  }
 0x16b   :  { %3142 = vmatpush1.bf16.msra.mxu0 %v4667_v5  ;;  %v2656_v5 = vadd.f32 %v6039_v23, %v458_v61 }
 0x16c   :  { %3115 = vmatpush2.bf16.msra.mxu1 %v4664_v4  ;;  %3143 = vmatprep.subr.bf16.mxu0 %v4675_v7  ;;  %v4735_v4 = vld [vmem:[%s6319_s1 + $0xc4c] ss:$16 sps:$4 sm:$0xff]   ;;  %v2658_v7 = vadd.f32 %v6053_v28, %v462_v63 }
 0x16d   :  { %3116 = vmatprep.subr.bf16.mxu1 %v4672_v6  ;;  %v2747_v6 = vpop.f32.mrf.mxu0 }
 0x16f   :  { %3144 = vmatpush1.bf16.msra.mxu0 %v4673_v9  ;;  %v4733_v9 = vld [vmem:[%s6319_s1 + $0xc48] ss:$16 sps:$4 sm:$0xff]  }
 0x170   :  { %3117 = vmatpush2.bf16.msra.mxu1 %v4670_v8  ;;  %3145 = vmatprep.subr.bf16.mxu0 %v4681_v11  ;;  %v4730_v8 = vld [vmem:[%s6319_s1 + $0xb48] ss:$16 sps:$4 sm:$0xff]  }
 0x171   :  { %3118 = vmatprep.subr.bf16.mxu1 %v4678_v10  ;;  %v2788_v10 = vpop.f32.mrf.mxu1 }
 0x173   :  { %3146 = vmatpush1.bf16.msra.mxu0 %v4679_v13  ;;  %v4741_v13 = vld [vmem:[%s6319_s1 + $0xc2c] ss:$16 sps:$4 sm:$0xff]  }
 0x174   :  { %3119 = vmatpush2.bf16.msra.mxu1 %v4676_v12  ;;  %3147 = vmatprep.subr.bf16.mxu0 %v4687_v15  ;;  %v4738_v12 = vld [vmem:[%s6319_s1 + $0xb2c] ss:$16 sps:$4 sm:$0xff]   ;;  %v2660_v15 = vadd.f32 %v6069_v34, %v458_v61 }
 0x175   :  { %3120 = vmatprep.subr.bf16.mxu1 %v4684_v14  ;;  %v2699_v14 = vadd.f32 %v6061_v31, %v2656_v5  ;;  %v4754_v5 = vld [vmem:[%s6321_s3 + $0x60] sm:$0xff]  }
 0x177   :  { %3148 = vmatpush1.bf16.msra.mxu0 %v4685_v17  ;;  %v2662_v17 = vadd.f32 %v2661_v42, %v462_v63  ;;  %v4749_v42 = vld [vmem:[%s6321_s3 + $0x38] sm:$0xff]  }
 0x178   :  { %3121 = vmatpush2.bf16.msra.mxu1 %v4682_v16  ;;  %3149 = vmatprep.subr.bf16.mxu0 %v4693_v19  ;;  %v2701_v16 = vadd.f32 %v6077_v38, %v2658_v7  ;;  %v4736_v19 = vld [vmem:[%s6319_s1 + $0xb28] ss:$16 sps:$4 sm:$0xff]  }
 0x179   :  { %3122 = vmatprep.subr.bf16.mxu1 %v4690_v18  ;;  %v2742_v18 = vadd.f32 %v2741_v47, %v2699_v14  ;;  %v4759_v14 = vld [vmem:[%s6321_s3 + $0x10] sm:$0xff]  }
 0x17b   :  { %3150 = vmatpush1.bf16.msra.mxu0 %v4691_v21  ;;  %v2790_v21 = vpop.f32.mrf.mxu1 }
 0x17c   :  { %3123 = vmatpush2.bf16.msra.mxu1 %v4688_v20  ;;  %3151 = vmatprep.subr.bf16.mxu0 %v4699_v25  ;;  %v4739_v20 = vld [vmem:[%s6319_s1 + $0xc28] ss:$16 sps:$4 sm:$0xff]   ;;  %v4747_v25 = vld [vmem:[%s6319_s1 + $0xc0c] ss:$16 sps:$4 sm:$0xff]  }
 0x17d   :  { %3124 = vmatprep.subr.bf16.mxu1 %v4696_v24  ;;  %v4744_v24 = vld [vmem:[%s6319_s1 + $0xb0c] ss:$16 sps:$4 sm:$0xff]  }
 0x17f   :  { %3152 = vmatpush1.bf16.msra.mxu0 %v4697_v27  ;;  %v2744_v27 = vadd.f32 %v2743_v54, %v2701_v16  ;;  %v4761_v16 = vld [vmem:[%s6321_s3 + $0x8] sm:$0xff]  }
 0x180   :  { %3125 = vmatpush2.bf16.msra.mxu1 %v4694_v26  ;;  %3153 = vmatprep.subr.bf16.mxu0 %v4702_v29  ;;  %v2703_v26 = vadd.f32 %v6097_v46, %v2660_v15  ;;  %v2705_v29 = vadd.f32 %v2704_v53, %v2662_v17  ;;  %v4760_v15 = vld [vmem:[%s6321_s3 + $0x48] sm:$0xff]   ;;  %v4762_v17 = vld [vmem:[%s6321_s3 + $0x40] sm:$0xff]  }
 0x181   :  { %3180 = vmatprep.subr.bf16.mxu1 %v4705_v30  ;;  %v2785_v30 = vadd.f32 %v2784_v58, %v2742_v18  ;;  %v4752_v58 = vld [vmem:[%s6321_s3 + $0x68] sm:$0xff]   ;;  %v4763_v18 = vld [vmem:[%s6321_s3] sm:$0xff]  }
 0x182   :  { %v2827_v11 = vpop.f32.mrf.mxu0  ;;  %v2746_v31 = vadd.f32 %v2745_v62, %v2703_v26  ;;  %v2748_v37 = vadd.f32 %v2747_v6, %v2705_v29  ;;  %v4769_v26 = vld [vmem:[%s6321_s3 + $0xa8] sm:$0xff]   ;;  %v4772_v29 = vld [vmem:[%s6321_s3 + $0xd8] sm:$0xff]  }
 0x183   :  { %3127 = vmatmul.mubr.bf16.vlgmr.msra.gmra.mxu1 %v4790_v39  ;;  %3154 = vmatpush2.bf16.msra.mxu0 %v4700_v32  ;;  %v2870_v28 = vpop.f32.mrf.mxu1  ;;  %v4742_v32 = vld [vmem:[%s6319_s1 + $0xb08] ss:$16 sps:$4 sm:$0xff]   ;;  %v2828_v38 = vadd.f32 %v2827_v11, %v2785_v30 }
 0x184   :  { %3181 = vmatpush1.bf16.msra.mxu1 %v4703_v33  ;;  %3155 = vmatprep.subr.bf16.mxu0 %v4708_v35  ;;  %v2829_v23 = vpop.f32.mrf.mxu0  ;;  %v4745_v33 = vld [vmem:[%s6319_s1 + $0xc08] ss:$16 sps:$4 sm:$0xff]   ;;  %v2791_v46 = vadd.f32 %v2790_v21, %v2748_v37 }
 0x185   :  { %3182 = vmatprep.subr.bf16.mxu1 %v4711_v36  ;;  %3212 = vmatprep.mubr.bf16.mxu1 %v4793_v22  ;;  %v4723_v22 = vld [vmem:[%s6319_s1 + $0xc8c] ss:$16 sps:$4 sm:$0xff]   ;;  %v2787_v36 = vadd.f32 %v2786_v2, %v2744_v27  ;;  %v2872_v39 = vpop.f32.mrf.mxu1  ;;  %v2871_v47 = vadd.f32 %v2870_v28, %v2828_v38  ;;  %v4770_v27 = vld [vmem:[%s6321_s3 + $0xe0] sm:$0xff]  }
 0x186   :  { %v2831_v34 = vpop.f32.mrf.mxu0  ;;  %v4748_v35 = vld [vmem:[%s6321_s3 + $0x78] sm:$0xff]   ;;  %v4771_v28 = vld [vmem:[%s6321_s3 + $0xa0] sm:$0xff]  }
 0x187   :  { %3156 = vmatpush2.bf16.msra.mxu0 %v4706_v40  ;;  %v2789_v40 = vadd.f32 %v2788_v10, %v2746_v31  ;;  %v4756_v10 = vld [vmem:[%s6321_s3 + $0x58] sm:$0xff]   ;;  %v4774_v31 = vld [vmem:[%s6321_s3 + $0xd0] sm:$0xff]  }
 0x188   :  { %3183 = vmatpush1.bf16.msra.mxu1 %v4709_v41  ;;  %3157 = vmatprep.subr.bf16.mxu0 %v4714_v43  ;;  %v2830_v41 = vadd.f32 %v2829_v23, %v2787_v36  ;;  %v2833_v43 = vpop.f32.mrf.mxu0  ;;  %v4765_v21 = vld [vmem:[%s6321_s3 + $0xb8] sm:$0xff]   ;;  %v4766_v23 = vld [vmem:[%s6321_s3 + $0xf0] sm:$0xff]   ;;  %v4779_v36 = vld [vmem:[%s6321_s3 + $0x80] sm:$0xff]  }
 0x189   :  { %3184 = vmatprep.subr.bf16.mxu1 %v4717_v44  ;;  %v4750_v44 = vld [vmem:[%s6321_s3 + $0x70] sm:$0xff]   ;;  %v2834_v54 = vadd.f32 %v2833_v43, %v2791_v46  ;;  %v4773_v30 = vld [vmem:[%s6321_s3 + $0x98] sm:$0xff]  }
 0x18a   :  { %v2873_v53 = vadd.f32 %v2872_v39, %v2830_v41 }
 0x18b   :  { %3158 = vmatpush2.bf16.msra.mxu0 %v4712_v48  ;;  %v2832_v48 = vadd.f32 %v2831_v34, %v2789_v40  ;;  %v4777_v34 = vld [vmem:[%s6321_s3 + $0x88] sm:$0xff]  }
 0x18c   :  { %3185 = vmatpush1.bf16.msra.mxu1 %v4715_v49  ;;  %3159 = vmatprep.subr.bf16.mxu0 %v4720_v50  ;;  %v2874_v49 = vpop.f32.mrf.mxu1 }
 0x18d   :  { %3186 = vmatprep.subr.bf16.mxu1 %v4723_v22  ;;  %v4791_v22 = vld [vmem:[%s6320_s0 + $0x28] ss:$52 sps:$4 sm:$0xff]  }
 0x18e   :  { %v2876_v62 = vpop.f32.mrf.mxu1 }
 0x18f   :  { %3160 = vmatpush2.bf16.msra.mxu0 %v4718_v56  ;;  %v4751_v56 = vld [vmem:[%s6321_s3 + $0x30] sm:$0xff]  }
 0x190   :  { %3187 = vmatpush1.bf16.msra.mxu1 %v4721_v57  ;;  %3161 = vmatprep.subr.bf16.mxu0 %v4726_v59  ;;  %v2875_v59 = vadd.f32 %v2874_v49, %v2832_v48  ;;  %v465_v48 = vsub.s32 2, %v6094_v45 }
 0x191   :  { %3188 = vmatprep.subr.bf16.mxu1 %v4729_v60 }
 0x193   :  { %3162 = vmatpush2.bf16.msra.mxu0 %v4724_v0  ;;  %v2877_v0 = vadd.f32 %v2876_v62, %v2834_v54  ;;  %v466_v54 = vrot.slane %v6115_v52, %v465_v48 }
 0x194   :  { %3189 = vmatpush1.bf16.msra.mxu1 %v4727_v1  ;;  %3163 = vmatprep.subr.bf16.mxu0 %v4732_v3  ;;  %v4753_v3 = vld [vmem:[%s6321_s3 + $0x28] sm:$0xff]  }
 0x195   :  { %3190 = vmatprep.subr.bf16.mxu1 %v4735_v4 }
 0x197   :  { %3164 = vmatpush2.bf16.msra.mxu0 %v4730_v8 }
 0x198   :  { %3191 = vmatpush1.bf16.msra.mxu1 %v4733_v9  ;;  %3165 = vmatprep.subr.bf16.mxu0 %v4738_v12  ;;  %v4755_v9 = vld [vmem:[%s6321_s3 + $0x20] sm:$0xff]   ;;  %v4757_v12 = vld [vmem:[%s6321_s3 + $0x18] sm:$0xff]  }
 0x199   :  { %3192 = vmatprep.subr.bf16.mxu1 %v4741_v13  ;;  %v4758_v13 = vld [vmem:[%s6321_s3 + $0x50] sm:$0xff]  }
 0x19b   :  { %3166 = vmatpush2.bf16.msra.mxu0 %v4736_v19 }
 0x19c   :  { %3193 = vmatpush1.bf16.msra.mxu1 %v4739_v20  ;;  %3167 = vmatprep.subr.bf16.mxu0 %v4744_v24  ;;  %v4764_v20 = vld [vmem:[%s6321_s3 + $0xf8] sm:$0xff]   ;;  %v4767_v24 = vld [vmem:[%s6321_s3 + $0xb0] sm:$0xff]  }
 0x19d   :  { %3194 = vmatprep.subr.bf16.mxu1 %v4747_v25  ;;  %v4768_v25 = vld [vmem:[%s6321_s3 + $0xe8] sm:$0xff]  }
 0x19f   :  { %3168 = vmatpush2.bf16.msra.mxu0 %v4742_v32  ;;  %v4775_v32 = vld [vmem:[%s6321_s3 + $0x90] sm:$0xff]  }
 0x1a0   :  { %3195 = vmatpush1.bf16.msra.mxu1 %v4745_v33  ;;  %4060 = vmatprep.subr.bf16.mxu0 %v4748_v35  ;;  %v4776_v33 = vld [vmem:[%s6321_s3 + $0xc8] sm:$0xff]   ;;  %v4778_v35 = vld [vmem:[%s6321_s3 + $0xc0] sm:$0xff]  }
 0x1a1   :  { %4082 = vmatprep.subr.bf16.mxu1 %v4764_v20 }
 0x1a2   :  { %v2913_v50 = vpop.f32.mrf.mxu0  ;;  %3170 = vmatmul.mubr.bf16.vlgmr.msra.gmra.mxu0 %v4791_v22  ;;  %v469_v22 = vsub.s32 3, %v6094_v45 }
 0x1a3   :  { %3213 = vmatmul.mubr.bf16.vlgmr.msra.gmra.mxu1 %v4792_v51  ;;  %v2914_v55 = vadd.f32 %v2913_v50, %v2871_v47  ;;  %4061 = vmatpush3.bf16.msra.mxu0 %v4749_v42 }
 0x1a4   :  { %v2915_v57 = vpop.f32.mrf.mxu0  ;;  %4062 = vmatprep.subr.bf16.mxu0 %v4750_v44  ;;  %4083 = vmatpush3.bf16.msra.mxu1 %v4765_v21 }
 0x1a5   :  { %v3223_v60 = vmax.f32 %v2914_v55, 0.0  ;;  %v2916_v61 = vadd.f32 %v2915_v57, %v2873_v53  ;;  %4084 = vmatprep.subr.bf16.mxu1 %v4766_v23  ;;  %v470_v55 = vrot.slane %v6115_v52, %v469_v22 }
 0x1a6   :  { %v2917_v63 = vpop.f32.mrf.mxu0 }
 0x1a7   :  { %3231 = vst [vmem:[%s6323_s5] sm:$0xff] %v3223_v60  ;;  %v3224_v1 = vmax.f32 %v2916_v61, 0.0  ;;  %v2918_v2 = vadd.f32 %v2917_v63, %v2875_v59  ;;  %4063 = vmatpush3.bf16.msra.mxu0 %v4751_v56 }
 0x1a8   :  { %v2919_v4 = vpop.f32.mrf.mxu0  ;;  %4064 = vmatprep.subr.bf16.mxu0 %v4752_v58  ;;  %4085 = vmatpush3.bf16.msra.mxu1 %v4767_v24 }
 0x1a9   :  { %3232 = vst [vmem:[%s6323_s5 + $0x8] sm:$0xff] %v3224_v1  ;;  %v3227_v6 = vmax.f32 %v2918_v2, 0.0  ;;  %v2920_v7 = vadd.f32 %v2919_v4, %v2877_v0  ;;  %4086 = vmatprep.subr.bf16.mxu1 %v4768_v25 }
 0x1ab   :  { %3235 = vst [vmem:[%s6323_s5 + $0x20] sm:$0xff] %v3227_v6  ;;  %v3228_v8 = vmax.f32 %v2920_v7, 0.0  ;;  %4065 = vmatpush3.bf16.msra.mxu0 %v4753_v3  ;;  %v3239_v19 = vpack.c.bf16 %v3227_v6, %v3223_v60 }
 0x1ac   :  { %4066 = vmatprep.subr.bf16.mxu0 %v4754_v5  ;;  %4087 = vmatpush3.bf16.msra.mxu1 %v4769_v26 }
 0x1ad   :  { %3236 = vst [vmem:[%s6323_s5 + $0x28] sm:$0xff] %v3228_v8  ;;  %v3240_v11 = vpack.c.bf16 %v3228_v8, %v3224_v1  ;;  %4088 = vmatprep.subr.bf16.mxu1 %v4770_v27 }
 0x1af   :  { %4067 = vmatpush3.bf16.msra.mxu0 %v4755_v9  ;;  %3538 = vmatprep.mubr.bf16.mxu0 %v3240_v11 }
 0x1b0   :  { %4068 = vmatprep.subr.bf16.mxu0 %v4756_v10  ;;  %4089 = vmatpush3.bf16.msra.mxu1 %v4771_v28 }
 0x1b1   :  { %4090 = vmatprep.subr.bf16.mxu1 %v4772_v29 }
 0x1b3   :  { %4069 = vmatpush3.bf16.msra.mxu0 %v4757_v12 }
 0x1b4   :  { %4070 = vmatprep.subr.bf16.mxu0 %v4758_v13  ;;  %4091 = vmatpush3.bf16.msra.mxu1 %v4773_v30 }
 0x1b5   :  { %4092 = vmatprep.subr.bf16.mxu1 %v4774_v31 }
 0x1b7   :  { %4071 = vmatpush3.bf16.msra.mxu0 %v4759_v14 }
 0x1b8   :  { %4072 = vmatprep.subr.bf16.mxu0 %v4760_v15  ;;  %4093 = vmatpush3.bf16.msra.mxu1 %v4775_v32 }
 0x1b9   :  { %4094 = vmatprep.subr.bf16.mxu1 %v4776_v33 }
 0x1bb   :  { %4073 = vmatpush3.bf16.msra.mxu0 %v4761_v16 }
 0x1bc   :  { %4074 = vmatprep.subr.bf16.mxu0 %v4762_v17  ;;  %4095 = vmatpush3.bf16.msra.mxu1 %v4777_v34 }
 0x1bd   :  { %4096 = vmatprep.subr.bf16.mxu1 %v4778_v35 }
 0x1bf   :  { %4075 = vmatpush3.bf16.msra.mxu0 %v4763_v18 }
 0x1c0   :  { %4097 = vmatpush3.bf16.msra.mxu1 %v4779_v36 }
 0x1c2   :  { %3539 = vmatmul.mubr.bf16.vlgmr.msra.gmra.mxu0 %v3239_v19 }
 0x1c3   :  { %v2956_v37 = vpop.f32.mrf.mxu1 }
 0x1c4   :  { %v2957_v58 = vadd.f32 %v2956_v37, %v466_v54 }
 0x1c5   :  { %v2958_v38 = vpop.f32.mrf.mxu1 }
 0x1c6   :  { %v2959_v59 = vadd.f32 %v2958_v38, %v470_v55 }
 0x1c7   :  { %v2960_v39 = vpop.f32.mrf.mxu1 }
 0x1c8   :  { %v2961_v63 = vadd.f32 %v2960_v39, %v466_v54 }
 0x1c9   :  { %v2962_v40 = vpop.f32.mrf.mxu1 }
 0x1ca   :  { %v2963_v2 = vadd.f32 %v2962_v40, %v470_v55 }
 0x1e2   :  { %v2999_v41 = vpop.f32.mrf.mxu0 }
 0x1e3   :  { %v3000_v60 = vadd.f32 %v2999_v41, %v2957_v58 }
 0x1e4   :  { %v3001_v43 = vpop.f32.mrf.mxu0 }
 0x1e5   :  { %v3002_v0 = vadd.f32 %v3001_v43, %v2959_v59  ;;  %v4027_v43 = vld [vmem:[%s6324_s4] ss:$0 sm:$0xff] }
 0x1e6   :  { %v3003_v46 = vpop.f32.mrf.mxu0 }
 0x1e7   :  { %v3004_v3 = vadd.f32 %v3003_v46, %v2961_v63 }
 0x1e8   :  { %v3005_v49 = vpop.f32.mrf.mxu0 }
 0x1e9   :  { %v3006_v7 = vadd.f32 %v3005_v49, %v2963_v2 }
 0x203   :  { %v3042_v42 = vpop.f32.mrf.mxu1 }
 0x204   :  { %v3043_v1 = vadd.f32 %v3042_v42, %v3000_v60 }
 0x205   :  { %v3044_v44 = vpop.f32.mrf.mxu1 }
 0x206   :  { %v3045_v4 = vadd.f32 %v3044_v44, %v3002_v0 }
 0x207   :  { %v3046_v47 = vpop.f32.mrf.mxu1 }
 0x208   :  { %v3047_v8 = vadd.f32 %v3046_v47, %v3004_v3 }
 0x209   :  { %v3048_v50 = vpop.f32.mrf.mxu1 }
 0x20a   :  { %v3049_v12 = vadd.f32 %v3048_v50, %v3006_v7 }
 0x222   :  { %v3085_v51 = vpop.f32.mrf.mxu0 }
 0x223   :  { %v3086_v45 = vadd.f32 %v3085_v51, %v3043_v1 }
 0x224   :  { %v3087_v56 = vpop.f32.mrf.mxu0 }
 0x225   :  { %v3088_v9 = vadd.f32 %v3087_v56, %v3045_v4 }
 0x226   :  { %v3089_v61 = vpop.f32.mrf.mxu0 }
 0x227   :  { %v3090_v13 = vadd.f32 %v3089_v61, %v3047_v8 }
 0x228   :  { %v3091_v5 = vpop.f32.mrf.mxu0 }
 0x229   :  { %v3092_v18 = vadd.f32 %v3091_v5, %v3049_v12 }
 0x243   :  { %v3128_v53 = vpop.f32.mrf.mxu1 }
 0x244   :  { %v3129_v52 = vadd.f32 %v3128_v53, %v3086_v45 }
 0x245   :  { %v3130_v57 = vpop.f32.mrf.mxu1 }
 0x246   :  { %v3131_v14 = vadd.f32 %v3130_v57, %v3088_v9 }
 0x247   :  { %v3132_v62 = vpop.f32.mrf.mxu1 }
 0x248   :  { %v3133_v19 = vadd.f32 %v3132_v62, %v3090_v13 }
 0x249   :  { %v3134_v6 = vpop.f32.mrf.mxu1 }
 0x24a   :  { %v3135_v25 = vadd.f32 %v3134_v6, %v3092_v18 }
 0x262   :  { %v3171_v10 = vpop.f32.mrf.mxu0 }
 0x263   :  { %v3214_v11 = vpop.f32.mrf.mxu1  ;;  %v3172_v15 = vadd.f32 %v3171_v10, %v3129_v52 }
 0x264   :  { %v3173_v16 = vpop.f32.mrf.mxu0 }
 0x265   :  { %v3216_v17 = vpop.f32.mrf.mxu1  ;;  %v3215_v20 = vadd.f32 %v3214_v11, %v3172_v15  ;;  %v3174_v21 = vadd.f32 %v3173_v16, %v3131_v14 }
 0x266   :  { %v3175_v23 = vpop.f32.mrf.mxu0 }
 0x267   :  { %v3218_v24 = vpop.f32.mrf.mxu1  ;;  %v3225_v26 = vmax.f32 %v3215_v20, 0.0  ;;  %v3217_v27 = vadd.f32 %v3216_v17, %v3174_v21  ;;  %v3176_v28 = vadd.f32 %v3175_v23, %v3133_v19 }
 0x268   :  { %v3177_v29 = vpop.f32.mrf.mxu0 }
 0x269   :  { %3233 = vst [vmem:[%s6323_s5 + $0x10] sm:$0xff] %v3225_v26  ;;  %v3226_v30 = vmax.f32 %v3217_v27, 0.0  ;;  %v3219_v31 = vadd.f32 %v3218_v24, %v3176_v28  ;;  %v3178_v32 = vadd.f32 %v3177_v29, %v3135_v25  ;;  %v3220_v33 = vpop.f32.mrf.mxu1 }
 0x26b   :  { %3234 = vst [vmem:[%s6323_s5 + $0x18] sm:$0xff] %v3226_v30  ;;  %v3229_v34 = vmax.f32 %v3219_v31, 0.0  ;;  %v3221_v35 = vadd.f32 %v3220_v33, %v3178_v32 }
 0x26d   :  { %3237 = vst [vmem:[%s6323_s5 + $0x30] sm:$0xff] %v3229_v34  ;;  %v3230_v36 = vmax.f32 %v3221_v35, 0.0  ;;  %v3241_v38 = vpack.c.bf16 %v3229_v34, %v3225_v26 }
 0x26f   :  { %3238 = vst [vmem:[%s6323_s5 + $0x38] sm:$0xff] %v3230_v36  ;;  %v3242_v37 = vpack.c.bf16 %v3230_v36, %v3226_v30 }
 0x271   :  { %3579 = vmatprep.mubr.bf16.mxu1 %v3242_v37 }
 0x272   :  { %3580 = vmatmul.mubr.bf16.vlgmr.msra.gmra.mxu1 %v3241_v38 }
 0x282   :  { %v4076_v39 = vpop.f32.mrf.mxu0 }
 0x284   :  { %v4077_v40 = vpop.f32.mrf.mxu0 }
 0x285   :  { %v4078_v42 = vadd.f32 %v4077_v40, %v4076_v39 }
 0x286   :  { %v4079_v41 = vpop.f32.mrf.mxu0 }
 0x287   :  { %v3541_v48 = vadd.f32 %v4078_v42, %v4027_v43 }
 0x288   :  { %v4080_v44 = vpop.f32.mrf.mxu0 }
 0x289   :  { %v4081_v49 = vadd.f32 %v4080_v44, %v4079_v41 }
 0x28b   :  { %v3544_v54 = vadd.f32 %v4081_v49, %v4027_v43 }
 0x332   :  { %v4098_v46 = vpop.f32.mrf.mxu1 }
 0x334   :  { %v4099_v47 = vpop.f32.mrf.mxu1 }
 0x335   :  { %v4100_v50 = vadd.f32 %v4099_v47, %v4098_v46 }
 0x336   :  { %v4101_v22 = vpop.f32.mrf.mxu1 }
 0x337   :  { %v3582_v51 = vadd.f32 %v4100_v50, %v3541_v48 }
 0x338   :  { %v4102_v53 = vpop.f32.mrf.mxu1 }
 0x339   :  { %3588 = vst [vmem:[%s6325_s6] sm:$0xff] %v3582_v51  ;;  %v4103_v55 = vadd.f32 %v4102_v53, %v4101_v22 }
 0x33b   :  { %v3585_v56 = vadd.f32 %v4103_v55, %v3544_v54 }
 0x33d   :  { %3589 = vst [vmem:[%s6325_s6 + $0x8] sm:$0xff] %v3585_v56 }

</bundles_post_ra>
